<compile_context>
chip_gen: v7x
topology: tpu7x:2x2x1
jax: 0.10.0
libtpu: 0.0.40
codegen_flags: <defaults>
</compile_context>

<pallas_src>
import jax
import jax.numpy as jnp
from jax.experimental import pallas as pl
from jax.experimental.pallas import tpu as pltpu


# ----------------------------------------------------------------------------
# Fused per-sample kernel (grid = (B,), one sample per grid step).
#   p1   : (1, 256, 2048) int8   composed conv1/conv2 im2col, pixel-128
#   w1   : (16, 256)      bf16   conv1 weight (unscaled)
#   b1   : (16, 1)        f32    conv1 bias + (128/255)*rowsum(w1)  (shift fold)
#   w2   : (32, 256)      bf16   conv2 weight, columns ordered (i2, j2, oc1)
#   b2   : (32, 1)        f32
#   wfc1 : (32, 81, 256)  bf16   fc1 weight blocked by conv2 out-channel
#   bfc1 : (1, 256)       f32
#   wfc2 : (256, 128)     bf16   fc2 weight (transposed, N padded 4 -> 128)
#   bfc2 : (1, 128)       f32
#   out  : (1, 1, 128)    f32    lanes 0..3 hold the 4 Q-values
# ----------------------------------------------------------------------------
def _dqn_kernel(p1_ref, w1_ref, b1_ref, w2_ref, b2_ref,
                wfc1_ref, bfc1_ref, wfc2_ref, bfc2_ref, out_ref):
    # ---- conv1 evaluated at every pixel conv2 reads (composed im2col).
    # p1 holds (pixel - 128) as int8; the +128 shift is folded into b1.
    # int8 -> f32 -> bf16 is the safe / standard dequant conversion path.
    p = p1_ref[0].astype(jnp.float32).astype(jnp.bfloat16)            # (256, 2048)
    t = jnp.dot(w1_ref[...], p, preferred_element_type=jnp.float32)   # (16, 2048)
    # /255 applied as an f32 scale on the f32 accumulator (accuracy).
    t = jnp.maximum(t * (1.0 / 255.0) + b1_ref[...], 0.0).astype(jnp.bfloat16)

    # ---- conv2: stack the 16 kernel-offset blocks along sublanes (all lane
    # slices are 128-aligned) and do a single K=256 matmul.
    patch2 = jnp.concatenate([t[:, k * 128:(k + 1) * 128] for k in range(16)],
                             axis=0)                                   # (256, 128)
    h2 = jnp.dot(w2_ref[...], patch2, preferred_element_type=jnp.float32)
    h2 = jnp.maximum(h2 + b2_ref[...], 0.0)                            # (32, 128) f32

    # ---- fc1: 32 accumulated (1,81)x(81,256) matmuls.  No h2 -> fc_in
    # relayout; the rc-pad lanes 81..127 (garbage) never enter the contraction,
    # and wfc1 is stored unpadded so no zero rows are DMA'd from HBM.
    acc = bfc1_ref[...]                                                # (1, 256) f32
    for oc2 in range(32):
        lhs = h2[oc2:oc2 + 1, 0:81].astype(jnp.bfloat16)               # (1, 81)
        acc = acc + jnp.dot(lhs, wfc1_ref[oc2],
                            preferred_element_type=jnp.float32)
    c = jnp.maximum(acc, 0.0).astype(jnp.bfloat16)                     # (1, 256)

    # ---- fc2 epilogue (N padded 4 -> 128 with zero weights).
    res = jnp.dot(c, wfc2_ref[...],
                  preferred_element_type=jnp.float32) + bfc2_ref[...]  # (1, 128)
    out_ref[...] = res.reshape(1, 1, 128)


# ----------------------------------------------------------------------------
# Wrapper-side patch construction: composed conv1/conv2 im2col of the raw
# frame, built directly in the kernel's target order (batch-major), in int8.
#   p1[b, (ic,i1,j1), ((i2,j2), rc_pad)] = x[b, ic, 8r+4*i2+i1, 8c+4*j2+j1] - 128
# with rc = r*9 + c padded 81 -> 128 (zeros).
# ----------------------------------------------------------------------------
def _build_conv_patches(x):
    B = x.shape[0]
    xs = (x.astype(jnp.int16) - 128).astype(jnp.int8)     # 0..255 -> -128..127

    # conv1 im2col (k=8, s=4): 84 -> 20, rows ordered (ic, i1, j1)
    cols = []
    for i1 in range(8):
        for j1 in range(8):
            cols.append(xs[:, :, i1:i1 + 77:4, j1:j1 + 77:4])   # (B, 4, 20, 20)
    p1a = jnp.stack(cols, axis=2).reshape(B, 256, 20, 20)

    # conv2 im2col (k=4, s=2) composed on top: 20 -> 9, rc padded 81 -> 128.
    # Stacked straight into the final order: no transpose of the big buffer.
    blocks = []
    for i2 in range(4):
        for j2 in range(4):
            blk = p1a[:, :, i2:i2 + 17:2, j2:j2 + 17:2].reshape(B, 256, 81)
            blocks.append(jnp.pad(blk, ((0, 0), (0, 0), (0, 128 - 81))))
    return jnp.stack(blocks, axis=2).reshape(B, 256, 16 * 128)   # int8


# ----------------------------------------------------------------------------
# One-time static weight preparation (reshape / transpose / pad / cast).
# ----------------------------------------------------------------------------
def prepare_params(params):
    # conv1: keep the weight unscaled (the /255 is an f32 epilogue scale).
    w1 = params["conv1_w"].reshape(16, 4 * 8 * 8).astype(jnp.bfloat16)   # (16,256)
    # Fold the int8 "-128" input shift into the bias, using the bf16-rounded
    # weights so the shift cancels exactly inside the kernel.
    b1 = (params["conv1_b"].astype(jnp.float32)
          + (128.0 / 255.0) * w1.astype(jnp.float32).sum(axis=1)).reshape(16, 1)

    # conv2: columns ordered (i2, j2, oc1) to match the kernel's patch stacking.
    w2 = params["conv2_w"].transpose(0, 2, 3, 1).reshape(32, 256)
    w2 = w2.astype(jnp.bfloat16)                                         # (32,256)
    b2 = params["conv2_b"].reshape(32, 1).astype(jnp.float32)

    # fc1: torch weight is (256, 32*9*9) with input index oc2*81 + r*9 + c.
    # Store blocked by oc2, UNPADDED: (32, 81, 256).
    wfc1 = params["fc1_w"].reshape(256, 32, 81).transpose(1, 2, 0)
    wfc1 = wfc1.astype(jnp.bfloat16)                                     # (32,81,256)
    bfc1 = params["fc1_b"].reshape(1, 256).astype(jnp.float32)

    # fc2: transpose and pad N 4 -> 128 with zeros (only lanes 0..3 are used).
    wfc2 = jnp.zeros((256, 128), jnp.float32).at[:, :4].set(params["fc2_w"].T)
    wfc2 = wfc2.astype(jnp.bfloat16)
    bfc2 = jnp.zeros((1, 128), jnp.float32).at[0, :4].set(params["fc2_b"])

    return {"w1": w1, "b1": b1, "w2": w2, "b2": b2,
            "wfc1": wfc1, "bfc1": bfc1, "wfc2": wfc2, "bfc2": bfc2}


# ----------------------------------------------------------------------------
# Forward pass (jit this): tiny wrapper glue + one batched-grid pallas_call.
# ----------------------------------------------------------------------------
def dqn_forward(prep, x):
    B = x.shape[0]
    assert x.shape[1:] == (4, 84, 84), "DQNModel.fc1 pins the input to 4x84x84"
    p1 = _build_conv_patches(x)                                  # (B, 256, 2048) int8

    flops = B * 2 * (16 * 256 * 2048 + 32 * 256 * 128 + 32 * 81 * 256 + 256 * 128)
    bytes_accessed = (int(p1.size)                                # int8
                      + sum(int(v.size) * v.dtype.itemsize for v in prep.values())
                      + B * 128 * 4)

    # NOTE on scaling batch per generation: the per-step block is one sample
    # (~0.5 MiB patches + ~1.4 MiB resident weights), far below the 64 MiB VMEM
    # of v7x; only re-derive block sizes once samples-per-step is increased.
    out = pl.pallas_call(
        _dqn_kernel,
        out_shape=jax.ShapeDtypeStruct((B, 1, 128), jnp.float32),
        grid=(B,),
        in_specs=[
            pl.BlockSpec((1, 256, 2048), lambda b: (b, 0, 0)),    # p1 (per sample)
            pl.BlockSpec((16, 256), lambda b: (0, 0)),            # w1 (fetched once)
            pl.BlockSpec((16, 1), lambda b: (0, 0)),              # b1
            pl.BlockSpec((32, 256), lambda b: (0, 0)),            # w2
            pl.BlockSpec((32, 1), lambda b: (0, 0)),              # b2
            pl.BlockSpec((32, 81, 256), lambda b: (0, 0, 0)),     # wfc1 (unpadded)
            pl.BlockSpec((1, 256), lambda b: (0, 0)),             # bfc1
            pl.BlockSpec((256, 128), lambda b: (0, 0)),           # wfc2
            pl.BlockSpec((1, 128), lambda b: (0, 0)),             # bfc2
        ],
        out_specs=pl.BlockSpec((1, 1, 128), lambda b: (b, 0, 0)),
        cost_estimate=pl.CostEstimate(flops=flops, transcendentals=0,
                                      bytes_accessed=bytes_accessed),
        compiler_params=pltpu.CompilerParams(
            dimension_semantics=("parallel",),          # v7x: split batch over 2 TCs
            vmem_limit_bytes=32 * 1024 * 1024),
    )(p1, prep["w1"], prep["b1"], prep["w2"], prep["b2"],
      prep["wfc1"], prep["bfc1"], prep["wfc2"], prep["bfc2"])
    return out[:, 0, :4]


# ----------------------------------------------------------------------------
# Deterministic PyTorch-style init and a pure-JAX reference for sanity checks.
# ----------------------------------------------------------------------------
def init_params(key):
    def uni(k, shape, fan_in):
        bound = 1.0 / jnp.sqrt(jnp.float32(fan_in))
        return jax.random.uniform(k, shape, jnp.float32, -bound, bound)

    ks = jax.random.split(key, 8)
    return {
        "conv1_w": uni(ks[0], (16, 4, 8, 8), 4 * 8 * 8),
        "conv1_b": uni(ks[1], (16,), 4 * 8 * 8),
        "conv2_w": uni(ks[2], (32, 16, 4, 4), 16 * 4 * 4),
        "conv2_b": uni(ks[3], (32,), 16 * 4 * 4),
        "fc1_w":   uni(ks[4], (256, 32 * 9 * 9), 32 * 9 * 9),
        "fc1_b":   uni(ks[5], (256,), 32 * 9 * 9),
        "fc2_w":   uni(ks[6], (4, 256), 256),
        "fc2_b":   uni(ks[7], (4,), 256),
    }


def reference_forward(params, x):
    xf = x.astype(jnp.float32) / 255.0
    dn = ("NCHW", "OIHW", "NCHW")
    a = jax.lax.conv_general_dilated(xf, params["conv1_w"], (4, 4), "VALID",
                                     dimension_numbers=dn)
    a = jax.nn.relu(a + params["conv1_b"][None, :, None, None])
    b = jax.lax.conv_general_dilated(a, params["conv2_w"], (2, 2), "VALID",
                                     dimension_numbers=dn)
    b = jax.nn.relu(b + params["conv2_b"][None, :, None, None])
    flat = b.reshape(b.shape[0], 32 * 9 * 9)
    c = jax.nn.relu(flat @ params["fc1_w"].T + params["fc1_b"])
    return c @ params["fc2_w"].T + params["fc2_b"]


if __name__ == "__main__":
    key = jax.random.PRNGKey(0)
    k_params, k_x = jax.random.split(key)

    params = init_params(k_params)
    prep = prepare_params(params)          # static weight prep, done once

    # Synthetic uint8 "frame stack" input (batch=2, 4x84x84).
    x = jax.random.randint(k_x, (2, 4, 84, 84), 0, 256,
                           dtype=jnp.int32).astype(jnp.uint8)

    fwd = jax.jit(dqn_forward)
    out = jax.block_until_ready(fwd(prep, x))

    assert out.shape == (2, 4) and out.dtype == jnp.float32
    ref = jax.block_until_ready(reference_forward(params, x))
    assert bool(jnp.allclose(out, ref, rtol=5e-2, atol=5e-2)), "mismatch vs reference"

    print("KERNEL_OK")
</pallas_src>

<mosaic_0001>
module attributes {stable_mosaic.version = 11 : i64} {
  func.func @_dqn_kernel(%arg0: i32, %arg1: memref<1x256x2048xi8, #tpu.memory_space<vmem>>, %arg2: memref<16x256xbf16, #tpu.memory_space<vmem>>, %arg3: memref<16x1xf32, #tpu.memory_space<vmem>>, %arg4: memref<32x256xbf16, #tpu.memory_space<vmem>>, %arg5: memref<32x1xf32, #tpu.memory_space<vmem>>, %arg6: memref<32x81x256xbf16, #tpu.memory_space<vmem>>, %arg7: memref<1x256xf32, #tpu.memory_space<vmem>>, %arg8: memref<256x128xbf16, #tpu.memory_space<vmem>>, %arg9: memref<1x128xf32, #tpu.memory_space<vmem>>, %arg10: memref<1x1x128xf32, #tpu.memory_space<vmem>>) attributes {dimension_semantics = [#tpu.dimension_semantics<parallel>], iteration_bounds = array<i64: 2>, scalar_prefetch = 0 : i64, scratch_operands = 0 : i64, tpu.core_type = #tpu.core_type<tc>, window_params = [{transform_indices = @transform_0, window_bounds = array<i64: 1, 256, 2048>}, {pipeline_mode = #tpu.pipeline_mode<synchronous>, transform_indices = @transform_1, window_bounds = array<i64: 16, 256>}, {pipeline_mode = #tpu.pipeline_mode<synchronous>, transform_indices = @transform_2, window_bounds = array<i64: 16, 1>}, {pipeline_mode = #tpu.pipeline_mode<synchronous>, transform_indices = @transform_3, window_bounds = array<i64: 32, 256>}, {pipeline_mode = #tpu.pipeline_mode<synchronous>, transform_indices = @transform_4, window_bounds = array<i64: 32, 1>}, {pipeline_mode = #tpu.pipeline_mode<synchronous>, transform_indices = @transform_5, window_bounds = array<i64: 32, 81, 256>}, {pipeline_mode = #tpu.pipeline_mode<synchronous>, transform_indices = @transform_6, window_bounds = array<i64: 1, 256>}, {pipeline_mode = #tpu.pipeline_mode<synchronous>, transform_indices = @transform_7, window_bounds = array<i64: 256, 128>}, {pipeline_mode = #tpu.pipeline_mode<synchronous>, transform_indices = @transform_8, window_bounds = array<i64: 1, 128>}, {transform_indices = @transform_9, window_bounds = array<i64: 1, 1, 128>}]} {
    %c0 = arith.constant 0 : index
    %c0_0 = arith.constant 0 : index
    %c0_1 = arith.constant 0 : index
    %0 = vector.load %arg1[%c0, %c0_0, %c0_1] : memref<1x256x2048xi8, #tpu.memory_space<vmem>>, vector<1x256x2048xi8>
    %1 = vector.shape_cast %0 : vector<1x256x2048xi8> to vector<256x2048xi8>
    %2 = arith.sitofp %1 : vector<256x2048xi8> to vector<256x2048xf32>
    %3 = arith.truncf %2 : vector<256x2048xf32> to vector<256x2048xbf16>
    %c0_2 = arith.constant 0 : index
    %c0_3 = arith.constant 0 : index
    %4 = vector.load %arg2[%c0_2, %c0_3] : memref<16x256xbf16, #tpu.memory_space<vmem>>, vector<16x256xbf16>
    %cst = arith.constant dense<0.000000e+00> : vector<16x2048xf32>
    %5 = tpu.matmul %4, %3, %cst {dimension_numbers = #tpu.dot_dimension_numbers<[1], [0], [0], [1], [0, 0, 1, 1], [], []>} : vector<16x256xbf16>, vector<256x2048xbf16>, vector<16x2048xf32> -> vector<16x2048xf32>
    %cst_4 = arith.constant 0.00392156886 : f32
    %6 = vector.broadcast %cst_4 : f32 to vector<16x2048xf32>
    %7 = arith.mulf %5, %6 : vector<16x2048xf32>
    %c0_5 = arith.constant 0 : index
    %c0_6 = arith.constant 0 : index
    %8 = vector.load %arg3[%c0_5, %c0_6] : memref<16x1xf32, #tpu.memory_space<vmem>>, vector<16x1xf32>
    %9 = vector.broadcast %8 : vector<16x1xf32> to vector<16x2048xf32>
    %10 = arith.addf %7, %9 : vector<16x2048xf32>
    %cst_7 = arith.constant 0.000000e+00 : f32
    %11 = vector.broadcast %cst_7 : f32 to vector<16x2048xf32>
    %12 = arith.maximumf %10, %11 : vector<16x2048xf32>
    %13 = arith.truncf %12 : vector<16x2048xf32> to vector<16x2048xbf16>
    %14 = vector.extract_strided_slice %13 {offsets = [0, 0], sizes = [16, 128], strides = [1, 1]} : vector<16x2048xbf16> to vector<16x128xbf16>
    %15 = vector.extract_strided_slice %13 {offsets = [0, 128], sizes = [16, 128], strides = [1, 1]} : vector<16x2048xbf16> to vector<16x128xbf16>
    %16 = vector.extract_strided_slice %13 {offsets = [0, 256], sizes = [16, 128], strides = [1, 1]} : vector<16x2048xbf16> to vector<16x128xbf16>
    %17 = vector.extract_strided_slice %13 {offsets = [0, 384], sizes = [16, 128], strides = [1, 1]} : vector<16x2048xbf16> to vector<16x128xbf16>
    %18 = vector.extract_strided_slice %13 {offsets = [0, 512], sizes = [16, 128], strides = [1, 1]} : vector<16x2048xbf16> to vector<16x128xbf16>
    %19 = vector.extract_strided_slice %13 {offsets = [0, 640], sizes = [16, 128], strides = [1, 1]} : vector<16x2048xbf16> to vector<16x128xbf16>
    %20 = vector.extract_strided_slice %13 {offsets = [0, 768], sizes = [16, 128], strides = [1, 1]} : vector<16x2048xbf16> to vector<16x128xbf16>
    %21 = vector.extract_strided_slice %13 {offsets = [0, 896], sizes = [16, 128], strides = [1, 1]} : vector<16x2048xbf16> to vector<16x128xbf16>
    %22 = vector.extract_strided_slice %13 {offsets = [0, 1024], sizes = [16, 128], strides = [1, 1]} : vector<16x2048xbf16> to vector<16x128xbf16>
    %23 = vector.extract_strided_slice %13 {offsets = [0, 1152], sizes = [16, 128], strides = [1, 1]} : vector<16x2048xbf16> to vector<16x128xbf16>
    %24 = vector.extract_strided_slice %13 {offsets = [0, 1280], sizes = [16, 128], strides = [1, 1]} : vector<16x2048xbf16> to vector<16x128xbf16>
    %25 = vector.extract_strided_slice %13 {offsets = [0, 1408], sizes = [16, 128], strides = [1, 1]} : vector<16x2048xbf16> to vector<16x128xbf16>
    %26 = vector.extract_strided_slice %13 {offsets = [0, 1536], sizes = [16, 128], strides = [1, 1]} : vector<16x2048xbf16> to vector<16x128xbf16>
    %27 = vector.extract_strided_slice %13 {offsets = [0, 1664], sizes = [16, 128], strides = [1, 1]} : vector<16x2048xbf16> to vector<16x128xbf16>
    %28 = vector.extract_strided_slice %13 {offsets = [0, 1792], sizes = [16, 128], strides = [1, 1]} : vector<16x2048xbf16> to vector<16x128xbf16>
    %29 = vector.extract_strided_slice %13 {offsets = [0, 1920], sizes = [16, 128], strides = [1, 1]} : vector<16x2048xbf16> to vector<16x128xbf16>
    %30 = tpu.concatenate %14, %15, %16, %17, %18, %19, %20, %21, %22, %23, %24, %25, %26, %27, %28, %29 in 0 : vector<16x128xbf16>, vector<16x128xbf16>, vector<16x128xbf16>, vector<16x128xbf16>, vector<16x128xbf16>, vector<16x128xbf16>, vector<16x128xbf16>, vector<16x128xbf16>, vector<16x128xbf16>, vector<16x128xbf16>, vector<16x128xbf16>, vector<16x128xbf16>, vector<16x128xbf16>, vector<16x128xbf16>, vector<16x128xbf16>, vector<16x128xbf16> -> vector<256x128xbf16>
    %c0_8 = arith.constant 0 : index
    %c0_9 = arith.constant 0 : index
    %31 = vector.load %arg4[%c0_8, %c0_9] : memref<32x256xbf16, #tpu.memory_space<vmem>>, vector<32x256xbf16>
    %cst_10 = arith.constant dense<0.000000e+00> : vector<32x128xf32>
    %32 = tpu.matmul %31, %30, %cst_10 {dimension_numbers = #tpu.dot_dimension_numbers<[1], [0], [0], [1], [0, 0, 1, 1], [], []>} : vector<32x256xbf16>, vector<256x128xbf16>, vector<32x128xf32> -> vector<32x128xf32>
    %c0_11 = arith.constant 0 : index
    %c0_12 = arith.constant 0 : index
    %33 = vector.load %arg5[%c0_11, %c0_12] : memref<32x1xf32, #tpu.memory_space<vmem>>, vector<32x1xf32>
    %34 = vector.broadcast %33 : vector<32x1xf32> to vector<32x128xf32>
    %35 = arith.addf %32, %34 : vector<32x128xf32>
    %cst_13 = arith.constant 0.000000e+00 : f32
    %36 = vector.broadcast %cst_13 : f32 to vector<32x128xf32>
    %37 = arith.maximumf %35, %36 : vector<32x128xf32>
    %c0_14 = arith.constant 0 : index
    %c0_15 = arith.constant 0 : index
    %38 = vector.load %arg7[%c0_14, %c0_15] : memref<1x256xf32, #tpu.memory_space<vmem>>, vector<1x256xf32>
    %39 = vector.extract_strided_slice %37 {offsets = [0, 0], sizes = [1, 81], strides = [1, 1]} : vector<32x128xf32> to vector<1x81xf32>
    %40 = arith.truncf %39 : vector<1x81xf32> to vector<1x81xbf16>
    %c0_16 = arith.constant 0 : index
    %c0_17 = arith.constant 0 : index
    %c0_18 = arith.constant 0 : index
    %41 = vector.load %arg6[%c0_16, %c0_17, %c0_18] : memref<32x81x256xbf16, #tpu.memory_space<vmem>>, vector<1x81x256xbf16>
    %42 = vector.shape_cast %41 : vector<1x81x256xbf16> to vector<81x256xbf16>
    %cst_19 = arith.constant dense<0.000000e+00> : vector<1x256xf32>
    %43 = tpu.matmul %40, %42, %cst_19 {dimension_numbers = #tpu.dot_dimension_numbers<[1], [0], [0], [1], [0, 0, 1, 1], [], []>} : vector<1x81xbf16>, vector<81x256xbf16>, vector<1x256xf32> -> vector<1x256xf32>
    %44 = arith.addf %38, %43 : vector<1x256xf32>
    %45 = vector.extract_strided_slice %37 {offsets = [1, 0], sizes = [1, 81], strides = [1, 1]} : vector<32x128xf32> to vector<1x81xf32>
    %46 = arith.truncf %45 : vector<1x81xf32> to vector<1x81xbf16>
    %c1 = arith.constant 1 : index
    %c0_20 = arith.constant 0 : index
    %c0_21 = arith.constant 0 : index
    %47 = vector.load %arg6[%c1, %c0_20, %c0_21] : memref<32x81x256xbf16, #tpu.memory_space<vmem>>, vector<1x81x256xbf16>
    %48 = vector.shape_cast %47 : vector<1x81x256xbf16> to vector<81x256xbf16>
    %cst_22 = arith.constant dense<0.000000e+00> : vector<1x256xf32>
    %49 = tpu.matmul %46, %48, %cst_22 {dimension_numbers = #tpu.dot_dimension_numbers<[1], [0], [0], [1], [0, 0, 1, 1], [], []>} : vector<1x81xbf16>, vector<81x256xbf16>, vector<1x256xf32> -> vector<1x256xf32>
    %50 = arith.addf %44, %49 : vector<1x256xf32>
    %51 = vector.extract_strided_slice %37 {offsets = [2, 0], sizes = [1, 81], strides = [1, 1]} : vector<32x128xf32> to vector<1x81xf32>
    %52 = arith.truncf %51 : vector<1x81xf32> to vector<1x81xbf16>
    %c2 = arith.constant 2 : index
    %c0_23 = arith.constant 0 : index
    %c0_24 = arith.constant 0 : index
    %53 = vector.load %arg6[%c2, %c0_23, %c0_24] : memref<32x81x256xbf16, #tpu.memory_space<vmem>>, vector<1x81x256xbf16>
    %54 = vector.shape_cast %53 : vector<1x81x256xbf16> to vector<81x256xbf16>
    %cst_25 = arith.constant dense<0.000000e+00> : vector<1x256xf32>
    %55 = tpu.matmul %52, %54, %cst_25 {dimension_numbers = #tpu.dot_dimension_numbers<[1], [0], [0], [1], [0, 0, 1, 1], [], []>} : vector<1x81xbf16>, vector<81x256xbf16>, vector<1x256xf32> -> vector<1x256xf32>
    %56 = arith.addf %50, %55 : vector<1x256xf32>
    %57 = vector.extract_strided_slice %37 {offsets = [3, 0], sizes = [1, 81], strides = [1, 1]} : vector<32x128xf32> to vector<1x81xf32>
    %58 = arith.truncf %57 : vector<1x81xf32> to vector<1x81xbf16>
    %c3 = arith.constant 3 : index
    %c0_26 = arith.constant 0 : index
    %c0_27 = arith.constant 0 : index
    %59 = vector.load %arg6[%c3, %c0_26, %c0_27] : memref<32x81x256xbf16, #tpu.memory_space<vmem>>, vector<1x81x256xbf16>
    %60 = vector.shape_cast %59 : vector<1x81x256xbf16> to vector<81x256xbf16>
    %cst_28 = arith.constant dense<0.000000e+00> : vector<1x256xf32>
    %61 = tpu.matmul %58, %60, %cst_28 {dimension_numbers = #tpu.dot_dimension_numbers<[1], [0], [0], [1], [0, 0, 1, 1], [], []>} : vector<1x81xbf16>, vector<81x256xbf16>, vector<1x256xf32> -> vector<1x256xf32>
    %62 = arith.addf %56, %61 : vector<1x256xf32>
    %63 = vector.extract_strided_slice %37 {offsets = [4, 0], sizes = [1, 81], strides = [1, 1]} : vector<32x128xf32> to vector<1x81xf32>
    %64 = arith.truncf %63 : vector<1x81xf32> to vector<1x81xbf16>
    %c4 = arith.constant 4 : index
    %c0_29 = arith.constant 0 : index
    %c0_30 = arith.constant 0 : index
    %65 = vector.load %arg6[%c4, %c0_29, %c0_30] : memref<32x81x256xbf16, #tpu.memory_space<vmem>>, vector<1x81x256xbf16>
    %66 = vector.shape_cast %65 : vector<1x81x256xbf16> to vector<81x256xbf16>
    %cst_31 = arith.constant dense<0.000000e+00> : vector<1x256xf32>
    %67 = tpu.matmul %64, %66, %cst_31 {dimension_numbers = #tpu.dot_dimension_numbers<[1], [0], [0], [1], [0, 0, 1, 1], [], []>} : vector<1x81xbf16>, vector<81x256xbf16>, vector<1x256xf32> -> vector<1x256xf32>
    %68 = arith.addf %62, %67 : vector<1x256xf32>
    %69 = vector.extract_strided_slice %37 {offsets = [5, 0], sizes = [1, 81], strides = [1, 1]} : vector<32x128xf32> to vector<1x81xf32>
    %70 = arith.truncf %69 : vector<1x81xf32> to vector<1x81xbf16>
    %c5 = arith.constant 5 : index
    %c0_32 = arith.constant 0 : index
    %c0_33 = arith.constant 0 : index
    %71 = vector.load %arg6[%c5, %c0_32, %c0_33] : memref<32x81x256xbf16, #tpu.memory_space<vmem>>, vector<1x81x256xbf16>
    %72 = vector.shape_cast %71 : vector<1x81x256xbf16> to vector<81x256xbf16>
    %cst_34 = arith.constant dense<0.000000e+00> : vector<1x256xf32>
    %73 = tpu.matmul %70, %72, %cst_34 {dimension_numbers = #tpu.dot_dimension_numbers<[1], [0], [0], [1], [0, 0, 1, 1], [], []>} : vector<1x81xbf16>, vector<81x256xbf16>, vector<1x256xf32> -> vector<1x256xf32>
    %74 = arith.addf %68, %73 : vector<1x256xf32>
    %75 = vector.extract_strided_slice %37 {offsets = [6, 0], sizes = [1, 81], strides = [1, 1]} : vector<32x128xf32> to vector<1x81xf32>
    %76 = arith.truncf %75 : vector<1x81xf32> to vector<1x81xbf16>
    %c6 = arith.constant 6 : index
    %c0_35 = arith.constant 0 : index
    %c0_36 = arith.constant 0 : index
    %77 = vector.load %arg6[%c6, %c0_35, %c0_36] : memref<32x81x256xbf16, #tpu.memory_space<vmem>>, vector<1x81x256xbf16>
    %78 = vector.shape_cast %77 : vector<1x81x256xbf16> to vector<81x256xbf16>
    %cst_37 = arith.constant dense<0.000000e+00> : vector<1x256xf32>
    %79 = tpu.matmul %76, %78, %cst_37 {dimension_numbers = #tpu.dot_dimension_numbers<[1], [0], [0], [1], [0, 0, 1, 1], [], []>} : vector<1x81xbf16>, vector<81x256xbf16>, vector<1x256xf32> -> vector<1x256xf32>
    %80 = arith.addf %74, %79 : vector<1x256xf32>
    %81 = vector.extract_strided_slice %37 {offsets = [7, 0], sizes = [1, 81], strides = [1, 1]} : vector<32x128xf32> to vector<1x81xf32>
    %82 = arith.truncf %81 : vector<1x81xf32> to vector<1x81xbf16>
    %c7 = arith.constant 7 : index
    %c0_38 = arith.constant 0 : index
    %c0_39 = arith.constant 0 : index
    %83 = vector.load %arg6[%c7, %c0_38, %c0_39] : memref<32x81x256xbf16, #tpu.memory_space<vmem>>, vector<1x81x256xbf16>
    %84 = vector.shape_cast %83 : vector<1x81x256xbf16> to vector<81x256xbf16>
    %cst_40 = arith.constant dense<0.000000e+00> : vector<1x256xf32>
    %85 = tpu.matmul %82, %84, %cst_40 {dimension_numbers = #tpu.dot_dimension_numbers<[1], [0], [0], [1], [0, 0, 1, 1], [], []>} : vector<1x81xbf16>, vector<81x256xbf16>, vector<1x256xf32> -> vector<1x256xf32>
    %86 = arith.addf %80, %85 : vector<1x256xf32>
    %87 = vector.extract_strided_slice %37 {offsets = [8, 0], sizes = [1, 81], strides = [1, 1]} : vector<32x128xf32> to vector<1x81xf32>
    %88 = arith.truncf %87 : vector<1x81xf32> to vector<1x81xbf16>
    %c8 = arith.constant 8 : index
    %c0_41 = arith.constant 0 : index
    %c0_42 = arith.constant 0 : index
    %89 = vector.load %arg6[%c8, %c0_41, %c0_42] : memref<32x81x256xbf16, #tpu.memory_space<vmem>>, vector<1x81x256xbf16>
    %90 = vector.shape_cast %89 : vector<1x81x256xbf16> to vector<81x256xbf16>
    %cst_43 = arith.constant dense<0.000000e+00> : vector<1x256xf32>
    %91 = tpu.matmul %88, %90, %cst_43 {dimension_numbers = #tpu.dot_dimension_numbers<[1], [0], [0], [1], [0, 0, 1, 1], [], []>} : vector<1x81xbf16>, vector<81x256xbf16>, vector<1x256xf32> -> vector<1x256xf32>
    %92 = arith.addf %86, %91 : vector<1x256xf32>
    %93 = vector.extract_strided_slice %37 {offsets = [9, 0], sizes = [1, 81], strides = [1, 1]} : vector<32x128xf32> to vector<1x81xf32>
    %94 = arith.truncf %93 : vector<1x81xf32> to vector<1x81xbf16>
    %c9 = arith.constant 9 : index
    %c0_44 = arith.constant 0 : index
    %c0_45 = arith.constant 0 : index
    %95 = vector.load %arg6[%c9, %c0_44, %c0_45] : memref<32x81x256xbf16, #tpu.memory_space<vmem>>, vector<1x81x256xbf16>
    %96 = vector.shape_cast %95 : vector<1x81x256xbf16> to vector<81x256xbf16>
    %cst_46 = arith.constant dense<0.000000e+00> : vector<1x256xf32>
    %97 = tpu.matmul %94, %96, %cst_46 {dimension_numbers = #tpu.dot_dimension_numbers<[1], [0], [0], [1], [0, 0, 1, 1], [], []>} : vector<1x81xbf16>, vector<81x256xbf16>, vector<1x256xf32> -> vector<1x256xf32>
    %98 = arith.addf %92, %97 : vector<1x256xf32>
    %99 = vector.extract_strided_slice %37 {offsets = [10, 0], sizes = [1, 81], strides = [1, 1]} : vector<32x128xf32> to vector<1x81xf32>
    %100 = arith.truncf %99 : vector<1x81xf32> to vector<1x81xbf16>
    %c10 = arith.constant 10 : index
    %c0_47 = arith.constant 0 : index
    %c0_48 = arith.constant 0 : index
    %101 = vector.load %arg6[%c10, %c0_47, %c0_48] : memref<32x81x256xbf16, #tpu.memory_space<vmem>>, vector<1x81x256xbf16>
    %102 = vector.shape_cast %101 : vector<1x81x256xbf16> to vector<81x256xbf16>
    %cst_49 = arith.constant dense<0.000000e+00> : vector<1x256xf32>
    %103 = tpu.matmul %100, %102, %cst_49 {dimension_numbers = #tpu.dot_dimension_numbers<[1], [0], [0], [1], [0, 0, 1, 1], [], []>} : vector<1x81xbf16>, vector<81x256xbf16>, vector<1x256xf32> -> vector<1x256xf32>
    %104 = arith.addf %98, %103 : vector<1x256xf32>
    %105 = vector.extract_strided_slice %37 {offsets = [11, 0], sizes = [1, 81], strides = [1, 1]} : vector<32x128xf32> to vector<1x81xf32>
    %106 = arith.truncf %105 : vector<1x81xf32> to vector<1x81xbf16>
    %c11 = arith.constant 11 : index
    %c0_50 = arith.constant 0 : index
    %c0_51 = arith.constant 0 : index
    %107 = vector.load %arg6[%c11, %c0_50, %c0_51] : memref<32x81x256xbf16, #tpu.memory_space<vmem>>, vector<1x81x256xbf16>
    %108 = vector.shape_cast %107 : vector<1x81x256xbf16> to vector<81x256xbf16>
    %cst_52 = arith.constant dense<0.000000e+00> : vector<1x256xf32>
    %109 = tpu.matmul %106, %108, %cst_52 {dimension_numbers = #tpu.dot_dimension_numbers<[1], [0], [0], [1], [0, 0, 1, 1], [], []>} : vector<1x81xbf16>, vector<81x256xbf16>, vector<1x256xf32> -> vector<1x256xf32>
    %110 = arith.addf %104, %109 : vector<1x256xf32>
    %111 = vector.extract_strided_slice %37 {offsets = [12, 0], sizes = [1, 81], strides = [1, 1]} : vector<32x128xf32> to vector<1x81xf32>
    %112 = arith.truncf %111 : vector<1x81xf32> to vector<1x81xbf16>
    %c12 = arith.constant 12 : index
    %c0_53 = arith.constant 0 : index
    %c0_54 = arith.constant 0 : index
    %113 = vector.load %arg6[%c12, %c0_53, %c0_54] : memref<32x81x256xbf16, #tpu.memory_space<vmem>>, vector<1x81x256xbf16>
    %114 = vector.shape_cast %113 : vector<1x81x256xbf16> to vector<81x256xbf16>
    %cst_55 = arith.constant dense<0.000000e+00> : vector<1x256xf32>
    %115 = tpu.matmul %112, %114, %cst_55 {dimension_numbers = #tpu.dot_dimension_numbers<[1], [0], [0], [1], [0, 0, 1, 1], [], []>} : vector<1x81xbf16>, vector<81x256xbf16>, vector<1x256xf32> -> vector<1x256xf32>
    %116 = arith.addf %110, %115 : vector<1x256xf32>
    %117 = vector.extract_strided_slice %37 {offsets = [13, 0], sizes = [1, 81], strides = [1, 1]} : vector<32x128xf32> to vector<1x81xf32>
    %118 = arith.truncf %117 : vector<1x81xf32> to vector<1x81xbf16>
    %c13 = arith.constant 13 : index
    %c0_56 = arith.constant 0 : index
    %c0_57 = arith.constant 0 : index
    %119 = vector.load %arg6[%c13, %c0_56, %c0_57] : memref<32x81x256xbf16, #tpu.memory_space<vmem>>, vector<1x81x256xbf16>
    %120 = vector.shape_cast %119 : vector<1x81x256xbf16> to vector<81x256xbf16>
    %cst_58 = arith.constant dense<0.000000e+00> : vector<1x256xf32>
    %121 = tpu.matmul %118, %120, %cst_58 {dimension_numbers = #tpu.dot_dimension_numbers<[1], [0], [0], [1], [0, 0, 1, 1], [], []>} : vector<1x81xbf16>, vector<81x256xbf16>, vector<1x256xf32> -> vector<1x256xf32>
    %122 = arith.addf %116, %121 : vector<1x256xf32>
    %123 = vector.extract_strided_slice %37 {offsets = [14, 0], sizes = [1, 81], strides = [1, 1]} : vector<32x128xf32> to vector<1x81xf32>
    %124 = arith.truncf %123 : vector<1x81xf32> to vector<1x81xbf16>
    %c14 = arith.constant 14 : index
    %c0_59 = arith.constant 0 : index
    %c0_60 = arith.constant 0 : index
    %125 = vector.load %arg6[%c14, %c0_59, %c0_60] : memref<32x81x256xbf16, #tpu.memory_space<vmem>>, vector<1x81x256xbf16>
    %126 = vector.shape_cast %125 : vector<1x81x256xbf16> to vector<81x256xbf16>
    %cst_61 = arith.constant dense<0.000000e+00> : vector<1x256xf32>
    %127 = tpu.matmul %124, %126, %cst_61 {dimension_numbers = #tpu.dot_dimension_numbers<[1], [0], [0], [1], [0, 0, 1, 1], [], []>} : vector<1x81xbf16>, vector<81x256xbf16>, vector<1x256xf32> -> vector<1x256xf32>
    %128 = arith.addf %122, %127 : vector<1x256xf32>
    %129 = vector.extract_strided_slice %37 {offsets = [15, 0], sizes = [1, 81], strides = [1, 1]} : vector<32x128xf32> to vector<1x81xf32>
    %130 = arith.truncf %129 : vector<1x81xf32> to vector<1x81xbf16>
    %c15 = arith.constant 15 : index
    %c0_62 = arith.constant 0 : index
    %c0_63 = arith.constant 0 : index
    %131 = vector.load %arg6[%c15, %c0_62, %c0_63] : memref<32x81x256xbf16, #tpu.memory_space<vmem>>, vector<1x81x256xbf16>
    %132 = vector.shape_cast %131 : vector<1x81x256xbf16> to vector<81x256xbf16>
    %cst_64 = arith.constant dense<0.000000e+00> : vector<1x256xf32>
    %133 = tpu.matmul %130, %132, %cst_64 {dimension_numbers = #tpu.dot_dimension_numbers<[1], [0], [0], [1], [0, 0, 1, 1], [], []>} : vector<1x81xbf16>, vector<81x256xbf16>, vector<1x256xf32> -> vector<1x256xf32>
    %134 = arith.addf %128, %133 : vector<1x256xf32>
    %135 = vector.extract_strided_slice %37 {offsets = [16, 0], sizes = [1, 81], strides = [1, 1]} : vector<32x128xf32> to vector<1x81xf32>
    %136 = arith.truncf %135 : vector<1x81xf32> to vector<1x81xbf16>
    %c16 = arith.constant 16 : index
    %c0_65 = arith.constant 0 : index
    %c0_66 = arith.constant 0 : index
    %137 = vector.load %arg6[%c16, %c0_65, %c0_66] : memref<32x81x256xbf16, #tpu.memory_space<vmem>>, vector<1x81x256xbf16>
    %138 = vector.shape_cast %137 : vector<1x81x256xbf16> to vector<81x256xbf16>
    %cst_67 = arith.constant dense<0.000000e+00> : vector<1x256xf32>
    %139 = tpu.matmul %136, %138, %cst_67 {dimension_numbers = #tpu.dot_dimension_numbers<[1], [0], [0], [1], [0, 0, 1, 1], [], []>} : vector<1x81xbf16>, vector<81x256xbf16>, vector<1x256xf32> -> vector<1x256xf32>
    %140 = arith.addf %134, %139 : vector<1x256xf32>
    %141 = vector.extract_strided_slice %37 {offsets = [17, 0], sizes = [1, 81], strides = [1, 1]} : vector<32x128xf32> to vector<1x81xf32>
    %142 = arith.truncf %141 : vector<1x81xf32> to vector<1x81xbf16>
    %c17 = arith.constant 17 : index
    %c0_68 = arith.constant 0 : index
    %c0_69 = arith.constant 0 : index
    %143 = vector.load %arg6[%c17, %c0_68, %c0_69] : memref<32x81x256xbf16, #tpu.memory_space<vmem>>, vector<1x81x256xbf16>
    %144 = vector.shape_cast %143 : vector<1x81x256xbf16> to vector<81x256xbf16>
    %cst_70 = arith.constant dense<0.000000e+00> : vector<1x256xf32>
    %145 = tpu.matmul %142, %144, %cst_70 {dimension_numbers = #tpu.dot_dimension_numbers<[1], [0], [0], [1], [0, 0, 1, 1], [], []>} : vector<1x81xbf16>, vector<81x256xbf16>, vector<1x256xf32> -> vector<1x256xf32>
    %146 = arith.addf %140, %145 : vector<1x256xf32>
    %147 = vector.extract_strided_slice %37 {offsets = [18, 0], sizes = [1, 81], strides = [1, 1]} : vector<32x128xf32> to vector<1x81xf32>
    %148 = arith.truncf %147 : vector<1x81xf32> to vector<1x81xbf16>
    %c18 = arith.constant 18 : index
    %c0_71 = arith.constant 0 : index
    %c0_72 = arith.constant 0 : index
    %149 = vector.load %arg6[%c18, %c0_71, %c0_72] : memref<32x81x256xbf16, #tpu.memory_space<vmem>>, vector<1x81x256xbf16>
    %150 = vector.shape_cast %149 : vector<1x81x256xbf16> to vector<81x256xbf16>
    %cst_73 = arith.constant dense<0.000000e+00> : vector<1x256xf32>
    %151 = tpu.matmul %148, %150, %cst_73 {dimension_numbers = #tpu.dot_dimension_numbers<[1], [0], [0], [1], [0, 0, 1, 1], [], []>} : vector<1x81xbf16>, vector<81x256xbf16>, vector<1x256xf32> -> vector<1x256xf32>
    %152 = arith.addf %146, %151 : vector<1x256xf32>
    %153 = vector.extract_strided_slice %37 {offsets = [19, 0], sizes = [1, 81], strides = [1, 1]} : vector<32x128xf32> to vector<1x81xf32>
    %154 = arith.truncf %153 : vector<1x81xf32> to vector<1x81xbf16>
    %c19 = arith.constant 19 : index
    %c0_74 = arith.constant 0 : index
    %c0_75 = arith.constant 0 : index
    %155 = vector.load %arg6[%c19, %c0_74, %c0_75] : memref<32x81x256xbf16, #tpu.memory_space<vmem>>, vector<1x81x256xbf16>
    %156 = vector.shape_cast %155 : vector<1x81x256xbf16> to vector<81x256xbf16>
    %cst_76 = arith.constant dense<0.000000e+00> : vector<1x256xf32>
    %157 = tpu.matmul %154, %156, %cst_76 {dimension_numbers = #tpu.dot_dimension_numbers<[1], [0], [0], [1], [0, 0, 1, 1], [], []>} : vector<1x81xbf16>, vector<81x256xbf16>, vector<1x256xf32> -> vector<1x256xf32>
    %158 = arith.addf %152, %157 : vector<1x256xf32>
    %159 = vector.extract_strided_slice %37 {offsets = [20, 0], sizes = [1, 81], strides = [1, 1]} : vector<32x128xf32> to vector<1x81xf32>
    %160 = arith.truncf %159 : vector<1x81xf32> to vector<1x81xbf16>
    %c20 = arith.constant 20 : index
    %c0_77 = arith.constant 0 : index
    %c0_78 = arith.constant 0 : index
    %161 = vector.load %arg6[%c20, %c0_77, %c0_78] : memref<32x81x256xbf16, #tpu.memory_space<vmem>>, vector<1x81x256xbf16>
    %162 = vector.shape_cast %161 : vector<1x81x256xbf16> to vector<81x256xbf16>
    %cst_79 = arith.constant dense<0.000000e+00> : vector<1x256xf32>
    %163 = tpu.matmul %160, %162, %cst_79 {dimension_numbers = #tpu.dot_dimension_numbers<[1], [0], [0], [1], [0, 0, 1, 1], [], []>} : vector<1x81xbf16>, vector<81x256xbf16>, vector<1x256xf32> -> vector<1x256xf32>
    %164 = arith.addf %158, %163 : vector<1x256xf32>
    %165 = vector.extract_strided_slice %37 {offsets = [21, 0], sizes = [1, 81], strides = [1, 1]} : vector<32x128xf32> to vector<1x81xf32>
    %166 = arith.truncf %165 : vector<1x81xf32> to vector<1x81xbf16>
    %c21 = arith.constant 21 : index
    %c0_80 = arith.constant 0 : index
    %c0_81 = arith.constant 0 : index
    %167 = vector.load %arg6[%c21, %c0_80, %c0_81] : memref<32x81x256xbf16, #tpu.memory_space<vmem>>, vector<1x81x256xbf16>
    %168 = vector.shape_cast %167 : vector<1x81x256xbf16> to vector<81x256xbf16>
    %cst_82 = arith.constant dense<0.000000e+00> : vector<1x256xf32>
    %169 = tpu.matmul %166, %168, %cst_82 {dimension_numbers = #tpu.dot_dimension_numbers<[1], [0], [0], [1], [0, 0, 1, 1], [], []>} : vector<1x81xbf16>, vector<81x256xbf16>, vector<1x256xf32> -> vector<1x256xf32>
    %170 = arith.addf %164, %169 : vector<1x256xf32>
    %171 = vector.extract_strided_slice %37 {offsets = [22, 0], sizes = [1, 81], strides = [1, 1]} : vector<32x128xf32> to vector<1x81xf32>
    %172 = arith.truncf %171 : vector<1x81xf32> to vector<1x81xbf16>
    %c22 = arith.constant 22 : index
    %c0_83 = arith.constant 0 : index
    %c0_84 = arith.constant 0 : index
    %173 = vector.load %arg6[%c22, %c0_83, %c0_84] : memref<32x81x256xbf16, #tpu.memory_space<vmem>>, vector<1x81x256xbf16>
    %174 = vector.shape_cast %173 : vector<1x81x256xbf16> to vector<81x256xbf16>
    %cst_85 = arith.constant dense<0.000000e+00> : vector<1x256xf32>
    %175 = tpu.matmul %172, %174, %cst_85 {dimension_numbers = #tpu.dot_dimension_numbers<[1], [0], [0], [1], [0, 0, 1, 1], [], []>} : vector<1x81xbf16>, vector<81x256xbf16>, vector<1x256xf32> -> vector<1x256xf32>
    %176 = arith.addf %170, %175 : vector<1x256xf32>
    %177 = vector.extract_strided_slice %37 {offsets = [23, 0], sizes = [1, 81], strides = [1, 1]} : vector<32x128xf32> to vector<1x81xf32>
    %178 = arith.truncf %177 : vector<1x81xf32> to vector<1x81xbf16>
    %c23 = arith.constant 23 : index
    %c0_86 = arith.constant 0 : index
    %c0_87 = arith.constant 0 : index
    %179 = vector.load %arg6[%c23, %c0_86, %c0_87] : memref<32x81x256xbf16, #tpu.memory_space<vmem>>, vector<1x81x256xbf16>
    %180 = vector.shape_cast %179 : vector<1x81x256xbf16> to vector<81x256xbf16>
    %cst_88 = arith.constant dense<0.000000e+00> : vector<1x256xf32>
    %181 = tpu.matmul %178, %180, %cst_88 {dimension_numbers = #tpu.dot_dimension_numbers<[1], [0], [0], [1], [0, 0, 1, 1], [], []>} : vector<1x81xbf16>, vector<81x256xbf16>, vector<1x256xf32> -> vector<1x256xf32>
    %182 = arith.addf %176, %181 : vector<1x256xf32>
    %183 = vector.extract_strided_slice %37 {offsets = [24, 0], sizes = [1, 81], strides = [1, 1]} : vector<32x128xf32> to vector<1x81xf32>
    %184 = arith.truncf %183 : vector<1x81xf32> to vector<1x81xbf16>
    %c24 = arith.constant 24 : index
    %c0_89 = arith.constant 0 : index
    %c0_90 = arith.constant 0 : index
    %185 = vector.load %arg6[%c24, %c0_89, %c0_90] : memref<32x81x256xbf16, #tpu.memory_space<vmem>>, vector<1x81x256xbf16>
    %186 = vector.shape_cast %185 : vector<1x81x256xbf16> to vector<81x256xbf16>
    %cst_91 = arith.constant dense<0.000000e+00> : vector<1x256xf32>
    %187 = tpu.matmul %184, %186, %cst_91 {dimension_numbers = #tpu.dot_dimension_numbers<[1], [0], [0], [1], [0, 0, 1, 1], [], []>} : vector<1x81xbf16>, vector<81x256xbf16>, vector<1x256xf32> -> vector<1x256xf32>
    %188 = arith.addf %182, %187 : vector<1x256xf32>
    %189 = vector.extract_strided_slice %37 {offsets = [25, 0], sizes = [1, 81], strides = [1, 1]} : vector<32x128xf32> to vector<1x81xf32>
    %190 = arith.truncf %189 : vector<1x81xf32> to vector<1x81xbf16>
    %c25 = arith.constant 25 : index
    %c0_92 = arith.constant 0 : index
    %c0_93 = arith.constant 0 : index
    %191 = vector.load %arg6[%c25, %c0_92, %c0_93] : memref<32x81x256xbf16, #tpu.memory_space<vmem>>, vector<1x81x256xbf16>
    %192 = vector.shape_cast %191 : vector<1x81x256xbf16> to vector<81x256xbf16>
    %cst_94 = arith.constant dense<0.000000e+00> : vector<1x256xf32>
    %193 = tpu.matmul %190, %192, %cst_94 {dimension_numbers = #tpu.dot_dimension_numbers<[1], [0], [0], [1], [0, 0, 1, 1], [], []>} : vector<1x81xbf16>, vector<81x256xbf16>, vector<1x256xf32> -> vector<1x256xf32>
    %194 = arith.addf %188, %193 : vector<1x256xf32>
    %195 = vector.extract_strided_slice %37 {offsets = [26, 0], sizes = [1, 81], strides = [1, 1]} : vector<32x128xf32> to vector<1x81xf32>
    %196 = arith.truncf %195 : vector<1x81xf32> to vector<1x81xbf16>
    %c26 = arith.constant 26 : index
    %c0_95 = arith.constant 0 : index
    %c0_96 = arith.constant 0 : index
    %197 = vector.load %arg6[%c26, %c0_95, %c0_96] : memref<32x81x256xbf16, #tpu.memory_space<vmem>>, vector<1x81x256xbf16>
    %198 = vector.shape_cast %197 : vector<1x81x256xbf16> to vector<81x256xbf16>
    %cst_97 = arith.constant dense<0.000000e+00> : vector<1x256xf32>
    %199 = tpu.matmul %196, %198, %cst_97 {dimension_numbers = #tpu.dot_dimension_numbers<[1], [0], [0], [1], [0, 0, 1, 1], [], []>} : vector<1x81xbf16>, vector<81x256xbf16>, vector<1x256xf32> -> vector<1x256xf32>
    %200 = arith.addf %194, %199 : vector<1x256xf32>
    %201 = vector.extract_strided_slice %37 {offsets = [27, 0], sizes = [1, 81], strides = [1, 1]} : vector<32x128xf32> to vector<1x81xf32>
    %202 = arith.truncf %201 : vector<1x81xf32> to vector<1x81xbf16>
    %c27 = arith.constant 27 : index
    %c0_98 = arith.constant 0 : index
    %c0_99 = arith.constant 0 : index
    %203 = vector.load %arg6[%c27, %c0_98, %c0_99] : memref<32x81x256xbf16, #tpu.memory_space<vmem>>, vector<1x81x256xbf16>
    %204 = vector.shape_cast %203 : vector<1x81x256xbf16> to vector<81x256xbf16>
    %cst_100 = arith.constant dense<0.000000e+00> : vector<1x256xf32>
    %205 = tpu.matmul %202, %204, %cst_100 {dimension_numbers = #tpu.dot_dimension_numbers<[1], [0], [0], [1], [0, 0, 1, 1], [], []>} : vector<1x81xbf16>, vector<81x256xbf16>, vector<1x256xf32> -> vector<1x256xf32>
    %206 = arith.addf %200, %205 : vector<1x256xf32>
    %207 = vector.extract_strided_slice %37 {offsets = [28, 0], sizes = [1, 81], strides = [1, 1]} : vector<32x128xf32> to vector<1x81xf32>
    %208 = arith.truncf %207 : vector<1x81xf32> to vector<1x81xbf16>
    %c28 = arith.constant 28 : index
    %c0_101 = arith.constant 0 : index
    %c0_102 = arith.constant 0 : index
    %209 = vector.load %arg6[%c28, %c0_101, %c0_102] : memref<32x81x256xbf16, #tpu.memory_space<vmem>>, vector<1x81x256xbf16>
    %210 = vector.shape_cast %209 : vector<1x81x256xbf16> to vector<81x256xbf16>
    %cst_103 = arith.constant dense<0.000000e+00> : vector<1x256xf32>
    %211 = tpu.matmul %208, %210, %cst_103 {dimension_numbers = #tpu.dot_dimension_numbers<[1], [0], [0], [1], [0, 0, 1, 1], [], []>} : vector<1x81xbf16>, vector<81x256xbf16>, vector<1x256xf32> -> vector<1x256xf32>
    %212 = arith.addf %206, %211 : vector<1x256xf32>
    %213 = vector.extract_strided_slice %37 {offsets = [29, 0], sizes = [1, 81], strides = [1, 1]} : vector<32x128xf32> to vector<1x81xf32>
    %214 = arith.truncf %213 : vector<1x81xf32> to vector<1x81xbf16>
    %c29 = arith.constant 29 : index
    %c0_104 = arith.constant 0 : index
    %c0_105 = arith.constant 0 : index
    %215 = vector.load %arg6[%c29, %c0_104, %c0_105] : memref<32x81x256xbf16, #tpu.memory_space<vmem>>, vector<1x81x256xbf16>
    %216 = vector.shape_cast %215 : vector<1x81x256xbf16> to vector<81x256xbf16>
    %cst_106 = arith.constant dense<0.000000e+00> : vector<1x256xf32>
    %217 = tpu.matmul %214, %216, %cst_106 {dimension_numbers = #tpu.dot_dimension_numbers<[1], [0], [0], [1], [0, 0, 1, 1], [], []>} : vector<1x81xbf16>, vector<81x256xbf16>, vector<1x256xf32> -> vector<1x256xf32>
    %218 = arith.addf %212, %217 : vector<1x256xf32>
    %219 = vector.extract_strided_slice %37 {offsets = [30, 0], sizes = [1, 81], strides = [1, 1]} : vector<32x128xf32> to vector<1x81xf32>
    %220 = arith.truncf %219 : vector<1x81xf32> to vector<1x81xbf16>
    %c30 = arith.constant 30 : index
    %c0_107 = arith.constant 0 : index
    %c0_108 = arith.constant 0 : index
    %221 = vector.load %arg6[%c30, %c0_107, %c0_108] : memref<32x81x256xbf16, #tpu.memory_space<vmem>>, vector<1x81x256xbf16>
    %222 = vector.shape_cast %221 : vector<1x81x256xbf16> to vector<81x256xbf16>
    %cst_109 = arith.constant dense<0.000000e+00> : vector<1x256xf32>
    %223 = tpu.matmul %220, %222, %cst_109 {dimension_numbers = #tpu.dot_dimension_numbers<[1], [0], [0], [1], [0, 0, 1, 1], [], []>} : vector<1x81xbf16>, vector<81x256xbf16>, vector<1x256xf32> -> vector<1x256xf32>
    %224 = arith.addf %218, %223 : vector<1x256xf32>
    %225 = vector.extract_strided_slice %37 {offsets = [31, 0], sizes = [1, 81], strides = [1, 1]} : vector<32x128xf32> to vector<1x81xf32>
    %226 = arith.truncf %225 : vector<1x81xf32> to vector<1x81xbf16>
    %c31 = arith.constant 31 : index
    %c0_110 = arith.constant 0 : index
    %c0_111 = arith.constant 0 : index
    %227 = vector.load %arg6[%c31, %c0_110, %c0_111] : memref<32x81x256xbf16, #tpu.memory_space<vmem>>, vector<1x81x256xbf16>
    %228 = vector.shape_cast %227 : vector<1x81x256xbf16> to vector<81x256xbf16>
    %cst_112 = arith.constant dense<0.000000e+00> : vector<1x256xf32>
    %229 = tpu.matmul %226, %228, %cst_112 {dimension_numbers = #tpu.dot_dimension_numbers<[1], [0], [0], [1], [0, 0, 1, 1], [], []>} : vector<1x81xbf16>, vector<81x256xbf16>, vector<1x256xf32> -> vector<1x256xf32>
    %230 = arith.addf %224, %229 : vector<1x256xf32>
    %cst_113 = arith.constant 0.000000e+00 : f32
    %231 = vector.broadcast %cst_113 : f32 to vector<1x256xf32>
    %232 = arith.maximumf %230, %231 : vector<1x256xf32>
    %233 = arith.truncf %232 : vector<1x256xf32> to vector<1x256xbf16>
    %c0_114 = arith.constant 0 : index
    %c0_115 = arith.constant 0 : index
    %234 = vector.load %arg8[%c0_114, %c0_115] : memref<256x128xbf16, #tpu.memory_space<vmem>>, vector<256x128xbf16>
    %cst_116 = arith.constant dense<0.000000e+00> : vector<1x128xf32>
    %235 = tpu.matmul %233, %234, %cst_116 {dimension_numbers = #tpu.dot_dimension_numbers<[1], [0], [0], [1], [0, 0, 1, 1], [], []>} : vector<1x256xbf16>, vector<256x128xbf16>, vector<1x128xf32> -> vector<1x128xf32>
    %c0_117 = arith.constant 0 : index
    %c0_118 = arith.constant 0 : index
    %236 = vector.load %arg9[%c0_117, %c0_118] : memref<1x128xf32, #tpu.memory_space<vmem>>, vector<1x128xf32>
    %237 = arith.addf %235, %236 : vector<1x128xf32>
    %238 = vector.shape_cast %237 : vector<1x128xf32> to vector<1x1x128xf32>
    %c0_119 = arith.constant 0 : index
    %c0_120 = arith.constant 0 : index
    %c0_121 = arith.constant 0 : index
    %239 = vector.load %arg10[%c0_119, %c0_120, %c0_121] : memref<1x1x128xf32, #tpu.memory_space<vmem>>, vector<1x1x128xf32>
    tpu.vector_store %arg10[%c0_119, %c0_120, %c0_121], %238 {strides = array<i32>} : memref<1x1x128xf32, #tpu.memory_space<vmem>>, vector<1x1x128xf32>,
    return
  }
  func.func @transform_0(%arg0: i32) -> (i32, i32, i32) {
    %c0_i32 = arith.constant 0 : i32
    %c0_i32_0 = arith.constant 0 : i32
    %c0_i32_1 = arith.constant 0 : i32
    return %arg0, %c0_i32, %c0_i32_0 : i32, i32, i32
  }
  func.func @transform_1(%arg0: i32) -> (i32, i32) {
    %c0_i32 = arith.constant 0 : i32
    %c0_i32_0 = arith.constant 0 : i32
    %c0_i32_1 = arith.constant 0 : i32
    return %c0_i32, %c0_i32_0 : i32, i32
  }
  func.func @transform_2(%arg0: i32) -> (i32, i32) {
    %c0_i32 = arith.constant 0 : i32
    %c0_i32_0 = arith.constant 0 : i32
    %c0_i32_1 = arith.constant 0 : i32
    return %c0_i32, %c0_i32_0 : i32, i32
  }
  func.func @transform_3(%arg0: i32) -> (i32, i32) {
    %c0_i32 = arith.constant 0 : i32
    %c0_i32_0 = arith.constant 0 : i32
    %c0_i32_1 = arith.constant 0 : i32
    return %c0_i32, %c0_i32_0 : i32, i32
  }
  func.func @transform_4(%arg0: i32) -> (i32, i32) {
    %c0_i32 = arith.constant 0 : i32
    %c0_i32_0 = arith.constant 0 : i32
    %c0_i32_1 = arith.constant 0 : i32
    return %c0_i32, %c0_i32_0 : i32, i32
  }
  func.func @transform_5(%arg0: i32) -> (i32, i32, i32) {
    %c0_i32 = arith.constant 0 : i32
    %c0_i32_0 = arith.constant 0 : i32
    %c0_i32_1 = arith.constant 0 : i32
    %c0_i32_2 = arith.constant 0 : i32
    return %c0_i32, %c0_i32_0, %c0_i32_1 : i32, i32, i32
  }
  func.func @transform_6(%arg0: i32) -> (i32, i32) {
    %c0_i32 = arith.constant 0 : i32
    %c0_i32_0 = arith.constant 0 : i32
    %c0_i32_1 = arith.constant 0 : i32
    return %c0_i32, %c0_i32_0 : i32, i32
  }
  func.func @transform_7(%arg0: i32) -> (i32, i32) {
    %c0_i32 = arith.constant 0 : i32
    %c0_i32_0 = arith.constant 0 : i32
    %c0_i32_1 = arith.constant 0 : i32
    return %c0_i32, %c0_i32_0 : i32, i32
  }
  func.func @transform_8(%arg0: i32) -> (i32, i32) {
    %c0_i32 = arith.constant 0 : i32
    %c0_i32_0 = arith.constant 0 : i32
    %c0_i32_1 = arith.constant 0 : i32
    return %c0_i32, %c0_i32_0 : i32, i32
  }
  func.func @transform_9(%arg0: i32) -> (i32, i32, i32) {
    %c0_i32 = arith.constant 0 : i32
    %c0_i32_0 = arith.constant 0 : i32
    %c0_i32_1 = arith.constant 0 : i32
    return %arg0, %c0_i32, %c0_i32_0 : i32, i32, i32
  }
}

</mosaic_0001>

<bundles_post_ra>
// kernel: dqn_forward.1
= control target key start
LH: loop header
LB: loop body
LE: loop exit
PB: predicated region body
PF: predicated region fallthrough
CT: control target
= control target key end

     0   :  { %14 = vsyncpa [#allocation3], 0  ;;  %s9311_s0 = inlined_call_operand.vmem [shape: s8[2,256,2048], index: 0, kind: input, shape index: {}]   ;;  %s9312_s1 = inlined_call_operand.vmem [shape: bf16[16,256], index: 1, kind: input, shape index: {}]   ;;  %s9313_s2 = inlined_call_operand.vmem [shape: f32[16,1], index: 2, kind: input, shape index: {}]   ;;  %s9314_s3 = inlined_call_operand.vmem [shape: bf16[32,256], index: 3, kind: input, shape index: {}]   ;;  %s9315_s4 = inlined_call_operand.vmem [shape: f32[32,1], index: 4, kind: input, shape index: {}]   ;;  %s9316_s5 = inlined_call_operand.vmem [shape: bf16[32,81,256], index: 5, kind: input, shape index: {}]   ;;  %s9317_s6 = inlined_call_operand.vmem [shape: f32[1,256], index: 6, kind: input, shape index: {}]   ;;  %s9318_s7 = inlined_call_operand.vmem [shape: bf16[256,128], index: 7, kind: input, shape index: {}]   ;;  %s9319_s8 = inlined_call_operand.vmem [shape: f32[1,128], index: 8, kind: input, shape index: {}]   ;;  %s9320_s9 = inlined_call_operand.hbm [shape: f32[2,1,128], index: 9, kind: output, shape index: {}]  }
   0x1   :  { %16 = vsyncpa [#allocation3 + $0x1], 0  ;;  %s7514_s30 = smov 0   ;;  %s7516_s10 = smov 0  }
   0x2   :  { %s7518_s11 = smov 0   ;;  %s7520_s12 = smov 0  }
   0x3 LB: > { %s7535_s13 = sadd.s32 4294967295, %s7459_s12   ;;  %s5944_s14 = sadd.s32 4294967294, %s7459_s12   ;;  %s7459_s12 = sphi %s7520_s12, %s9326_s12   ;;  %s7455_s11 = sphi %s7518_s11, %s9325_s11   ;;  %s7451_s10 = sphi %s7516_s10, %s9324_s10   ;;  %s7447_s30 = sphi %s7514_s30, %s9323_s30  }
   0x4   : > { %s7539_s15 = sadd.s32 1, %s7459_s12   ;;  %s223_s16 = sadd.s32 1, %s7455_s11 }
   0x5   : > { %s220_s17 = ssub.s32 %s7459_s12, %s7539_s15  ;;  %p233_p0 = scmp.ne.s32.totalorder %s7455_s11, %s7451_s10 }
   0x6   : > { %p221_p1 = scmp.eq.s32.totalorder %s220_s17, 0  ;;  %p234_p2 = scmp.eq.s32.totalorder %s7535_s13, 1 }
   0x7   : > { %p239_p3 = scmp.ne.s32.totalorder %s7451_s10, %s7447_s30  ;;  %p240_p4 = scmp.eq.s32.totalorder %s5944_s14, 1 }
   0x8   : > { %s7550_s18 = scalar_select %p221_p1, %s7455_s11, %s223_s16  }
   0x9   : > { %p7552_p5 = por %p234_p2, %p233_p0  ;;  %p7556_p6 = por %p240_p4, %p239_p3 }
   0xa   : > { %p5947_p7 = scmp.ge.s32.totalorder %s7459_s12, 1  ;;  %p290_p8 = scmp.lt.s32.totalorder %s7459_s12, 3 }
   0xc   : > { %p291_p9 = pnand %p5947_p7, %p290_p8 }
   0xd   : > { %p325_p10 = scmp.lt.s32.totalorder (!%p291_p9), %s7535_s13, 1  ;;  %v7566_v0 = vld [vmem:[%s9312_s1 + $0x4] ss:$8 sps:$4 sm:$0xff] (!%p291_p9)   ;;  %vm1368_vm0 = vcmask (!%p291_p9), 1040384   ;;  %vm1364_vm1 = vcmask (!%p291_p9), 662528   ;;  %s6729_s28 = sshll.u32 (!%p291_p9), %s7535_s13, 4 }
   0xe   : > { %294 = sbr.rel (%p291_p9) target bundleno = 1586 (0x632), region = 56  ;;  %759 = vmatprep.mubr.bf16.mxu0 (!%p291_p9), %v7566_v0  ;;  %802 = vmatprep.mubr.bf16.mxu1 (!%p291_p9), %v7566_v0  ;;  %s9269_s17 = scalar_lea.hbm (!%p291_p9), %s9320_s9, %s6729_s28 }
  0x15   : > { %s326_s23 = scalar_select %p325_p10, %s7535_s13, 1 }
  0x16   : > { %s7463_s13 = smov [#allocation2]  }
  0x17   : > { %s6732_s24 = sshll.u32 %s326_s23, 10  ;;  %s7401_s23 = sshll.u32 %s7463_s13, 4  ;;  %s7402_s23 = int_to_ptr.vmem [resolvable:$false] %s7401_s23 }
  0x18   : > { %s7574_s27 = scalar_lea.vmem %s9311_s0, %s6732_s24  ;;  %s323_s24 = sand.u32 1, %s7451_s10  }
  0x19   : > { %v332_v1 = vld [vmem:[%s7574_s27 + $0x8] sm:$0xff]  ;;  %v334_v2 = vld [vmem:[%s7574_s27 + $0x18] sm:$0xff]  ;;  %v331_v3 = vld [vmem:[%s7574_s27] sm:$0xff]  ;;  %s5877_s21 = scalar_lea.sflag [#allocation3], %s323_s24  ;;  %s7403_s25 = scalar_lea.vmem %s7402_s23, 32 }
  0x1a   : > { %v460_v4 = vunpack.c.l.s8.bf16 %v332_v1  ;;  %v476_v5 = vunpack.c.h.s8.bf16 %v332_v1  ;;  %v462_v6 = vunpack.c.l.s8.bf16 %v334_v2  ;;  %v478_v7 = vunpack.c.h.s8.bf16 %v334_v2  ;;  %v333_v8 = vld [vmem:[%s7574_s27 + $0x10] sm:$0xff]  ;;  %v348_v11 = vld [vmem:[%s7574_s27 + $0x88] sm:$0xff]  ;;  %v350_v12 = vld [vmem:[%s7574_s27 + $0x98] sm:$0xff] }
  0x1b   : > { %v459_v9 = vunpack.c.l.s8.bf16 %v331_v3  ;;  %v461_v10 = vunpack.c.l.s8.bf16 %v333_v8  ;;  %v475_v13 = vunpack.c.h.s8.bf16 %v331_v3  ;;  %v477_v14 = vunpack.c.h.s8.bf16 %v333_v8  ;;  %v347_v17 = vld [vmem:[%s7574_s27 + $0x80] sm:$0xff]  ;;  %v349_v18 = vld [vmem:[%s7574_s27 + $0x90] sm:$0xff]  ;;  %v364_v23 = vld [vmem:[%s7574_s27 + $0x108] sm:$0xff] }
  0x1c   : > { %727 = vmatprep.subr.bf16.mxu0 %v460_v4  ;;  %770 = vmatprep.subr.bf16.mxu1 %v462_v6  ;;  %v492_v15 = vunpack.c.l.s8.bf16 %v348_v11  ;;  %v494_v16 = vunpack.c.l.s8.bf16 %v350_v12  ;;  %v491_v19 = vunpack.c.l.s8.bf16 %v347_v17  ;;  %v493_v20 = vunpack.c.l.s8.bf16 %v349_v18  ;;  %v366_v24 = vld [vmem:[%s7574_s27 + $0x118] sm:$0xff]  ;;  %v363_v29 = vld [vmem:[%s7574_s27 + $0x100] sm:$0xff]  ;;  %v365_v30 = vld [vmem:[%s7574_s27 + $0x110] sm:$0xff] }
  0x1d   : > { %728 = vmatpush1.bf16.msra.mxu0 %v459_v9  ;;  %771 = vmatpush1.bf16.msra.mxu1 %v461_v10  ;;  %v508_v21 = vunpack.c.h.s8.bf16 %v348_v11  ;;  %v510_v22 = vunpack.c.h.s8.bf16 %v350_v12  ;;  %v507_v25 = vunpack.c.h.s8.bf16 %v347_v17  ;;  %v509_v26 = vunpack.c.h.s8.bf16 %v349_v18  ;;  %v380_v35 = vld [vmem:[%s7574_s27 + $0x188] sm:$0xff]  ;;  %v382_v36 = vld [vmem:[%s7574_s27 + $0x198] sm:$0xff]  ;;  %v379_v41 = vld [vmem:[%s7574_s27 + $0x180] sm:$0xff] }
  0x1e   : > { %729 = vmatprep.subr.bf16.mxu0 %v476_v5  ;;  %772 = vmatprep.subr.bf16.mxu1 %v478_v7  ;;  %v524_v27 = vunpack.c.l.s8.bf16 %v364_v23  ;;  %v526_v28 = vunpack.c.l.s8.bf16 %v366_v24  ;;  %v523_v31 = vunpack.c.l.s8.bf16 %v363_v29  ;;  %v525_v32 = vunpack.c.l.s8.bf16 %v365_v30  ;;  %v381_v42 = vld [vmem:[%s7574_s27 + $0x190] sm:$0xff]  ;;  %v396_v47 = vld [vmem:[%s7574_s27 + $0x208] sm:$0xff]  ;;  %v398_v48 = vld [vmem:[%s7574_s27 + $0x218] sm:$0xff] }
  0x1f   : > { %v540_v33 = vunpack.c.h.s8.bf16 %v364_v23  ;;  %v542_v34 = vunpack.c.h.s8.bf16 %v366_v24  ;;  %v539_v37 = vunpack.c.h.s8.bf16 %v363_v29  ;;  %v541_v38 = vunpack.c.h.s8.bf16 %v365_v30  ;;  %v395_v49 = vld [vmem:[%s7574_s27 + $0x200] sm:$0xff]  ;;  %v397_v50 = vld [vmem:[%s7574_s27 + $0x210] sm:$0xff]  ;;  %v412_v59 = vld [vmem:[%s7574_s27 + $0x288] sm:$0xff] }
  0x20   : > { %v556_v39 = vunpack.c.l.s8.bf16 %v380_v35  ;;  %v558_v40 = vunpack.c.l.s8.bf16 %v382_v36  ;;  %v555_v43 = vunpack.c.l.s8.bf16 %v379_v41  ;;  %v557_v44 = vunpack.c.l.s8.bf16 %v381_v42  ;;  %v414_v60 = vld [vmem:[%s7574_s27 + $0x298] sm:$0xff]  ;;  %v411_v61 = vld [vmem:[%s7574_s27 + $0x280] sm:$0xff]  ;;  %v413_v62 = vld [vmem:[%s7574_s27 + $0x290] sm:$0xff] }
  0x21   : > { %730 = vmatpush1.bf16.msra.mxu0 %v475_v13  ;;  %773 = vmatpush1.bf16.msra.mxu1 %v477_v14  ;;  %v572_v45 = vunpack.c.h.s8.bf16 %v380_v35  ;;  %v574_v46 = vunpack.c.h.s8.bf16 %v382_v36  ;;  %v571_v51 = vunpack.c.h.s8.bf16 %v379_v41  ;;  %v573_v52 = vunpack.c.h.s8.bf16 %v381_v42  ;;  %v1103_v4 = vld [vmem:[%s9313_s2] sm:$0xff]  ;;  %v428_v8 = vld [vmem:[%s7574_s27 + $0x308] sm:$0xff]  ;;  %v430_v11 = vld [vmem:[%s7574_s27 + $0x318] sm:$0xff] }
  0x22   : > { %731 = vmatprep.subr.bf16.mxu0 %v492_v15  ;;  %774 = vmatprep.subr.bf16.mxu1 %v494_v16  ;;  %v588_v53 = vunpack.c.l.s8.bf16 %v396_v47  ;;  %v590_v54 = vunpack.c.l.s8.bf16 %v398_v48  ;;  %v587_v55 = vunpack.c.l.s8.bf16 %v395_v49  ;;  %v589_v56 = vunpack.c.l.s8.bf16 %v397_v50  ;;  %v1104_v12 = vld [vmem:[%s9313_s2 + $0x8] sm:$0xff]  ;;  %v427_v13 = vld [vmem:[%s7574_s27 + $0x300] sm:$0xff]  ;;  %v429_v14 = vld [vmem:[%s7574_s27 + $0x310] sm:$0xff] }
  0x23   : > { %v604_v57 = vunpack.c.h.s8.bf16 %v396_v47  ;;  %v606_v58 = vunpack.c.h.s8.bf16 %v398_v48  ;;  %v603_v63 = vunpack.c.h.s8.bf16 %v395_v49  ;;  %v605_v1 = vunpack.c.h.s8.bf16 %v397_v50  ;;  %v444_v23 = vld [vmem:[%s7574_s27 + $0x388] sm:$0xff]  ;;  %v446_v24 = vld [vmem:[%s7574_s27 + $0x398] sm:$0xff]  ;;  %v351_v50 = vld [vmem:[%s7574_s27 + $0xa0] sm:$0xff] }
  0x24   : > { %v620_v2 = vunpack.c.l.s8.bf16 %v412_v59  ;;  %v622_v3 = vunpack.c.l.s8.bf16 %v414_v60  ;;  %v7461_v5 = vmov 0   ;;  %v619_v6 = vunpack.c.l.s8.bf16 %v411_v61  ;;  %v336_v35 = vld [vmem:[%s7574_s27 + $0x28] sm:$0xff]  ;;  %v338_v36 = vld [vmem:[%s7574_s27 + $0x38] sm:$0xff] }
  0x25   : > { %732 = vmatpush1.bf16.msra.mxu0 %v491_v19  ;;  %775 = vmatpush1.bf16.msra.mxu1 %v493_v20  ;;  %v621_v7 = vunpack.c.l.s8.bf16 %v413_v62  ;;  %v636_v9 = vunpack.c.h.s8.bf16 %v412_v59  ;;  %v638_v10 = vunpack.c.h.s8.bf16 %v414_v60  ;;  %v635_v15 = vunpack.c.h.s8.bf16 %v411_v61  ;;  %v7623_v41 = vld [vmem:[%s9312_s1] ss:$8 sps:$4 sm:$0xff]   ;;  %v354_v49 = vld [vmem:[%s7574_s27 + $0xb8] sm:$0xff] }
  0x26   : > { %733 = vmatprep.subr.bf16.mxu0 %v508_v21  ;;  %776 = vmatprep.subr.bf16.mxu1 %v510_v22  ;;  %v637_v16 = vunpack.c.h.s8.bf16 %v413_v62  ;;  %v652_v17 = vunpack.c.l.s8.bf16 %v428_v8  ;;  %v654_v18 = vunpack.c.l.s8.bf16 %v430_v11  ;;  %v651_v19 = vunpack.c.l.s8.bf16 %v427_v13  ;;  %v352_v48 = vld [vmem:[%s7574_s27 + $0xa8] sm:$0xff]  ;;  %v370_v61 = vld [vmem:[%s7574_s27 + $0x138] sm:$0xff]  ;;  %v367_v62 = vld [vmem:[%s7574_s27 + $0x120] sm:$0xff] }
  0x27   : > { %6824 = vset.pattern.permute.xlu0 %v7461_v5  ;;  %6825 = vset.pattern.permute.xlu1 %v7461_v5  ;;  %v653_v20 = vunpack.c.l.s8.bf16 %v429_v14  ;;  %v668_v21 = vunpack.c.h.s8.bf16 %v428_v8  ;;  %v670_v22 = vunpack.c.h.s8.bf16 %v430_v11  ;;  %v684_v29 = vunpack.c.l.s8.bf16 %v444_v23  ;;  %v368_v60 = vld [vmem:[%s7574_s27 + $0x128] sm:$0xff]  ;;  %v383_v11 = vld [vmem:[%s7574_s27 + $0x1a0] sm:$0xff] }
  0x28   : > { %1107 = vperm.xlu0 %6824, %v1103_v4   ;;  %v686_v30 = vunpack.c.l.s8.bf16 %v446_v24  ;;  %v464_v42 = vunpack.c.l.s8.bf16 %v336_v35  ;;  %v482_v47 = vunpack.c.h.s8.bf16 %v338_v36  ;;  %v514_v59 = vunpack.c.h.s8.bf16 %v354_v49 }
  0x29   : > { %734 = vmatpush1.bf16.msra.mxu0 %v507_v25  ;;  %777 = vmatpush1.bf16.msra.mxu1 %v509_v26  ;;  %v443_v25 = vld [vmem:[%s7574_s27 + $0x380] sm:$0xff]  ;;  %v445_v26 = vld [vmem:[%s7574_s27 + $0x390] sm:$0xff]  ;;  %v527_v4 = vunpack.c.l.s8.bf16 %v367_v62  ;;  %v546_v8 = vunpack.c.h.s8.bf16 %v370_v61 }
  0x2a   : > { %735 = vmatprep.subr.bf16.mxu0 %v524_v27  ;;  %778 = vmatprep.subr.bf16.mxu1 %v526_v28  ;;  %v667_v27 = vunpack.c.h.s8.bf16 %v427_v13  ;;  %v669_v28 = vunpack.c.h.s8.bf16 %v429_v14  ;;  %v543_v13 = vunpack.c.h.s8.bf16 %v367_v62 }
  0x2c   : > { %1112 = vperm.xlu0 %6824, %v1104_v12   ;;  %v385_v12 = vld [vmem:[%s7574_s27 + $0x1b0] sm:$0xff] }
  0x2d   : > { %736 = vmatpush1.bf16.msra.mxu0 %v523_v31  ;;  %779 = vmatpush1.bf16.msra.mxu1 %v525_v32  ;;  %v683_v31 = vunpack.c.l.s8.bf16 %v443_v25  ;;  %v685_v32 = vunpack.c.l.s8.bf16 %v445_v26 }
  0x2e   : > { %737 = vmatprep.subr.bf16.mxu0 %v540_v33  ;;  %780 = vmatprep.subr.bf16.mxu1 %v542_v34  ;;  %v700_v33 = vunpack.c.h.s8.bf16 %v444_v23  ;;  %v702_v34 = vunpack.c.h.s8.bf16 %v446_v24  ;;  %v399_v23 = vld [vmem:[%s7574_s27 + $0x220] sm:$0xff]  ;;  %v401_v24 = vld [vmem:[%s7574_s27 + $0x230] sm:$0xff] }
  0x31   : > { %738 = vmatpush1.bf16.msra.mxu0 %v539_v37  ;;  %781 = vmatpush1.bf16.msra.mxu1 %v541_v38  ;;  %v335_v37 = vld [vmem:[%s7574_s27 + $0x20] sm:$0xff]  ;;  %v337_v38 = vld [vmem:[%s7574_s27 + $0x30] sm:$0xff] }
  0x32   : > { %739 = vmatprep.subr.bf16.mxu0 %v556_v39  ;;  %782 = vmatprep.subr.bf16.mxu1 %v558_v40  ;;  %v699_v39 = vunpack.c.h.s8.bf16 %v443_v25  ;;  %v701_v40 = vunpack.c.h.s8.bf16 %v445_v26  ;;  %v575_v25 = vunpack.c.h.s8.bf16 %v383_v11  ;;  %v577_v26 = vunpack.c.h.s8.bf16 %v385_v12 }
  0x35   : > { %740 = vmatpush1.bf16.msra.mxu0 %v555_v43  ;;  %783 = vmatpush1.bf16.msra.mxu1 %v557_v44  ;;  %v466_v43 = vunpack.c.l.s8.bf16 %v338_v36  ;;  %v463_v44 = vunpack.c.l.s8.bf16 %v335_v37  ;;  %v417_v36 = vld [vmem:[%s7574_s27 + $0x2b0] sm:$0xff] }
  0x36   : > { %741 = vmatprep.subr.bf16.mxu0 %v572_v45  ;;  %784 = vmatprep.subr.bf16.mxu1 %v574_v46  ;;  %v465_v45 = vunpack.c.l.s8.bf16 %v337_v38  ;;  %v480_v46 = vunpack.c.h.s8.bf16 %v336_v35  ;;  %v415_v35 = vld [vmem:[%s7574_s27 + $0x2a0] sm:$0xff] }
  0x39   : > { %742 = vmatpush1.bf16.msra.mxu0 %v571_v51  ;;  %785 = vmatpush1.bf16.msra.mxu1 %v573_v52  ;;  %v353_v51 = vld [vmem:[%s7574_s27 + $0xb0] sm:$0xff]  ;;  %v479_v52 = vunpack.c.h.s8.bf16 %v335_v37  ;;  %v607_v37 = vunpack.c.h.s8.bf16 %v399_v23 }
  0x3a   : > { %743 = vmatprep.subr.bf16.mxu0 %v588_v53  ;;  %786 = vmatprep.subr.bf16.mxu1 %v590_v54  ;;  %v481_v53 = vunpack.c.h.s8.bf16 %v337_v38  ;;  %v496_v54 = vunpack.c.l.s8.bf16 %v352_v48  ;;  %v609_v38 = vunpack.c.h.s8.bf16 %v401_v24 }
  0x3d   : > { %744 = vmatpush1.bf16.msra.mxu0 %v587_v55  ;;  %787 = vmatpush1.bf16.msra.mxu1 %v589_v56  ;;  %v498_v55 = vunpack.c.l.s8.bf16 %v354_v49  ;;  %v495_v56 = vunpack.c.l.s8.bf16 %v351_v50  ;;  %v433_v49 = vld [vmem:[%s7574_s27 + $0x330] sm:$0xff] }
  0x3e   : > { %745 = vmatprep.subr.bf16.mxu0 %v604_v57  ;;  %788 = vmatprep.subr.bf16.mxu1 %v606_v58  ;;  %v497_v57 = vunpack.c.l.s8.bf16 %v353_v51  ;;  %v512_v58 = vunpack.c.h.s8.bf16 %v352_v48  ;;  %v431_v48 = vld [vmem:[%s7574_s27 + $0x320] sm:$0xff] }
  0x3f   : > { %v671_v62 = vunpack.c.h.s8.bf16 %v431_v48 }
  0x41   : > { %746 = vmatpush1.bf16.msra.mxu0 %v603_v63  ;;  %789 = vmatpush1.bf16.msra.mxu1 %v605_v1  ;;  %v369_v63 = vld [vmem:[%s7574_s27 + $0x130] sm:$0xff]  ;;  %v511_v1 = vunpack.c.h.s8.bf16 %v351_v50  ;;  %v639_v50 = vunpack.c.h.s8.bf16 %v415_v35 }
  0x42   : > { %747 = vmatprep.subr.bf16.mxu0 %v620_v2  ;;  %790 = vmatprep.subr.bf16.mxu1 %v622_v3  ;;  %v513_v2 = vunpack.c.h.s8.bf16 %v353_v51  ;;  %v530_v3 = vunpack.c.l.s8.bf16 %v370_v61  ;;  %v545_v14 = vunpack.c.h.s8.bf16 %v369_v63  ;;  %v641_v51 = vunpack.c.h.s8.bf16 %v417_v36  ;;  %v449_v61 = vld [vmem:[%s7574_s27 + $0x3b0] sm:$0xff] }
  0x45   : > { %748 = vmatpush1.bf16.msra.mxu0 %v619_v6  ;;  %791 = vmatpush1.bf16.msra.mxu1 %v621_v7  ;;  %v529_v6 = vunpack.c.l.s8.bf16 %v369_v63  ;;  %v544_v7 = vunpack.c.h.s8.bf16 %v368_v60  ;;  %v673_v63 = vunpack.c.h.s8.bf16 %v433_v49 }
  0x46   : > { %749 = vmatprep.subr.bf16.mxu0 %v636_v9  ;;  %792 = vmatprep.subr.bf16.mxu1 %v638_v10  ;;  %v384_v9 = vld [vmem:[%s7574_s27 + $0x1a8] sm:$0xff]  ;;  %v386_v10 = vld [vmem:[%s7574_s27 + $0x1b8] sm:$0xff] }
  0x49   : > { %750 = vmatpush1.bf16.msra.mxu0 %v635_v15  ;;  %793 = vmatpush1.bf16.msra.mxu1 %v637_v16  ;;  %v560_v15 = vunpack.c.l.s8.bf16 %v384_v9  ;;  %v562_v16 = vunpack.c.l.s8.bf16 %v386_v10 }
  0x4a   : > { %751 = vmatprep.subr.bf16.mxu0 %v652_v17  ;;  %794 = vmatprep.subr.bf16.mxu1 %v654_v18  ;;  %v559_v17 = vunpack.c.l.s8.bf16 %v383_v11  ;;  %v561_v18 = vunpack.c.l.s8.bf16 %v385_v12  ;;  %v705_v12 = vunpack.c.h.s8.bf16 %v449_v61 }
  0x4d   : > { %752 = vmatpush1.bf16.msra.mxu0 %v651_v19  ;;  %795 = vmatpush1.bf16.msra.mxu1 %v653_v20  ;;  %v576_v19 = vunpack.c.h.s8.bf16 %v384_v9  ;;  %v578_v20 = vunpack.c.h.s8.bf16 %v386_v10  ;;  %v339_v9 = vld [vmem:[%s7574_s27 + $0x40] sm:$0xff]  ;;  %v341_v10 = vld [vmem:[%s7574_s27 + $0x50] sm:$0xff] }
  0x4e   : > { %753 = vmatprep.subr.bf16.mxu0 %v668_v21  ;;  %796 = vmatprep.subr.bf16.mxu1 %v670_v22  ;;  %v400_v21 = vld [vmem:[%s7574_s27 + $0x228] sm:$0xff]  ;;  %v402_v22 = vld [vmem:[%s7574_s27 + $0x238] sm:$0xff] }
  0x51   : > { %754 = vmatpush1.bf16.msra.mxu0 %v667_v27  ;;  %797 = vmatpush1.bf16.msra.mxu1 %v669_v28  ;;  %v592_v27 = vunpack.c.l.s8.bf16 %v400_v21  ;;  %v594_v28 = vunpack.c.l.s8.bf16 %v402_v22 }
  0x52   : > { %755 = vmatprep.subr.bf16.mxu0 %v684_v29  ;;  %798 = vmatprep.subr.bf16.mxu1 %v686_v30  ;;  %v591_v29 = vunpack.c.l.s8.bf16 %v399_v23  ;;  %v593_v30 = vunpack.c.l.s8.bf16 %v401_v24  ;;  %v483_v23 = vunpack.c.h.s8.bf16 %v339_v9  ;;  %v485_v24 = vunpack.c.h.s8.bf16 %v341_v10 }
  0x55   : > { %756 = vmatpush1.bf16.msra.mxu0 %v683_v31  ;;  %799 = vmatpush1.bf16.msra.mxu1 %v685_v32  ;;  %v608_v31 = vunpack.c.h.s8.bf16 %v400_v21  ;;  %v610_v32 = vunpack.c.h.s8.bf16 %v402_v22  ;;  %v355_v21 = vld [vmem:[%s7574_s27 + $0xc0] sm:$0xff]  ;;  %v357_v22 = vld [vmem:[%s7574_s27 + $0xd0] sm:$0xff] }
  0x56   : > { %757 = vmatprep.subr.bf16.mxu0 %v700_v33  ;;  %800 = vmatprep.subr.bf16.mxu1 %v702_v34  ;;  %v416_v33 = vld [vmem:[%s7574_s27 + $0x2a8] sm:$0xff]  ;;  %v418_v34 = vld [vmem:[%s7574_s27 + $0x2b8] sm:$0xff] }
  0x59   : > { %758 = vmatpush1.bf16.msra.mxu0 %v699_v39  ;;  %801 = vmatpush1.bf16.msra.mxu1 %v701_v40  ;;  %v624_v39 = vunpack.c.l.s8.bf16 %v416_v33  ;;  %v626_v40 = vunpack.c.l.s8.bf16 %v418_v34 }
  0x5a   : > { %813 = vmatprep.subr.bf16.mxu0 %v464_v42  ;;  %856 = vmatprep.subr.bf16.mxu1 %v466_v43  ;;  %v623_v42 = vunpack.c.l.s8.bf16 %v415_v35  ;;  %v625_v43 = vunpack.c.l.s8.bf16 %v417_v36  ;;  %v515_v35 = vunpack.c.h.s8.bf16 %v355_v21  ;;  %v517_v36 = vunpack.c.h.s8.bf16 %v357_v22 }
  0x5c   : > { %760 = vmatmul.mubr.bf16.vlgmr.msra.gmra.mrb[0].mxu0 %v7623_v41  ;;  %803 = vmatmul.mubr.bf16.vlgmr.msra.gmra.mrb[0].mxu1 %v7623_v41 }
  0x5d   : > { %814 = vmatpush1.bf16.msra.mxu0 %v463_v44  ;;  %857 = vmatpush1.bf16.msra.mxu1 %v465_v45  ;;  %v640_v44 = vunpack.c.h.s8.bf16 %v416_v33  ;;  %v642_v45 = vunpack.c.h.s8.bf16 %v418_v34  ;;  %v371_v33 = vld [vmem:[%s7574_s27 + $0x140] sm:$0xff]  ;;  %v373_v34 = vld [vmem:[%s7574_s27 + $0x150] sm:$0xff] }
  0x5e   : > { %815 = vmatprep.subr.bf16.mxu0 %v480_v46  ;;  %858 = vmatprep.subr.bf16.mxu1 %v482_v47  ;;  %v432_v46 = vld [vmem:[%s7574_s27 + $0x328] sm:$0xff]  ;;  %v434_v47 = vld [vmem:[%s7574_s27 + $0x338] sm:$0xff] }
  0x5f   : > { %845 = vmatprep.mubr.bf16.mxu0 %v7566_v0  ;;  %888 = vmatprep.mubr.bf16.mxu1 %v7566_v0  ;;  %v528_v0 = vunpack.c.l.s8.bf16 %v368_v60  ;;  %v447_v60 = vld [vmem:[%s7574_s27 + $0x3a0] sm:$0xff] }
  0x60   : > { %v703_v11 = vunpack.c.h.s8.bf16 %v447_v60 }
  0x61   : > { %816 = vmatpush1.bf16.msra.mxu0 %v479_v52  ;;  %859 = vmatpush1.bf16.msra.mxu1 %v481_v53  ;;  %v656_v52 = vunpack.c.l.s8.bf16 %v432_v46  ;;  %v658_v53 = vunpack.c.l.s8.bf16 %v434_v47 }
  0x62   : > { %817 = vmatprep.subr.bf16.mxu0 %v496_v54  ;;  %860 = vmatprep.subr.bf16.mxu1 %v498_v55  ;;  %v655_v54 = vunpack.c.l.s8.bf16 %v431_v48  ;;  %v657_v55 = vunpack.c.l.s8.bf16 %v433_v49  ;;  %v547_v48 = vunpack.c.h.s8.bf16 %v371_v33  ;;  %v549_v49 = vunpack.c.h.s8.bf16 %v373_v34 }
  0x65   : > { %818 = vmatpush1.bf16.msra.mxu0 %v495_v56  ;;  %861 = vmatpush1.bf16.msra.mxu1 %v497_v57  ;;  %v672_v56 = vunpack.c.h.s8.bf16 %v432_v46  ;;  %v674_v57 = vunpack.c.h.s8.bf16 %v434_v47  ;;  %v387_v46 = vld [vmem:[%s7574_s27 + $0x1c0] sm:$0xff]  ;;  %v389_v47 = vld [vmem:[%s7574_s27 + $0x1d0] sm:$0xff] }
  0x66   : > { %819 = vmatprep.subr.bf16.mxu0 %v512_v58  ;;  %862 = vmatprep.subr.bf16.mxu1 %v514_v59  ;;  %v448_v58 = vld [vmem:[%s7574_s27 + $0x3a8] sm:$0xff]  ;;  %v450_v59 = vld [vmem:[%s7574_s27 + $0x3b8] sm:$0xff] }
  0x69   : > { %820 = vmatpush1.bf16.msra.mxu0 %v511_v1  ;;  %863 = vmatpush1.bf16.msra.mxu1 %v513_v2  ;;  %v688_v1 = vunpack.c.l.s8.bf16 %v448_v58  ;;  %v690_v2 = vunpack.c.l.s8.bf16 %v450_v59 }
  0x6a   : > { %821 = vmatprep.subr.bf16.mxu0 %v528_v0  ;;  %864 = vmatprep.subr.bf16.mxu1 %v530_v3  ;;  %v687_v0 = vunpack.c.l.s8.bf16 %v447_v60  ;;  %v689_v3 = vunpack.c.l.s8.bf16 %v449_v61 }
  0x6d   : > { %822 = vmatpush1.bf16.msra.mxu0 %v527_v4  ;;  %865 = vmatpush1.bf16.msra.mxu1 %v529_v6  ;;  %v704_v4 = vunpack.c.h.s8.bf16 %v448_v58  ;;  %v706_v6 = vunpack.c.h.s8.bf16 %v450_v59  ;;  %v579_v58 = vunpack.c.h.s8.bf16 %v387_v46  ;;  %v581_v59 = vunpack.c.h.s8.bf16 %v389_v47 }
  0x6e   : > { %823 = vmatprep.subr.bf16.mxu0 %v544_v7  ;;  %866 = vmatprep.subr.bf16.mxu1 %v546_v8  ;;  %v340_v7 = vld [vmem:[%s7574_s27 + $0x48] sm:$0xff]  ;;  %v342_v8 = vld [vmem:[%s7574_s27 + $0x58] sm:$0xff] }
  0x71   : > { %824 = vmatpush1.bf16.msra.mxu0 %v543_v13  ;;  %867 = vmatpush1.bf16.msra.mxu1 %v545_v14  ;;  %v468_v13 = vunpack.c.l.s8.bf16 %v340_v7  ;;  %v470_v14 = vunpack.c.l.s8.bf16 %v342_v8 }
  0x72   : > { %825 = vmatprep.subr.bf16.mxu0 %v560_v15  ;;  %868 = vmatprep.subr.bf16.mxu1 %v562_v16  ;;  %v467_v15 = vunpack.c.l.s8.bf16 %v339_v9  ;;  %v469_v16 = vunpack.c.l.s8.bf16 %v341_v10 }
  0x75   : > { %826 = vmatpush1.bf16.msra.mxu0 %v559_v17  ;;  %869 = vmatpush1.bf16.msra.mxu1 %v561_v18  ;;  %v356_v17 = vld [vmem:[%s7574_s27 + $0xc8] sm:$0xff]  ;;  %v358_v18 = vld [vmem:[%s7574_s27 + $0xd8] sm:$0xff] }
  0x76   : > { %827 = vmatprep.subr.bf16.mxu0 %v576_v19  ;;  %870 = vmatprep.subr.bf16.mxu1 %v578_v20  ;;  %v484_v19 = vunpack.c.h.s8.bf16 %v340_v7  ;;  %v486_v20 = vunpack.c.h.s8.bf16 %v342_v8  ;;  %v422_v7 = vld [vmem:[%s7574_s27 + $0x2d8] sm:$0xff] }
  0x79   : > { %828 = vmatpush1.bf16.msra.mxu0 %v575_v25  ;;  %871 = vmatpush1.bf16.msra.mxu1 %v577_v26  ;;  %v500_v25 = vunpack.c.l.s8.bf16 %v356_v17  ;;  %v502_v26 = vunpack.c.l.s8.bf16 %v358_v18 }
  0x7a   : > { %829 = vmatprep.subr.bf16.mxu0 %v592_v27  ;;  %872 = vmatprep.subr.bf16.mxu1 %v594_v28  ;;  %v7670_v27 = vld [vmem:[%s9312_s1 + $0x4] ss:$8 sps:$4 sm:$0xff]   ;;  %v501_v28 = vunpack.c.l.s8.bf16 %v357_v22 }
  0x7d   : > { %830 = vmatpush1.bf16.msra.mxu0 %v591_v29  ;;  %873 = vmatpush1.bf16.msra.mxu1 %v593_v30  ;;  %v372_v29 = vld [vmem:[%s7574_s27 + $0x148] sm:$0xff]  ;;  %v374_v30 = vld [vmem:[%s7574_s27 + $0x158] sm:$0xff] }
  0x7e   : > { %831 = vmatprep.subr.bf16.mxu0 %v608_v31  ;;  %874 = vmatprep.subr.bf16.mxu1 %v610_v32  ;;  %v516_v31 = vunpack.c.h.s8.bf16 %v356_v17  ;;  %v518_v32 = vunpack.c.h.s8.bf16 %v358_v18  ;;  %v646_v17 = vunpack.c.h.s8.bf16 %v422_v7  ;;  %v436_v18 = vld [vmem:[%s7574_s27 + $0x348] sm:$0xff] }
  0x7f   : > { %v660_v22 = vunpack.c.l.s8.bf16 %v436_v18 }
  0x81   : > { %832 = vmatpush1.bf16.msra.mxu0 %v607_v37  ;;  %875 = vmatpush1.bf16.msra.mxu1 %v609_v38  ;;  %v532_v37 = vunpack.c.l.s8.bf16 %v372_v29  ;;  %v534_v38 = vunpack.c.l.s8.bf16 %v374_v30 }
  0x82   : > { %833 = vmatprep.subr.bf16.mxu0 %v624_v39  ;;  %876 = vmatprep.subr.bf16.mxu1 %v626_v40  ;;  %v531_v39 = vunpack.c.l.s8.bf16 %v371_v33  ;;  %v533_v40 = vunpack.c.l.s8.bf16 %v373_v34 }
  0x85   : > { %834 = vmatpush1.bf16.msra.mxu0 %v623_v42  ;;  %877 = vmatpush1.bf16.msra.mxu1 %v625_v43  ;;  %v388_v42 = vld [vmem:[%s7574_s27 + $0x1c8] sm:$0xff]  ;;  %v390_v43 = vld [vmem:[%s7574_s27 + $0x1d8] sm:$0xff] }
  0x86   : > { %835 = vmatprep.subr.bf16.mxu0 %v640_v44  ;;  %878 = vmatprep.subr.bf16.mxu1 %v642_v45  ;;  %v548_v44 = vunpack.c.h.s8.bf16 %v372_v29  ;;  %v550_v45 = vunpack.c.h.s8.bf16 %v374_v30  ;;  %v452_v30 = vld [vmem:[%s7574_s27 + $0x3c8] sm:$0xff] }
  0x87   : > { %v692_v34 = vunpack.c.l.s8.bf16 %v452_v30 }
  0x89   : > { %836 = vmatpush1.bf16.msra.mxu0 %v639_v50  ;;  %879 = vmatpush1.bf16.msra.mxu1 %v641_v51  ;;  %v564_v50 = vunpack.c.l.s8.bf16 %v388_v42  ;;  %v566_v51 = vunpack.c.l.s8.bf16 %v390_v43 }
  0x8a   : > { %837 = vmatprep.subr.bf16.mxu0 %v656_v52  ;;  %880 = vmatprep.subr.bf16.mxu1 %v658_v53  ;;  %v563_v52 = vunpack.c.l.s8.bf16 %v387_v46  ;;  %v565_v53 = vunpack.c.l.s8.bf16 %v389_v47 }
  0x8d   : > { %838 = vmatpush1.bf16.msra.mxu0 %v655_v54  ;;  %881 = vmatpush1.bf16.msra.mxu1 %v657_v55  ;;  %v404_v54 = vld [vmem:[%s7574_s27 + $0x248] sm:$0xff]  ;;  %v406_v55 = vld [vmem:[%s7574_s27 + $0x258] sm:$0xff] }
  0x8e   : > { %839 = vmatprep.subr.bf16.mxu0 %v672_v56  ;;  %882 = vmatprep.subr.bf16.mxu1 %v674_v57  ;;  %v580_v56 = vunpack.c.h.s8.bf16 %v388_v42  ;;  %v582_v57 = vunpack.c.h.s8.bf16 %v390_v43  ;;  %v596_v60 = vunpack.c.l.s8.bf16 %v404_v54  ;;  %v598_v61 = vunpack.c.l.s8.bf16 %v406_v55  ;;  %v344_v43 = vld [vmem:[%s7574_s27 + $0x68] sm:$0xff] }
  0x8f   : > { %v472_v47 = vunpack.c.l.s8.bf16 %v344_v43 }
  0x91   : > { %840 = vmatpush1.bf16.msra.mxu0 %v671_v62  ;;  %883 = vmatpush1.bf16.msra.mxu1 %v673_v63  ;;  %v403_v62 = vld [vmem:[%s7574_s27 + $0x240] sm:$0xff]  ;;  %v405_v63 = vld [vmem:[%s7574_s27 + $0x250] sm:$0xff] }
  0x92   : > { %841 = vmatprep.subr.bf16.mxu0 %v688_v1  ;;  %884 = vmatprep.subr.bf16.mxu1 %v690_v2  ;;  %v595_v1 = vunpack.c.l.s8.bf16 %v403_v62  ;;  %v597_v2 = vunpack.c.l.s8.bf16 %v405_v63  ;;  %v611_v8 = vunpack.c.h.s8.bf16 %v403_v62  ;;  %v613_v9 = vunpack.c.h.s8.bf16 %v405_v63  ;;  %v359_v62 = vld [vmem:[%s7574_s27 + $0xe0] sm:$0xff]  ;;  %v361_v63 = vld [vmem:[%s7574_s27 + $0xf0] sm:$0xff] }
  0x95   : > { %842 = vmatpush1.bf16.msra.mxu0 %v687_v0  ;;  %885 = vmatpush1.bf16.msra.mxu1 %v689_v3  ;;  %v1201_v0 = vld [vmem:[%s9315_s4 + $0x10] sm:$0xff]  ;;  %v612_v3 = vunpack.c.h.s8.bf16 %v404_v54 }
  0x96   : > { %843 = vmatprep.subr.bf16.mxu0 %v704_v4  ;;  %886 = vmatprep.subr.bf16.mxu1 %v706_v6  ;;  %v614_v4 = vunpack.c.h.s8.bf16 %v406_v55  ;;  %v420_v6 = vld [vmem:[%s7574_s27 + $0x2c8] sm:$0xff] }
  0x97   : > { %1215 = vperm.xlu0 %6824, %v1201_v0   ;;  %v628_v10 = vunpack.c.l.s8.bf16 %v420_v6  ;;  %v360_v55 = vld [vmem:[%s7574_s27 + $0xe8] sm:$0xff] }
  0x98   : > { %v520_v0 = vunpack.c.h.s8.bf16 %v360_v55 }
  0x99   : > { %844 = vmatpush1.bf16.msra.mxu0 %v703_v11  ;;  %887 = vmatpush1.bf16.msra.mxu1 %v705_v12  ;;  %v630_v11 = vunpack.c.l.s8.bf16 %v422_v7  ;;  %v419_v12 = vld [vmem:[%s7574_s27 + $0x2c0] sm:$0xff]  ;;  %v519_v7 = vunpack.c.h.s8.bf16 %v359_v62 }
  0x9a   : > { %899 = vmatprep.subr.bf16.mxu0 %v468_v13  ;;  %942 = vmatprep.subr.bf16.mxu1 %v470_v14  ;;  %v421_v13 = vld [vmem:[%s7574_s27 + $0x2d0] sm:$0xff]  ;;  %v627_v14 = vunpack.c.l.s8.bf16 %v419_v12 }
  0x9c   : > { %846 = vmatmul.mubr.bf16.vlgmr.msra.gmra.mrb[4].mxu0 %v7623_v41  ;;  %889 = vmatmul.mubr.bf16.vlgmr.msra.gmra.mrb[4].mxu1 %v7623_v41  ;;  %v499_v41 = vunpack.c.l.s8.bf16 %v355_v21  ;;  %v645_v21 = vunpack.c.h.s8.bf16 %v421_v13 }
  0x9d   : > { %900 = vmatpush1.bf16.msra.mxu0 %v467_v15  ;;  %943 = vmatpush1.bf16.msra.mxu1 %v469_v16  ;;  %v629_v15 = vunpack.c.l.s8.bf16 %v421_v13  ;;  %v644_v16 = vunpack.c.h.s8.bf16 %v420_v6  ;;  %v378_v6 = vld [vmem:[%s7574_s27 + $0x178] sm:$0xff] }
  0x9e   : > { %901 = vmatprep.subr.bf16.mxu0 %v484_v19  ;;  %944 = vmatprep.subr.bf16.mxu1 %v486_v20  ;;  %v438_v19 = vld [vmem:[%s7574_s27 + $0x358] sm:$0xff]  ;;  %v643_v20 = vunpack.c.h.s8.bf16 %v419_v12 }
  0x9f   : > { %931 = vmatprep.mubr.bf16.mxu0 %v7670_v27  ;;  %974 = vmatprep.mubr.bf16.mxu1 %v7670_v27  ;;  %v678_v29 = vunpack.c.h.s8.bf16 %v438_v19 }
  0xa1   : > { %902 = vmatpush1.bf16.msra.mxu0 %v483_v23  ;;  %945 = vmatpush1.bf16.msra.mxu1 %v485_v24  ;;  %v662_v23 = vunpack.c.l.s8.bf16 %v438_v19  ;;  %v435_v24 = vld [vmem:[%s7574_s27 + $0x340] sm:$0xff] }
  0xa2   : > { %903 = vmatprep.subr.bf16.mxu0 %v500_v25  ;;  %946 = vmatprep.subr.bf16.mxu1 %v502_v26  ;;  %v437_v25 = vld [vmem:[%s7574_s27 + $0x350] sm:$0xff]  ;;  %v659_v26 = vunpack.c.l.s8.bf16 %v435_v24 }
  0xa3   : > { %v677_v33 = vunpack.c.h.s8.bf16 %v437_v25 }
  0xa5   : > { %904 = vmatpush1.bf16.msra.mxu0 %v499_v41  ;;  %947 = vmatpush1.bf16.msra.mxu1 %v501_v28  ;;  %v661_v41 = vunpack.c.l.s8.bf16 %v437_v25  ;;  %v676_v28 = vunpack.c.h.s8.bf16 %v436_v18 }
  0xa6   : > { %905 = vmatprep.subr.bf16.mxu0 %v516_v31  ;;  %948 = vmatprep.subr.bf16.mxu1 %v518_v32  ;;  %v454_v31 = vld [vmem:[%s7574_s27 + $0x3d8] sm:$0xff]  ;;  %v675_v32 = vunpack.c.h.s8.bf16 %v435_v24 }
  0xa7   : > { %v710_v42 = vunpack.c.h.s8.bf16 %v454_v31 }
  0xa9   : > { %906 = vmatpush1.bf16.msra.mxu0 %v515_v35  ;;  %949 = vmatpush1.bf16.msra.mxu1 %v517_v36  ;;  %v694_v35 = vunpack.c.l.s8.bf16 %v454_v31  ;;  %v451_v36 = vld [vmem:[%s7574_s27 + $0x3c0] sm:$0xff] }
  0xaa   : > { %907 = vmatprep.subr.bf16.mxu0 %v532_v37  ;;  %950 = vmatprep.subr.bf16.mxu1 %v534_v38  ;;  %v453_v37 = vld [vmem:[%s7574_s27 + $0x3d0] sm:$0xff]  ;;  %v691_v38 = vunpack.c.l.s8.bf16 %v451_v36 }
  0xab   : > { %v709_v46 = vunpack.c.h.s8.bf16 %v453_v37 }
  0xad   : > { %908 = vmatpush1.bf16.msra.mxu0 %v531_v39  ;;  %951 = vmatpush1.bf16.msra.mxu1 %v533_v40  ;;  %v693_v39 = vunpack.c.l.s8.bf16 %v453_v37  ;;  %v708_v40 = vunpack.c.h.s8.bf16 %v452_v30 }
  0xae   : > { %909 = vmatprep.subr.bf16.mxu0 %v548_v44  ;;  %952 = vmatprep.subr.bf16.mxu1 %v550_v45  ;;  %v346_v44 = vld [vmem:[%s7574_s27 + $0x78] sm:$0xff]  ;;  %v707_v45 = vunpack.c.h.s8.bf16 %v451_v36 }
  0xaf   : > { %v490_v54 = vunpack.c.h.s8.bf16 %v346_v44 }
  0xb1   : > { %910 = vmatpush1.bf16.msra.mxu0 %v547_v48  ;;  %953 = vmatpush1.bf16.msra.mxu1 %v549_v49  ;;  %v474_v48 = vunpack.c.l.s8.bf16 %v346_v44  ;;  %v343_v49 = vld [vmem:[%s7574_s27 + $0x60] sm:$0xff] }
  0xb2   : > { %911 = vmatprep.subr.bf16.mxu0 %v564_v50  ;;  %954 = vmatprep.subr.bf16.mxu1 %v566_v51  ;;  %v345_v50 = vld [vmem:[%s7574_s27 + $0x70] sm:$0xff]  ;;  %v471_v51 = vunpack.c.l.s8.bf16 %v343_v49 }
  0xb5   : > { %912 = vmatpush1.bf16.msra.mxu0 %v563_v52  ;;  %955 = vmatpush1.bf16.msra.mxu1 %v565_v53  ;;  %v473_v52 = vunpack.c.l.s8.bf16 %v345_v50  ;;  %v488_v53 = vunpack.c.h.s8.bf16 %v344_v43 }
  0xb6   : > { %913 = vmatprep.subr.bf16.mxu0 %v580_v56  ;;  %956 = vmatprep.subr.bf16.mxu1 %v582_v57  ;;  %v362_v56 = vld [vmem:[%s7574_s27 + $0xf8] sm:$0xff]  ;;  %v7710_v57 = vld [vmem:[%s9312_s1] ss:$8 sps:$4 sm:$0xff]  }
  0xb9   : > { %914 = vmatpush1.bf16.msra.mxu0 %v579_v58  ;;  %957 = vmatpush1.bf16.msra.mxu1 %v581_v59  ;;  %v487_v58 = vunpack.c.h.s8.bf16 %v343_v49  ;;  %v489_v59 = vunpack.c.h.s8.bf16 %v345_v50 }
  0xba   : > { %915 = vmatprep.subr.bf16.mxu0 %v596_v60  ;;  %958 = vmatprep.subr.bf16.mxu1 %v598_v61  ;;  %v504_v60 = vunpack.c.l.s8.bf16 %v360_v55  ;;  %v506_v61 = vunpack.c.l.s8.bf16 %v362_v56 }
  0xbd   : > { %916 = vmatpush1.bf16.msra.mxu0 %v595_v1  ;;  %959 = vmatpush1.bf16.msra.mxu1 %v597_v2  ;;  %v503_v1 = vunpack.c.l.s8.bf16 %v359_v62  ;;  %v505_v2 = vunpack.c.l.s8.bf16 %v361_v63 }
  0xbe   : > { %917 = vmatprep.subr.bf16.mxu0 %v612_v3  ;;  %960 = vmatprep.subr.bf16.mxu1 %v614_v4  ;;  %v522_v3 = vunpack.c.h.s8.bf16 %v362_v56  ;;  %v376_v4 = vld [vmem:[%s7574_s27 + $0x168] sm:$0xff] }
  0xc1   : > { %918 = vmatpush1.bf16.msra.mxu0 %v611_v8  ;;  %961 = vmatpush1.bf16.msra.mxu1 %v613_v9  ;;  %v521_v8 = vunpack.c.h.s8.bf16 %v361_v63  ;;  %v538_v9 = vunpack.c.l.s8.bf16 %v378_v6 }
  0xc2   : > { %919 = vmatprep.subr.bf16.mxu0 %v628_v10  ;;  %962 = vmatprep.subr.bf16.mxu1 %v630_v11  ;;  %v375_v10 = vld [vmem:[%s7574_s27 + $0x160] sm:$0xff]  ;;  %v377_v11 = vld [vmem:[%s7574_s27 + $0x170] sm:$0xff] }
  0xc3   : > { %v535_v12 = vunpack.c.l.s8.bf16 %v375_v10  ;;  %v537_v13 = vunpack.c.l.s8.bf16 %v377_v11  ;;  %v551_v18 = vunpack.c.h.s8.bf16 %v375_v10  ;;  %v553_v19 = vunpack.c.h.s8.bf16 %v377_v11 }
  0xc5   : > { %920 = vmatpush1.bf16.msra.mxu0 %v627_v14  ;;  %963 = vmatpush1.bf16.msra.mxu1 %v629_v15  ;;  %v552_v14 = vunpack.c.h.s8.bf16 %v376_v4  ;;  %v554_v15 = vunpack.c.h.s8.bf16 %v378_v6 }
  0xc6   : > { %921 = vmatprep.subr.bf16.mxu0 %v644_v16  ;;  %964 = vmatprep.subr.bf16.mxu1 %v646_v17  ;;  %v392_v16 = vld [vmem:[%s7574_s27 + $0x1e8] sm:$0xff]  ;;  %v394_v17 = vld [vmem:[%s7574_s27 + $0x1f8] sm:$0xff] }
  0xc9   : > { %922 = vmatpush1.bf16.msra.mxu0 %v643_v20  ;;  %965 = vmatpush1.bf16.msra.mxu1 %v645_v21  ;;  %v568_v20 = vunpack.c.l.s8.bf16 %v392_v16  ;;  %v570_v21 = vunpack.c.l.s8.bf16 %v394_v17 }
  0xca   : > { %923 = vmatprep.subr.bf16.mxu0 %v660_v22  ;;  %966 = vmatprep.subr.bf16.mxu1 %v662_v23  ;;  %v391_v22 = vld [vmem:[%s7574_s27 + $0x1e0] sm:$0xff]  ;;  %v393_v23 = vld [vmem:[%s7574_s27 + $0x1f0] sm:$0xff] }
  0xcb   : > { %v567_v24 = vunpack.c.l.s8.bf16 %v391_v22  ;;  %v569_v25 = vunpack.c.l.s8.bf16 %v393_v23  ;;  %v583_v30 = vunpack.c.h.s8.bf16 %v391_v22  ;;  %v585_v31 = vunpack.c.h.s8.bf16 %v393_v23 }
  0xcd   : > { %924 = vmatpush1.bf16.msra.mxu0 %v659_v26  ;;  %967 = vmatpush1.bf16.msra.mxu1 %v661_v41  ;;  %v584_v26 = vunpack.c.h.s8.bf16 %v392_v16  ;;  %v586_v41 = vunpack.c.h.s8.bf16 %v394_v17  ;;  %v7745_v16 = vpop.permute.xlu0 %1107 }
  0xce   : > { %925 = vmatprep.subr.bf16.mxu0 %v676_v28  ;;  %968 = vmatprep.subr.bf16.mxu1 %v678_v29  ;;  %v408_v28 = vld [vmem:[%s7574_s27 + $0x268] sm:$0xff]  ;;  %v410_v29 = vld [vmem:[%s7574_s27 + $0x278] sm:$0xff] }
  0xd1   : > { %926 = vmatpush1.bf16.msra.mxu0 %v675_v32  ;;  %969 = vmatpush1.bf16.msra.mxu1 %v677_v33  ;;  %v600_v32 = vunpack.c.l.s8.bf16 %v408_v28  ;;  %v602_v33 = vunpack.c.l.s8.bf16 %v410_v29  ;;  %v7747_v17 = vpop.permute.xlu0 %1112 }
  0xd2   : > { %927 = vmatprep.subr.bf16.mxu0 %v692_v34  ;;  %970 = vmatprep.subr.bf16.mxu1 %v694_v35  ;;  %v407_v34 = vld [vmem:[%s7574_s27 + $0x260] sm:$0xff]  ;;  %v409_v35 = vld [vmem:[%s7574_s27 + $0x270] sm:$0xff] }
  0xd3   : > { %v599_v36 = vunpack.c.l.s8.bf16 %v407_v34  ;;  %v601_v37 = vunpack.c.l.s8.bf16 %v409_v35  ;;  %v615_v43 = vunpack.c.h.s8.bf16 %v407_v34  ;;  %v617_v44 = vunpack.c.h.s8.bf16 %v409_v35 }
  0xd5   : > { %928 = vmatpush1.bf16.msra.mxu0 %v691_v38  ;;  %971 = vmatpush1.bf16.msra.mxu1 %v693_v39  ;;  %v616_v38 = vunpack.c.h.s8.bf16 %v408_v28  ;;  %v618_v39 = vunpack.c.h.s8.bf16 %v410_v29 }
  0xd6   : > { %929 = vmatprep.subr.bf16.mxu0 %v708_v40  ;;  %972 = vmatprep.subr.bf16.mxu1 %v710_v42  ;;  %v424_v40 = vld [vmem:[%s7574_s27 + $0x2e8] sm:$0xff]  ;;  %v426_v42 = vld [vmem:[%s7574_s27 + $0x2f8] sm:$0xff] }
  0xd9   : > { %930 = vmatpush1.bf16.msra.mxu0 %v707_v45  ;;  %973 = vmatpush1.bf16.msra.mxu1 %v709_v46  ;;  %v632_v45 = vunpack.c.l.s8.bf16 %v424_v40  ;;  %v634_v46 = vunpack.c.l.s8.bf16 %v426_v42 }
  0xda   : > { %985 = vmatprep.subr.bf16.mxu0 %v472_v47  ;;  %1028 = vmatprep.subr.bf16.mxu1 %v474_v48  ;;  %v423_v47 = vld [vmem:[%s7574_s27 + $0x2e0] sm:$0xff]  ;;  %v425_v48 = vld [vmem:[%s7574_s27 + $0x2f0] sm:$0xff] }
  0xdb   : > { %v631_v49 = vunpack.c.l.s8.bf16 %v423_v47  ;;  %v633_v50 = vunpack.c.l.s8.bf16 %v425_v48  ;;  %v647_v55 = vunpack.c.h.s8.bf16 %v423_v47  ;;  %v649_v56 = vunpack.c.h.s8.bf16 %v425_v48 }
  0xdc   : > { %932 = vmatmul.mubr.bf16.vlgmr.msra.gmra.mrb[8].mxu0 %v7710_v57  ;;  %975 = vmatmul.mubr.bf16.vlgmr.msra.gmra.mrb[8].mxu1 %v7710_v57 }
  0xdd   : > { %986 = vmatpush1.bf16.msra.mxu0 %v471_v51  ;;  %1029 = vmatpush1.bf16.msra.mxu1 %v473_v52  ;;  %v648_v51 = vunpack.c.h.s8.bf16 %v424_v40  ;;  %v650_v52 = vunpack.c.h.s8.bf16 %v426_v42 }
  0xde   : > { %987 = vmatprep.subr.bf16.mxu0 %v488_v53  ;;  %1030 = vmatprep.subr.bf16.mxu1 %v490_v54  ;;  %v440_v53 = vld [vmem:[%s7574_s27 + $0x368] sm:$0xff]  ;;  %v442_v54 = vld [vmem:[%s7574_s27 + $0x378] sm:$0xff] }
  0xdf   : > { %1017 = vmatprep.mubr.bf16.mxu0 %v7670_v27  ;;  %1060 = vmatprep.mubr.bf16.mxu1 %v7670_v27  ;;  %v536_v27 = vunpack.c.l.s8.bf16 %v376_v4 }
  0xe1   : > { %988 = vmatpush1.bf16.msra.mxu0 %v487_v58  ;;  %1031 = vmatpush1.bf16.msra.mxu1 %v489_v59  ;;  %v664_v58 = vunpack.c.l.s8.bf16 %v440_v53  ;;  %v666_v59 = vunpack.c.l.s8.bf16 %v442_v54 }
  0xe2   : > { %989 = vmatprep.subr.bf16.mxu0 %v504_v60  ;;  %1032 = vmatprep.subr.bf16.mxu1 %v506_v61  ;;  %v439_v60 = vld [vmem:[%s7574_s27 + $0x360] sm:$0xff]  ;;  %v441_v61 = vld [vmem:[%s7574_s27 + $0x370] sm:$0xff] }
  0xe3   : > { %v663_v62 = vunpack.c.l.s8.bf16 %v439_v60  ;;  %v665_v63 = vunpack.c.l.s8.bf16 %v441_v61  ;;  %v679_v4 = vunpack.c.h.s8.bf16 %v439_v60  ;;  %v681_v6 = vunpack.c.h.s8.bf16 %v441_v61 }
  0xe5   : > { %990 = vmatpush1.bf16.msra.mxu0 %v503_v1  ;;  %1033 = vmatpush1.bf16.msra.mxu1 %v505_v2  ;;  %v680_v1 = vunpack.c.h.s8.bf16 %v440_v53  ;;  %v682_v2 = vunpack.c.h.s8.bf16 %v442_v54 }
  0xe6   : > { %991 = vmatprep.subr.bf16.mxu0 %v520_v0  ;;  %1034 = vmatprep.subr.bf16.mxu1 %v522_v3  ;;  %v456_v0 = vld [vmem:[%s7574_s27 + $0x3e8] sm:$0xff]  ;;  %v458_v3 = vld [vmem:[%s7574_s27 + $0x3f8] sm:$0xff] }
  0xe9   : > { %992 = vmatpush1.bf16.msra.mxu0 %v519_v7  ;;  %1035 = vmatpush1.bf16.msra.mxu1 %v521_v8  ;;  %v696_v7 = vunpack.c.l.s8.bf16 %v456_v0  ;;  %v698_v8 = vunpack.c.l.s8.bf16 %v458_v3 }
  0xea   : > { %993 = vmatprep.subr.bf16.mxu0 %v536_v27  ;;  %1036 = vmatprep.subr.bf16.mxu1 %v538_v9  ;;  %v455_v27 = vld [vmem:[%s7574_s27 + $0x3e0] sm:$0xff]  ;;  %v457_v9 = vld [vmem:[%s7574_s27 + $0x3f0] sm:$0xff]  ;;  %s324_s27 = scalar_lea.vmem [#allocation2], %s323_s24 }
  0xeb   : > { %v695_v10 = vunpack.c.l.s8.bf16 %v455_v27  ;;  %v697_v11 = vunpack.c.l.s8.bf16 %v457_v9  ;;  %s5889_s29 = sshll.u32 %s324_s27, 4  ;;  %s9271_s29 = int_to_ptr.vmem [resolvable:$true] %s5889_s29 }
  0xec   : > { %s7397_s22 = scalar_lea.vmem %s9271_s29, 16  ;;  %p7404_p0 = scmp.lt.s32.totalorder %s9271_s29, %s7402_s23 }
  0xed   : > { %994 = vmatpush1.bf16.msra.mxu0 %v535_v12  ;;  %1037 = vmatpush1.bf16.msra.mxu1 %v537_v13  ;;  %v712_v12 = vunpack.c.h.s8.bf16 %v456_v0  ;;  %v714_v13 = vunpack.c.h.s8.bf16 %v458_v3  ;;  %p7398_p11 = scmp.ne.s32.totalorder %s9271_s29, %s7397_s22  ;;  %p7405_p1 = scmp.lt.s32.totalorder %s7403_s25, %s7397_s22 }
  0xee   : > { %995 = vmatprep.subr.bf16.mxu0 %v552_v14  ;;  %1038 = vmatprep.subr.bf16.mxu1 %v554_v15  ;;  %v711_v14 = vunpack.c.h.s8.bf16 %v455_v27  ;;  %v713_v15 = vunpack.c.h.s8.bf16 %v457_v9 }
  0xef   : > { %p7399_p12 = pnand %p7398_p11, %p7552_p5  ;;  %p7406_p2 = por %p7405_p1, %p7404_p0 }
  0xf1   : > { %996 = vmatpush1.bf16.msra.mxu0 %v551_v18  ;;  %1039 = vmatpush1.bf16.msra.mxu1 %v553_v19  ;;  %p7400_p13 = pneg %p7399_p12 }
  0xf2   : > { %997 = vmatprep.subr.bf16.mxu0 %v568_v20  ;;  %1040 = vmatprep.subr.bf16.mxu1 %v570_v21 }
  0xf3   : > { %p7407_p3 = pnand %p7406_p2, %p7400_p13 }
  0xf5   : > { %998 = vmatpush1.bf16.msra.mxu0 %v567_v24  ;;  %1041 = vmatpush1.bf16.msra.mxu1 %v569_v25 }
  0xf6   : > { %999 = vmatprep.subr.bf16.mxu0 %v584_v26  ;;  %1042 = vmatprep.subr.bf16.mxu1 %v586_v41 }
  0xf9   : > { %1000 = vmatpush1.bf16.msra.mxu0 %v583_v30  ;;  %1043 = vmatpush1.bf16.msra.mxu1 %v585_v31 }
  0xfa   : > { %1001 = vmatprep.subr.bf16.mxu0 %v600_v32  ;;  %1044 = vmatprep.subr.bf16.mxu1 %v602_v33 }
  0xfd   : > { %1002 = vmatpush1.bf16.msra.mxu0 %v599_v36  ;;  %1045 = vmatpush1.bf16.msra.mxu1 %v601_v37 }
  0xfe   : > { %1003 = vmatprep.subr.bf16.mxu0 %v616_v38  ;;  %1046 = vmatprep.subr.bf16.mxu1 %v618_v39 }
 0x101   : > { %1004 = vmatpush1.bf16.msra.mxu0 %v615_v43  ;;  %1047 = vmatpush1.bf16.msra.mxu1 %v617_v44 }
 0x102   : > { %1005 = vmatprep.subr.bf16.mxu0 %v632_v45  ;;  %1048 = vmatprep.subr.bf16.mxu1 %v634_v46 }
 0x105   : > { %1006 = vmatpush1.bf16.msra.mxu0 %v631_v49  ;;  %1049 = vmatpush1.bf16.msra.mxu1 %v633_v50 }
 0x106   : > { %1007 = vmatprep.subr.bf16.mxu0 %v648_v51  ;;  %1050 = vmatprep.subr.bf16.mxu1 %v650_v52 }
 0x109   : > { %1008 = vmatpush1.bf16.msra.mxu0 %v647_v55  ;;  %1051 = vmatpush1.bf16.msra.mxu1 %v649_v56 }
 0x10a   : > { %1009 = vmatprep.subr.bf16.mxu0 %v664_v58  ;;  %1052 = vmatprep.subr.bf16.mxu1 %v666_v59 }
 0x10d   : > { %1010 = vmatpush1.bf16.msra.mxu0 %v663_v62  ;;  %1053 = vmatpush1.bf16.msra.mxu1 %v665_v63 }
 0x10e   : > { %1011 = vmatprep.subr.bf16.mxu0 %v680_v1  ;;  %1054 = vmatprep.subr.bf16.mxu1 %v682_v2 }
 0x111   : > { %1012 = vmatpush1.bf16.msra.mxu0 %v679_v4  ;;  %1055 = vmatpush1.bf16.msra.mxu1 %v681_v6 }
 0x112   : > { %1013 = vmatprep.subr.bf16.mxu0 %v696_v7  ;;  %1056 = vmatprep.subr.bf16.mxu1 %v698_v8 }
 0x115   : > { %1014 = vmatpush1.bf16.msra.mxu0 %v695_v10  ;;  %1057 = vmatpush1.bf16.msra.mxu1 %v697_v11 }
 0x116   : > { %1015 = vmatprep.subr.bf16.mxu0 %v712_v12  ;;  %1058 = vmatprep.subr.bf16.mxu1 %v714_v13 }
 0x119   : > { %1016 = vmatpush1.bf16.msra.mxu0 %v711_v14  ;;  %1059 = vmatpush1.bf16.msra.mxu1 %v713_v15 }
 0x11c   : > { %1018 = vmatmul.mubr.bf16.vlgmr.msra.gmra.mrb[12].mxu0 %v7710_v57  ;;  %1061 = vmatmul.mubr.bf16.vlgmr.msra.gmra.mrb[12].mxu1 %v7710_v57 }
 0x11d   : > { %1409 = vmatprep.mubr.bf16.mxu1 %v7461_v5 }
 0x12f   : > { %v761_v18 = vpop.f32.mrb[0].mxu0  ;;  %v804_v19 = vpop.f32.mrb[0].mxu1 }
 0x130   : > { %v1071_v20 = vmul.f32 0.003921569, %v761_v18  ;;  %v763_v21 = vpop.f32.mrb[1].mxu0  ;;  %v1073_v22 = vmul.f32 0.003921569, %v804_v19  ;;  %v806_v23 = vpop.f32.mrb[1].mxu1 }
 0x131   : > { %v1072_v24 = vmul.f32 0.003921569, %v763_v21  ;;  %v765_v25 = vpop.f32.mrb[2].mxu0  ;;  %v1074_v26 = vmul.f32 0.003921569, %v806_v23  ;;  %v808_v41 = vpop.f32.mrb[2].mxu1 }
 0x132   : > { %v1115_v28 = vadd.f32 %v7745_v16, %v1071_v20  ;;  %v1087_v29 = vmul.f32 0.003921569, %v765_v25  ;;  %v767_v57 = vpop.f32.mrb[3].mxu0  ;;  %v1117_v30 = vadd.f32 %v7745_v16, %v1073_v22  ;;  %v1089_v31 = vmul.f32 0.003921569, %v808_v41  ;;  %v810_v32 = vpop.f32.mrb[3].mxu1 }
 0x133   : > { %v1116_v33 = vadd.f32 %v7745_v16, %v1072_v24  ;;  %v1088_v34 = vmul.f32 0.003921569, %v767_v57  ;;  %v1118_v35 = vadd.f32 %v7745_v16, %v1074_v26  ;;  %v1090_v36 = vmul.f32 0.003921569, %v810_v32  ;;  %v1199_v57 = vld [vmem:[%s9315_s4] sm:$0xff]  ;;  %v1200_v32 = vld [vmem:[%s9315_s4 + $0x8] sm:$0xff] }
 0x134   : > { %v1147_v37 = vmax.f32 %v1115_v28, 0.0  ;;  %v1149_v38 = vmax.f32 %v1117_v30, 0.0  ;;  %v1133_v39 = vadd.f32 %v7747_v17, %v1089_v31  ;;  %v1131_v40 = vadd.f32 %v7747_v17, %v1087_v29  ;;  %v6831_v29 = vld [vmem:[%s9314_s3 + $0x4] ss:$8 sps:$4 sm:$0xff]   ;;  %1205 = vperm.xlu1 %6825, %v1199_v57   ;;  %v6835_v30 = vld [vmem:[%s9316_s5] ss:$8 sps:$4 sm:$0xff]  }
 0x135   : > { %v1150_v42 = vmax.f32 %v1118_v35, 0.0  ;;  %v1134_v43 = vadd.f32 %v7747_v17, %v1090_v36  ;;  %v1132_v44 = vadd.f32 %v7747_v17, %v1088_v34  ;;  %v1148_v47 = vmax.f32 %v1116_v33, 0.0  ;;  %1275 = vmatprep.mubr.bf16.mxu0 %v6831_v29  ;;  %v6837_v31 = vld [vmem:[%s9316_s5 + $0x4] ss:$8 sps:$4 sm:$0xff]   ;;  %v6843_v33 = vld [vmem:[%s9316_s5 + $0x14] ss:$8 sps:$4 sm:$0xff]  }
 0x136   : > { %v1165_v45 = vmax.f32 %v1133_v39, 0.0  ;;  %v1163_v46 = vmax.f32 %v1131_v40, 0.0  ;;  %1377 = vmatprep.subr.bf16.mxu1 %v6837_v31  ;;  %v6841_v34 = vld [vmem:[%s9316_s5 + $0x10] ss:$8 sps:$4 sm:$0xff]   ;;  %v6849_v35 = vld [vmem:[%s9316_s5 + $0x24] ss:$8 sps:$4 sm:$0xff]  }
 0x137   : > { %v1166_v48 = vmax.f32 %v1134_v43, 0.0  ;;  %v1164_v49 = vmax.f32 %v1132_v44, 0.0  ;;  %1378 = vmatpush1.bf16.msra.mxu1 %v6835_v30  ;;  %v1202_v36 = vld [vmem:[%s9315_s4 + $0x18] sm:$0xff] }
 0x138   : > { %v7757_v50 = vpack.c.bf16 %v1165_v45, %v1149_v38  ;;  %v7759_v51 = vpack.c.bf16 %v1163_v46, %v1147_v37  ;;  %1210 = vperm.xlu1 %6825, %v1200_v32   ;;  %1379 = vmatprep.subr.bf16.mxu1 %v6843_v33  ;;  %v6847_v37 = vld [vmem:[%s9316_s5 + $0x20] ss:$8 sps:$4 sm:$0xff]   ;;  %v6855_v38 = vld [vmem:[%s9316_s5 + $0x34] ss:$8 sps:$4 sm:$0xff]   ;;  %v6853_v39 = vld [vmem:[%s9316_s5 + $0x30] ss:$8 sps:$4 sm:$0xff]  }
 0x139   : > { %v7761_v52 = vpack.c.bf16 %v1166_v48, %v1150_v42  ;;  %v7763_v53 = vpack.c.bf16 %v1164_v49, %v1148_v47 }
 0x13b   : > { %1380 = vmatpush1.bf16.msra.mxu1 %v6841_v34 }
 0x13c   : > { %1220 = vperm.xlu1 %6825, %v1202_v36   ;;  %1381 = vmatprep.subr.bf16.mxu1 %v6849_v35 }
 0x13f   : > { %1382 = vmatpush1.bf16.msra.mxu1 %v6847_v37 }
 0x140   : > { %1383 = vmatprep.subr.bf16.mxu1 %v6855_v38 }
 0x143   : > { %1384 = vmatpush1.bf16.msra.mxu1 %v6853_v39 }
 0x16f   : > { %v847_v54 = vpop.f32.mrb[4].mxu0  ;;  %v890_v55 = vpop.f32.mrb[4].mxu1 }
 0x170   : > { %v1075_v56 = vmul.f32 0.003921569, %v847_v54  ;;  %v849_v58 = vpop.f32.mrb[5].mxu0  ;;  %v1077_v59 = vmul.f32 0.003921569, %v890_v55  ;;  %v892_v60 = vpop.f32.mrb[5].mxu1 }
 0x171   : > { %v1076_v61 = vmul.f32 0.003921569, %v849_v58  ;;  %v851_v62 = vpop.f32.mrb[6].mxu0  ;;  %v1078_v63 = vmul.f32 0.003921569, %v892_v60  ;;  %v894_v1 = vpop.f32.mrb[6].mxu1 }
 0x172   : > { %v1119_v2 = vadd.f32 %v7745_v16, %v1075_v56  ;;  %v1091_v0 = vmul.f32 0.003921569, %v851_v62  ;;  %v853_v3 = vpop.f32.mrb[7].mxu0  ;;  %v1121_v4 = vadd.f32 %v7745_v16, %v1077_v59  ;;  %v1093_v6 = vmul.f32 0.003921569, %v894_v1  ;;  %v896_v7 = vpop.f32.mrb[7].mxu1 }
 0x173   : > { %v1120_v8 = vadd.f32 %v7745_v16, %v1076_v61  ;;  %v1092_v27 = vmul.f32 0.003921569, %v853_v3  ;;  %v1122_v9 = vadd.f32 %v7745_v16, %v1078_v63  ;;  %v1094_v10 = vmul.f32 0.003921569, %v896_v7 }
 0x174   : > { %v1151_v11 = vmax.f32 %v1119_v2, 0.0  ;;  %v1135_v12 = vadd.f32 %v7747_v17, %v1091_v0  ;;  %v1153_v13 = vmax.f32 %v1121_v4, 0.0  ;;  %v1137_v14 = vadd.f32 %v7747_v17, %v1093_v6 }
 0x175   : > { %v1136_v15 = vadd.f32 %v7747_v17, %v1092_v27  ;;  %v1154_v18 = vmax.f32 %v1122_v9, 0.0  ;;  %v1138_v19 = vadd.f32 %v7747_v17, %v1094_v10  ;;  %v1152_v22 = vmax.f32 %v1120_v8, 0.0 }
 0x176   : > { %v1167_v20 = vmax.f32 %v1135_v12, 0.0  ;;  %v1169_v21 = vmax.f32 %v1137_v14, 0.0 }
 0x177   : > { %v1168_v23 = vmax.f32 %v1136_v15, 0.0  ;;  %v1170_v24 = vmax.f32 %v1138_v19, 0.0 }
 0x178   : > { %v7773_v25 = vpack.c.bf16 %v1167_v20, %v1151_v11  ;;  %v7775_v26 = vpack.c.bf16 %v1169_v21, %v1153_v13 }
 0x179   : > { %v7777_v41 = vpack.c.bf16 %v1168_v23, %v1152_v22  ;;  %v7779_v28 = vpack.c.bf16 %v1170_v24, %v1154_v18 }
 0x1af   : > { %v933_v40 = vpop.f32.mrb[8].mxu0  ;;  %v976_v42 = vpop.f32.mrb[8].mxu1 }
 0x1b0   : > { %v1079_v43 = vmul.f32 0.003921569, %v933_v40  ;;  %v935_v44 = vpop.f32.mrb[9].mxu0  ;;  %v1081_v45 = vmul.f32 0.003921569, %v976_v42  ;;  %v978_v46 = vpop.f32.mrb[9].mxu1 }
 0x1b1   : > { %v1080_v47 = vmul.f32 0.003921569, %v935_v44  ;;  %v937_v48 = vpop.f32.mrb[10].mxu0  ;;  %v1082_v49 = vmul.f32 0.003921569, %v978_v46  ;;  %v980_v54 = vpop.f32.mrb[10].mxu1 }
 0x1b2   : > { %v1123_v55 = vadd.f32 %v7745_v16, %v1079_v43  ;;  %v1095_v56 = vmul.f32 0.003921569, %v937_v48  ;;  %v939_v58 = vpop.f32.mrb[11].mxu0  ;;  %v1125_v59 = vadd.f32 %v7745_v16, %v1081_v45  ;;  %v1097_v60 = vmul.f32 0.003921569, %v980_v54  ;;  %v982_v61 = vpop.f32.mrb[11].mxu1 }
 0x1b3   : > { %v1124_v62 = vadd.f32 %v7745_v16, %v1080_v47  ;;  %v1096_v63 = vmul.f32 0.003921569, %v939_v58  ;;  %v1126_v1 = vadd.f32 %v7745_v16, %v1082_v49  ;;  %v1098_v2 = vmul.f32 0.003921569, %v982_v61  ;;  %v6852_v61 = vld [vmem:[%s9316_s5 + $0xd4] ss:$8 sps:$4 sm:$0xff]  }
 0x1b4   : > { %v1155_v0 = vmax.f32 %v1123_v55, 0.0  ;;  %v1139_v3 = vadd.f32 %v7747_v17, %v1095_v56  ;;  %v1157_v4 = vmax.f32 %v1125_v59, 0.0  ;;  %v1141_v6 = vadd.f32 %v7747_v17, %v1097_v60  ;;  %v6829_v60 = vld [vmem:[%s9314_s3] ss:$8 sps:$4 sm:$0xff]  }
 0x1b5   : > { %v1140_v7 = vadd.f32 %v7747_v17, %v1096_v63  ;;  %v1158_v8 = vmax.f32 %v1126_v1, 0.0  ;;  %v1142_v27 = vadd.f32 %v7747_v17, %v1098_v2  ;;  %v1156_v11 = vmax.f32 %v1124_v62, 0.0  ;;  %v6834_v62 = vld [vmem:[%s9314_s3 + $0x10] ss:$8 sps:$4 sm:$0xff]   ;;  %v6858_v1 = vld [vmem:[%s9316_s5 + $0xe4] ss:$8 sps:$4 sm:$0xff]  }
 0x1b6   : > { %v1171_v9 = vmax.f32 %v1139_v3, 0.0  ;;  %v1173_v10 = vmax.f32 %v1141_v6, 0.0  ;;  %v6850_v63 = vld [vmem:[%s9316_s5 + $0xd0] ss:$8 sps:$4 sm:$0xff]   ;;  %v6856_v2 = vld [vmem:[%s9316_s5 + $0xe0] ss:$8 sps:$4 sm:$0xff]  }
 0x1b7   : > { %v1172_v12 = vmax.f32 %v1140_v7, 0.0  ;;  %v1174_v13 = vmax.f32 %v1142_v27, 0.0  ;;  %v6859_v3 = vld [vmem:[%s9316_s5 + $0x40] ss:$8 sps:$4 sm:$0xff]   ;;  %v6864_v6 = vld [vmem:[%s9316_s5 + $0xf4] ss:$8 sps:$4 sm:$0xff]  }
 0x1b8   : > { %v1187_v14 = vpack.c.bf16 %v1171_v9, %v1155_v0  ;;  %v1189_v15 = vpack.c.bf16 %v1173_v10, %v1157_v4  ;;  %v6861_v0 = vld [vmem:[%s9316_s5 + $0x44] ss:$8 sps:$4 sm:$0xff]   ;;  %v1308_v4 = vld [vmem:[%s9316_s5 + $0x50] sm:$0x11]  ;;  %v7891_v9 = vsel %vm1368_vm0, 65535, %v7461_v5 }
 0x1b9   : > { %v1188_v18 = vpack.c.bf16 %v1172_v12, %v1156_v11  ;;  %v1190_v19 = vpack.c.bf16 %v1174_v13, %v1158_v8  ;;  %1385 = vmatprep.subr.bf16.mxu1 %v6861_v0  ;;  %v5967_v7 = vcombine.high %v1308_v4, %v1308_v4  ;;  %v6862_v8 = vld [vmem:[%s9316_s5 + $0xf0] ss:$8 sps:$4 sm:$0xff]   ;;  %v5966_v27 = vcombine.low %v1308_v4, %v1308_v4  ;;  %v6003_v10 = vld [vmem:[%s9316_s5 + $0x100] sm:$0x11]  ;;  %v6908_v0 = vld [vmem:[%s9316_s5 + $0x214] ss:$8 sps:$4 sm:$0xff]  }
 0x1ba   : > { %6733 = vmatprep.subr.bf16.mxu0 %v1187_v14  ;;  %1386 = vmatpush1.bf16.msra.mxu1 %v6859_v3  ;;  %v6015_v12 = vcombine.high %v6003_v10, %v6003_v10  ;;  %v6014_v14 = vcombine.low %v6003_v10, %v6003_v10  ;;  %v6903_v3 = vld [vmem:[%s9316_s5 + $0x108] ss:$8 sps:$4 sm:$0xff]   ;;  %v6909_v10 = vld [vmem:[%s9316_s5 + $0x118] ss:$8 sps:$4 sm:$0xff]  }
 0x1bb   : > { %6734 = vmatpush3.bf16.msra.mxu0 %v7759_v51  ;;  %v1375_v11 = vand.u32 %v5967_v7, %v7891_v9  ;;  %v1372_v13 = vand.u32 %v5966_v27, %v7891_v9  ;;  %v6906_v7 = vld [vmem:[%s9316_s5 + $0x210] ss:$8 sps:$4 sm:$0xff]   ;;  %v6914_v27 = vld [vmem:[%s9316_s5 + $0x224] ss:$8 sps:$4 sm:$0xff]  }
 0x1bc   : > { %6735 = vmatprep.subr.bf16.mxu0 %v1188_v18  ;;  %v1648_v18 = vand.u32 %v6014_v14, %v7891_v9  ;;  %v6915_v14 = vld [vmem:[%s9316_s5 + $0x128] ss:$8 sps:$4 sm:$0xff]  }
 0x1bd   : > { %1387 = vmatprep.subr.bf16.mxu1 %v1375_v11  ;;  %v6917_v11 = vld [vmem:[%s9316_s5 + $0x12c] ss:$8 sps:$4 sm:$0xff]  }
 0x1be   : > { %1388 = vmatpush1.bf16.msra.mxu1 %v1372_v13  ;;  %v6920_v13 = vld [vmem:[%s9316_s5 + $0x234] ss:$8 sps:$4 sm:$0xff]  }
 0x1bf   : > { %6736 = vmatpush3.bf16.msra.mxu0 %v7763_v53 }
 0x1c0   : > { %6737 = vmatprep.subr.bf16.mxu0 %v1189_v15  ;;  %v1651_v15 = vand.u32 %v6015_v12, %v7891_v9  ;;  %v6912_v12 = vld [vmem:[%s9316_s5 + $0x220] ss:$8 sps:$4 sm:$0xff]  }
 0x1c3   : > { %6738 = vmatpush3.bf16.msra.mxu0 %v7757_v50 }
 0x1c4   : > { %6739 = vmatprep.subr.bf16.mxu0 %v1190_v19  ;;  %v6871_v19 = vld [vmem:[%s9316_s5 + $0x5c] ss:$8 sps:$4 sm:$0xff]  }
 0x1c5   : > { %1515 = vmatprep.subr.bf16.mxu1 %v6871_v19  ;;  %v6027_v19 = vld [vmem:[%s9316_s5 + $0x158] sm:$0x11] }
 0x1c7   : > { %6740 = vmatpush3.bf16.msra.mxu0 %v7761_v52 }
 0x1ef   : > { %v1019_v20 = vpop.f32.mrb[12].mxu0  ;;  %v1062_v21 = vpop.f32.mrb[12].mxu1 }
 0x1f0   : > { %v1083_v22 = vmul.f32 0.003921569, %v1019_v20  ;;  %v1085_v23 = vmul.f32 0.003921569, %v1062_v21  ;;  %v1021_v24 = vpop.f32.mrb[13].mxu0  ;;  %v1064_v29 = vpop.f32.mrb[13].mxu1 }
 0x1f1   : > { %v1084_v57 = vmul.f32 0.003921569, %v1021_v24  ;;  %v1086_v30 = vmul.f32 0.003921569, %v1064_v29  ;;  %v1023_v31 = vpop.f32.mrb[14].mxu0  ;;  %v1066_v32 = vpop.f32.mrb[14].mxu1 }
 0x1f2   : > { %v1127_v51 = vadd.f32 %v7745_v16, %v1083_v22  ;;  %v1129_v53 = vadd.f32 %v7745_v16, %v1085_v23  ;;  %v1099_v33 = vmul.f32 0.003921569, %v1023_v31  ;;  %v1101_v34 = vmul.f32 0.003921569, %v1066_v32  ;;  %v1025_v50 = vpop.f32.mrb[15].mxu0  ;;  %v1068_v35 = vpop.f32.mrb[15].mxu1 }
 0x1f3   : > { %v1128_v52 = vadd.f32 %v7745_v16, %v1084_v57  ;;  %v1130_v36 = vadd.f32 %v7745_v16, %v1086_v30  ;;  %v1100_v37 = vmul.f32 0.003921569, %v1025_v50  ;;  %v1102_v38 = vmul.f32 0.003921569, %v1068_v35  ;;  %v6874_v20 = vld [vmem:[%s9316_s5 + $0x164] ss:$8 sps:$4 sm:$0xff]   ;;  %v1206_v29 = vpop.permute.xlu1 %1205 }
 0x1f4   : > { %v1143_v39 = vadd.f32 %v7747_v17, %v1099_v33  ;;  %v1145_v40 = vadd.f32 %v7747_v17, %v1101_v34  ;;  %v1159_v44 = vmax.f32 %v1127_v51, 0.0  ;;  %v1161_v45 = vmax.f32 %v1129_v53, 0.0  ;;  %v6869_v51 = vld [vmem:[%s9316_s5 + $0x58] ss:$8 sps:$4 sm:$0xff]   ;;  %v6877_v34 = vld [vmem:[%s9316_s5 + $0x6c] ss:$8 sps:$4 sm:$0xff]  }
 0x1f5   : > { %v1144_v42 = vadd.f32 %v7747_v17, %v1100_v37  ;;  %v1146_v43 = vadd.f32 %v7747_v17, %v1102_v38  ;;  %v1160_v48 = vmax.f32 %v1128_v52, 0.0  ;;  %v1162_v49 = vmax.f32 %v1130_v36, 0.0  ;;  %v6840_v17 = vld [vmem:[%s9316_s5 + $0xb4] ss:$8 sps:$4 sm:$0xff]   ;;  %v6872_v35 = vld [vmem:[%s9316_s5 + $0x160] ss:$8 sps:$4 sm:$0xff]  }
 0x1f6   : > { %v1175_v46 = vmax.f32 %v1143_v39, 0.0  ;;  %v1177_v47 = vmax.f32 %v1145_v40, 0.0  ;;  %v6880_v38 = vld [vmem:[%s9316_s5 + $0x174] ss:$8 sps:$4 sm:$0xff]   ;;  %v6875_v40 = vld [vmem:[%s9316_s5 + $0x68] ss:$8 sps:$4 sm:$0xff]  }
 0x1f7   : > { %v1176_v54 = vmax.f32 %v1144_v42, 0.0  ;;  %v1178_v55 = vmax.f32 %v1146_v43, 0.0  ;;  %v6883_v43 = vld [vmem:[%s9316_s5 + $0x7c] ss:$8 sps:$4 sm:$0xff]  }
 0x1f8   : > { %v1191_v56 = vpack.c.bf16 %v1175_v46, %v1159_v44  ;;  %v1193_v16 = vpack.c.bf16 %v1177_v47, %v1161_v45  ;;  %v6878_v44 = vld [vmem:[%s9316_s5 + $0x170] ss:$8 sps:$4 sm:$0xff]   ;;  %v6886_v45 = vld [vmem:[%s9316_s5 + $0x184] ss:$8 sps:$4 sm:$0xff]  }
 0x1f9   : > { %v1192_v58 = vpack.c.bf16 %v1176_v54, %v1160_v48  ;;  %v1194_v59 = vpack.c.bf16 %v1178_v55, %v1162_v49  ;;  %v6881_v46 = vld [vmem:[%s9316_s5 + $0x78] ss:$8 sps:$4 sm:$0xff]   ;;  %v6889_v47 = vld [vmem:[%s9316_s5 + $0x8c] ss:$8 sps:$4 sm:$0xff]   ;;  %v6887_v55 = vld [vmem:[%s9316_s5 + $0x88] ss:$8 sps:$4 sm:$0xff]  }
 0x1fa   : > { %6741 = vmatprep.subr.bf16.mxu0 %v1191_v56  ;;  %v6884_v48 = vld [vmem:[%s9316_s5 + $0x180] ss:$8 sps:$4 sm:$0xff]   ;;  %v6892_v54 = vld [vmem:[%s9316_s5 + $0x194] ss:$8 sps:$4 sm:$0xff]  }
 0x1fb   : > { %6742 = vmatpush3.bf16.msra.mxu0 %v7773_v25  ;;  %v6832_v25 = vld [vmem:[%s9314_s3 + $0x14] ss:$8 sps:$4 sm:$0xff]   ;;  %v5979_v49 = vld [vmem:[%s9316_s5 + $0xa8] sm:$0x11] }
 0x1fc   : > { %6743 = vmatprep.subr.bf16.mxu0 %v1192_v58  ;;  %v6051_v56 = vld [vmem:[%s9316_s5 + $0x1b0] sm:$0x11]  ;;  %v5991_v58 = vcombine.high %v5979_v49, %v5979_v49 }
 0x1ff   : > { %6744 = vmatpush3.bf16.msra.mxu0 %v7777_v41  ;;  %v6838_v41 = vld [vmem:[%s9316_s5 + $0xb0] ss:$8 sps:$4 sm:$0xff]  }
 0x200   : > { %6745 = vmatprep.subr.bf16.mxu0 %v1193_v16  ;;  %v6895_v16 = vld [vmem:[%s9316_s5 + $0x9c] ss:$8 sps:$4 sm:$0xff]  }
 0x203   : > { %6746 = vmatpush3.bf16.msra.mxu0 %v7775_v26  ;;  %v6846_v26 = vld [vmem:[%s9316_s5 + $0xc4] ss:$8 sps:$4 sm:$0xff]  }
 0x204   : > { %6747 = vmatprep.subr.bf16.mxu0 %v1194_v59  ;;  %v6890_v59 = vld [vmem:[%s9316_s5 + $0x190] ss:$8 sps:$4 sm:$0xff]  }
 0x207   : > { %6748 = vmatpush3.bf16.msra.mxu0 %v7779_v28  ;;  %v6844_v28 = vld [vmem:[%s9316_s5 + $0xc0] ss:$8 sps:$4 sm:$0xff]  }
 0x208   : > { %1653 = vmatprep.subr.bf16.mxu0 %v6840_v17  ;;  %v6898_v17 = vld [vmem:[%s9316_s5 + $0x1a4] ss:$8 sps:$4 sm:$0xff]  }
 0x20a   : > { %1276 = vmatmul.mubr.bf16.vlgmr.msra.gmra.mrb[16].mxu0 %v6829_v60  ;;  %v6063_v60 = vcombine.high %v6051_v56, %v6051_v56 }
 0x20b   : > { %1283 = vmatprep.mubr.bf16.mxu0 %v6832_v25  ;;  %1654 = vmatpush1.bf16.msra.mxu0 %v6838_v41  ;;  %v6893_v25 = vld [vmem:[%s9316_s5 + $0x98] ss:$8 sps:$4 sm:$0xff]   ;;  %v5990_v41 = vcombine.low %v5979_v49, %v5979_v49  ;;  %v6951_v49 = vld [vmem:[%s9316_s5 + $0x1dc] ss:$8 sps:$4 sm:$0xff]  }
 0x20c   : > { %1655 = vmatprep.subr.bf16.mxu0 %v6846_v26  ;;  %v1513_v26 = vand.u32 %v5991_v58, %v7891_v9  ;;  %v6075_v58 = vld [vmem:[%s9316_s5 + $0x208] sm:$0x11] }
 0x20f   : > { %1656 = vmatpush1.bf16.msra.mxu0 %v6844_v28  ;;  %v6896_v28 = vld [vmem:[%s9316_s5 + $0x1a0] ss:$8 sps:$4 sm:$0xff]  }
 0x210   : > { %1657 = vmatprep.subr.bf16.mxu0 %v6852_v61  ;;  %v6062_v61 = vcombine.low %v6051_v56, %v6051_v56  ;;  %v6957_v56 = vld [vmem:[%s9316_s5 + $0x1ec] ss:$8 sps:$4 sm:$0xff]  }
 0x212   : > { %1284 = vmatmul.mubr.bf16.gmra.mrb[20].mxu0 %v6834_v62  ;;  %v1925_v62 = vand.u32 %v6063_v60, %v7891_v9  ;;  %v6147_v60 = vld [vmem:[%s9316_s5 + $0x310] sm:$0x11] }
 0x213   : > { %1658 = vmatpush1.bf16.msra.mxu0 %v6850_v63  ;;  %1685 = vmatprep.mubr.bf16.mxu0 %v7461_v5  ;;  %v1510_v63 = vand.u32 %v5990_v41, %v7891_v9  ;;  %v6087_v41 = vcombine.high %v6075_v58, %v6075_v58 }
 0x214   : > { %1659 = vmatprep.subr.bf16.mxu0 %v6858_v1  ;;  %v6905_v1 = vld [vmem:[%s9316_s5 + $0x10c] ss:$8 sps:$4 sm:$0xff]  }
 0x217   : > { %1660 = vmatpush1.bf16.msra.mxu0 %v6856_v2  ;;  %v1922_v2 = vand.u32 %v6062_v61, %v7891_v9  ;;  %v6159_v61 = vcombine.high %v6147_v60, %v6147_v60 }
 0x218   : > { %1661 = vmatprep.subr.bf16.mxu0 %v6864_v6  ;;  %v6911_v6 = vld [vmem:[%s9316_s5 + $0x11c] ss:$8 sps:$4 sm:$0xff]  }
 0x21b   : > { %1662 = vmatpush1.bf16.msra.mxu0 %v6862_v8 }
 0x21c   : > { %1663 = vmatprep.subr.bf16.mxu0 %v1651_v15  ;;  %v6923_v15 = vld [vmem:[%s9316_s5 + $0x13c] ss:$8 sps:$4 sm:$0xff]  }
 0x21f   : > { %1664 = vmatpush1.bf16.msra.mxu0 %v1648_v18  ;;  %v6918_v18 = vld [vmem:[%s9316_s5 + $0x230] ss:$8 sps:$4 sm:$0xff]  }
 0x220   : > { %1927 = vmatprep.subr.bf16.mxu0 %v6874_v20  ;;  %v6926_v20 = vld [vmem:[%s9316_s5 + $0x244] ss:$8 sps:$4 sm:$0xff]  }
 0x2dd   : > { %v6749_v21 = vpop.f32.mrb[16].mxu0 }
 0x2de   : > { %v6750_v22 = vpop.f32.mrb[17].mxu0 }
 0x2df   : > { %v6751_v23 = vadd.f32 %v6750_v22, %v6749_v21  ;;  %v6752_v24 = vpop.f32.mrb[18].mxu0  ;;  %v6921_v21 = vld [vmem:[%s9316_s5 + $0x138] ss:$8 sps:$4 sm:$0xff]  }
 0x2e0   : > { %v6753_v57 = vpop.f32.mrb[19].mxu0  ;;  %v6099_v22 = vld [vmem:[%s9316_s5 + $0x260] sm:$0x11] }
 0x2e1   : > { %v1278_v30 = vadd.f32 %v6751_v23, %v1206_v29  ;;  %v7906_v31 = vadd.f32 %v6753_v57, %v6752_v24  ;;  %v6929_v23 = vld [vmem:[%s9316_s5 + $0x14c] ss:$8 sps:$4 sm:$0xff]   ;;  %v6039_v24 = vcombine.high %v6027_v19, %v6027_v19  ;;  %v6924_v29 = vld [vmem:[%s9316_s5 + $0x240] ss:$8 sps:$4 sm:$0xff]  }
 0x2e2   : > { %v6932_v57 = vld [vmem:[%s9316_s5 + $0x254] ss:$8 sps:$4 sm:$0xff]  }
 0x2e3   : > { %v1292_v32 = vmax.f32 %v1278_v30, 0.0  ;;  %v6111_v30 = vcombine.high %v6099_v22, %v6099_v22 }
 0x2e5   : > { %v7911_v53 = vpack.c.bf16 %v1292_v32, %v1292_v32  ;;  %v6755_v33 = vpop.f32.mrb[20].mxu0  ;;  %v6927_v32 = vld [vmem:[%s9316_s5 + $0x148] ss:$8 sps:$4 sm:$0xff]  }
 0x2e6   : > { %v6756_v50 = vpop.f32.mrb[21].mxu0 }
 0x2e7   : > { %v1588_v52 = vrot.slane %v7911_v53, 1  ;;  %v7920_v36 = vadd.f32 %v6756_v50, %v6755_v33  ;;  %v6758_v37 = vpop.f32.mrb[22].mxu0  ;;  %5968 = vmatmul.mubr.msk.bf16.vlgmr.msra.gmra.mrb[16].mxu1 %vm1364_vm1, %v7911_v53  ;;  %v7994_v4 = vshrl.u32 %v7911_v53, 16  ;;  %v1862_v8 = vrot.slane %v7911_v53, 2 }
 0x2e8   : > { %1516 = vmatpush1.bf16.msra.mxu1 %v6869_v51  ;;  %v6759_v39 = vpop.f32.mrb[23].mxu0  ;;  %1547 = vmatprep.mubr.bf16.mxu1 %v7461_v5  ;;  %v6038_v51 = vcombine.low %v6027_v19, %v6027_v19  ;;  %v1788_v33 = vand.u32 %v6039_v24, %v7891_v9  ;;  %v6110_v50 = vcombine.low %v6099_v22, %v6099_v22  ;;  %v6982_v19 = vld [vmem:[%s9316_s5 + $0x384] ss:$8 sps:$4 sm:$0xff]   ;;  %v6980_v22 = vld [vmem:[%s9316_s5 + $0x380] ss:$8 sps:$4 sm:$0xff]  }
 0x2e9   : > { %v7931_v42 = vadd.f32 %v6759_v39, %v6758_v37  ;;  %6016 = vmatmul.mubr.msk.bf16.vlgmr.msra.gmra.mrb[24].mxu0 %vm1364_vm1, %v1588_v52  ;;  %1517 = vmatprep.subr.bf16.mxu1 %v6877_v34  ;;  %v6930_v34 = vld [vmem:[%s9316_s5 + $0x250] ss:$8 sps:$4 sm:$0xff]   ;;  %v6939_v37 = vld [vmem:[%s9316_s5 + $0x1bc] ss:$8 sps:$4 sm:$0xff]  }
 0x2ea   : > { %1928 = vmatpush1.bf16.msra.mxu0 %v6872_v35  ;;  %1959 = vmatprep.mubr.bf16.mxu0 %v7461_v5  ;;  %v2199_v35 = vand.u32 %v6111_v30, %v7891_v9  ;;  %v1785_v52 = vand.u32 %v6038_v51, %v7891_v9  ;;  %v6942_v39 = vld [vmem:[%s9316_s5 + $0x2c4] ss:$8 sps:$4 sm:$0xff]   ;;  %v6983_v24 = vld [vmem:[%s9316_s5 + $0x288] ss:$8 sps:$4 sm:$0xff]   ;;  %v6123_v30 = vld [vmem:[%s9316_s5 + $0x2b8] sm:$0x11] }
 0x2eb   : > { %1929 = vmatprep.subr.bf16.mxu0 %v6880_v38  ;;  %v2196_v38 = vand.u32 %v6110_v50, %v7891_v9  ;;  %v6989_v51 = vld [vmem:[%s9316_s5 + $0x298] ss:$8 sps:$4 sm:$0xff]   ;;  %v6135_v50 = vcombine.high %v6123_v30, %v6123_v30 }
 0x2ec   : > { %1518 = vmatpush1.bf16.msra.mxu1 %v6875_v40  ;;  %v6937_v40 = vld [vmem:[%s9316_s5 + $0x1b8] ss:$8 sps:$4 sm:$0xff]  }
 0x2ed   : > { %1519 = vmatprep.subr.bf16.mxu1 %v6883_v43  ;;  %v1725_v43 = vrot.slane %v7994_v4, 1 }
 0x2ee   : > { %1930 = vmatpush1.bf16.msra.mxu0 %v6878_v44  ;;  %v6945_v44 = vld [vmem:[%s9316_s5 + $0x1cc] ss:$8 sps:$4 sm:$0xff]  }
 0x2ef   : > { %1931 = vmatprep.subr.bf16.mxu0 %v6886_v45  ;;  %v6940_v45 = vld [vmem:[%s9316_s5 + $0x2c0] ss:$8 sps:$4 sm:$0xff]  }
 0x2f0   : > { %1520 = vmatpush1.bf16.msra.mxu1 %v6881_v46  ;;  %v2136_v46 = vrot.slane %v7911_v53, 3  ;;  %v6946_v53 = vld [vmem:[%s9316_s5 + $0x2d0] ss:$8 sps:$4 sm:$0xff]  }
 0x2f1   : > { %1521 = vmatprep.subr.bf16.mxu1 %v6889_v47  ;;  %v6948_v47 = vld [vmem:[%s9316_s5 + $0x2d4] ss:$8 sps:$4 sm:$0xff]  }
 0x2f2   : > { %1932 = vmatpush1.bf16.msra.mxu0 %v6884_v48  ;;  %v6943_v48 = vld [vmem:[%s9316_s5 + $0x1c8] ss:$8 sps:$4 sm:$0xff]  }
 0x2f3   : > { %1933 = vmatprep.subr.bf16.mxu0 %v6892_v54  ;;  %v6954_v54 = vld [vmem:[%s9316_s5 + $0x2e4] ss:$8 sps:$4 sm:$0xff]  }
 0x2f4   : > { %1522 = vmatpush1.bf16.msra.mxu1 %v6887_v55  ;;  %v6949_v55 = vld [vmem:[%s9316_s5 + $0x1d8] ss:$8 sps:$4 sm:$0xff]  }
 0x2f5   : > { %1523 = vmatprep.subr.bf16.mxu1 %v6895_v16  ;;  %v6952_v16 = vld [vmem:[%s9316_s5 + $0x2e0] ss:$8 sps:$4 sm:$0xff]  }
 0x2f6   : > { %1934 = vmatpush1.bf16.msra.mxu0 %v6890_v59  ;;  %v6960_v59 = vld [vmem:[%s9316_s5 + $0x2f4] ss:$8 sps:$4 sm:$0xff]  }
 0x2f7   : > { %1935 = vmatprep.subr.bf16.mxu0 %v6898_v17  ;;  %v6955_v17 = vld [vmem:[%s9316_s5 + $0x1e8] ss:$8 sps:$4 sm:$0xff]  }
 0x2f8   : > { %1524 = vmatpush1.bf16.msra.mxu1 %v6893_v25  ;;  %v6963_v25 = vld [vmem:[%s9316_s5 + $0x1fc] ss:$8 sps:$4 sm:$0xff]  }
 0x2f9   : > { %1525 = vmatprep.subr.bf16.mxu1 %v1513_v26  ;;  %v6958_v26 = vld [vmem:[%s9316_s5 + $0x2f0] ss:$8 sps:$4 sm:$0xff]  }
 0x2fa   : > { %1936 = vmatpush1.bf16.msra.mxu0 %v6896_v28  ;;  %v6966_v28 = vld [vmem:[%s9316_s5 + $0x304] ss:$8 sps:$4 sm:$0xff]  }
 0x2fb   : > { %1937 = vmatprep.subr.bf16.mxu0 %v1925_v62  ;;  %v6961_v62 = vld [vmem:[%s9316_s5 + $0x1f8] ss:$8 sps:$4 sm:$0xff]  }
 0x2fc   : > { %1526 = vmatpush1.bf16.msra.mxu1 %v1510_v63  ;;  %v6086_v63 = vcombine.low %v6075_v58, %v6075_v58  ;;  %v7016_v58 = vld [vmem:[%s9316_s5 + $0x434] ss:$8 sps:$4 sm:$0xff]  }
 0x2fd   : > { %1790 = vmatprep.subr.bf16.mxu1 %v6905_v1  ;;  %v2062_v1 = vand.u32 %v6087_v41, %v7891_v9  ;;  %v7025_v41 = vld [vmem:[%s9316_s5 + $0x34c] ss:$8 sps:$4 sm:$0xff]  }
 0x2fe   : > { %1938 = vmatpush1.bf16.msra.mxu0 %v1922_v2  ;;  %v1211_v2 = vpop.permute.xlu1 %1210 }
 0x2ff   : > { %5992 = vmatmul.mubr.msk.bf16.vlgmr.msra.gmra.mrb[20].mxu1 %vm1364_vm1, %v7994_v4  ;;  %2201 = vmatprep.subr.bf16.mxu0 %v6908_v0  ;;  %v6964_v0 = vld [vmem:[%s9316_s5 + $0x300] ss:$8 sps:$4 sm:$0xff]  }
 0x300   : > { %1791 = vmatpush1.bf16.msra.mxu1 %v6903_v3  ;;  %1822 = vmatprep.mubr.bf16.mxu1 %v7461_v5  ;;  %v6158_v3 = vcombine.low %v6147_v60, %v6147_v60  ;;  %v7022_v60 = vld [vmem:[%s9316_s5 + $0x444] ss:$8 sps:$4 sm:$0xff]  }
 0x301   : > { %6064 = vmatmul.mubr.msk.bf16.vlgmr.msra.gmra.mrb[28].mxu0 %vm1364_vm1, %v1862_v8  ;;  %1792 = vmatprep.subr.bf16.mxu1 %v6911_v6  ;;  %v1281_v6 = vadd.f32 %v7906_v31, %v1211_v2  ;;  %v2059_v8 = vand.u32 %v6086_v63, %v7891_v9  ;;  %v6976_v31 = vld [vmem:[%s9316_s5 + $0x374] ss:$8 sps:$4 sm:$0xff]  }
 0x302   : > { %2202 = vmatpush1.bf16.msra.mxu0 %v6906_v7  ;;  %2233 = vmatprep.mubr.bf16.mxu0 %v7461_v5  ;;  %v2473_v7 = vand.u32 %v6159_v61, %v7891_v9  ;;  %v7028_v61 = vld [vmem:[%s9316_s5 + $0x454] ss:$8 sps:$4 sm:$0xff]  }
 0x303   : > { %2203 = vmatprep.subr.bf16.mxu0 %v6914_v27  ;;  %v6973_v27 = vld [vmem:[%s9316_s5 + $0x26c] ss:$8 sps:$4 sm:$0xff]  }
 0x304   : > { %1793 = vmatpush1.bf16.msra.mxu1 %v6909_v10  ;;  %v2470_v10 = vand.u32 %v6158_v3, %v7891_v9  ;;  %v6243_v63 = vld [vmem:[%s9316_s5 + $0x470] sm:$0x11]  ;;  %v7034_v3 = vld [vmem:[%s9316_s5 + $0x464] ss:$8 sps:$4 sm:$0xff]  }
 0x305   : > { %1794 = vmatprep.subr.bf16.mxu1 %v6917_v11  ;;  %v1293_v11 = vmax.f32 %v1281_v6, 0.0  ;;  %v6255_v6 = vcombine.high %v6243_v63, %v6243_v63 }
 0x306   : > { %2204 = vmatpush1.bf16.msra.mxu0 %v6912_v12  ;;  %v6971_v12 = vld [vmem:[%s9316_s5 + $0x268] ss:$8 sps:$4 sm:$0xff]  }
 0x307   : > { %2205 = vmatprep.subr.bf16.mxu0 %v6920_v13  ;;  %v1999_v13 = vrot.slane %v7994_v4, 2 }
 0x308   : > { %1795 = vmatpush1.bf16.msra.mxu1 %v6915_v14  ;;  %v6979_v14 = vld [vmem:[%s9316_s5 + $0x27c] ss:$8 sps:$4 sm:$0xff]  }
 0x309   : > { %1796 = vmatprep.subr.bf16.mxu1 %v6923_v15  ;;  %v6974_v15 = vld [vmem:[%s9316_s5 + $0x370] ss:$8 sps:$4 sm:$0xff]  }
 0x30a   : > { %2206 = vmatpush1.bf16.msra.mxu0 %v6918_v18  ;;  %v8156_v18 = vpack.c.bf16 %v1293_v11, %v1293_v11  ;;  %v6254_v11 = vcombine.low %v6243_v63, %v6243_v63  ;;  %v7088_v63 = vld [vmem:[%s9316_s5 + $0x5a0] ss:$8 sps:$4 sm:$0xff]  }
 0x30b   : > { %2207 = vmatprep.subr.bf16.mxu0 %v6926_v20  ;;  %v6977_v20 = vld [vmem:[%s9316_s5 + $0x278] ss:$8 sps:$4 sm:$0xff]  }
 0x30c   : > { %1797 = vmatpush1.bf16.msra.mxu1 %v6921_v21  ;;  %v6985_v21 = vld [vmem:[%s9316_s5 + $0x28c] ss:$8 sps:$4 sm:$0xff]  }
 0x30d   : > { %1798 = vmatprep.subr.bf16.mxu1 %v6929_v23  ;;  %v6988_v23 = vld [vmem:[%s9316_s5 + $0x394] ss:$8 sps:$4 sm:$0xff]  }
 0x30e   : > { %2208 = vmatpush1.bf16.msra.mxu0 %v6924_v29  ;;  %v6991_v29 = vld [vmem:[%s9316_s5 + $0x29c] ss:$8 sps:$4 sm:$0xff]  }
 0x30f   : > { %2209 = vmatprep.subr.bf16.mxu0 %v6932_v57  ;;  %v6986_v57 = vld [vmem:[%s9316_s5 + $0x390] ss:$8 sps:$4 sm:$0xff]  }
 0x310   : > { %1799 = vmatpush1.bf16.msra.mxu1 %v6927_v32  ;;  %v6994_v32 = vld [vmem:[%s9316_s5 + $0x3a4] ss:$8 sps:$4 sm:$0xff]  }
 0x311   : > { %1800 = vmatprep.subr.bf16.mxu1 %v1788_v33  ;;  %v6195_v33 = vld [vmem:[%s9316_s5 + $0x3c0] sm:$0x11] }
 0x312   : > { %2210 = vmatpush1.bf16.msra.mxu0 %v6930_v34  ;;  %v6997_v34 = vld [vmem:[%s9316_s5 + $0x2ac] ss:$8 sps:$4 sm:$0xff]  }
 0x313   : > { %2211 = vmatprep.subr.bf16.mxu0 %v2199_v35  ;;  %v6992_v35 = vld [vmem:[%s9316_s5 + $0x3a0] ss:$8 sps:$4 sm:$0xff]  }
 0x314   : > { %1801 = vmatpush1.bf16.msra.mxu1 %v1785_v52  ;;  %v7000_v52 = vld [vmem:[%s9316_s5 + $0x3b4] ss:$8 sps:$4 sm:$0xff]  }
 0x315   : > { %2064 = vmatprep.subr.bf16.mxu1 %v6939_v37  ;;  %v6207_v37 = vcombine.high %v6195_v33, %v6195_v33 }
 0x316   : > { %2212 = vmatpush1.bf16.msra.mxu0 %v2196_v38  ;;  %v6995_v38 = vld [vmem:[%s9316_s5 + $0x2a8] ss:$8 sps:$4 sm:$0xff]  }
 0x317   : > { %6040 = vmatmul.mubr.msk.bf16.vlgmr.msra.gmra.mrb[24].mxu1 %vm1364_vm1, %v1725_v43  ;;  %2475 = vmatprep.subr.bf16.mxu0 %v6942_v39  ;;  %v6134_v39 = vcombine.low %v6123_v30, %v6123_v30  ;;  %v6998_v43 = vld [vmem:[%s9316_s5 + $0x3b0] ss:$8 sps:$4 sm:$0xff]   ;;  %v7048_v30 = vld [vmem:[%s9316_s5 + $0x4e0] ss:$8 sps:$4 sm:$0xff]  }
 0x318   : > { %2065 = vmatpush1.bf16.msra.mxu1 %v6937_v40  ;;  %2096 = vmatprep.mubr.bf16.mxu1 %v7461_v5  ;;  %v2336_v40 = vand.u32 %v6135_v50, %v7891_v9  ;;  %v6219_v50 = vld [vmem:[%s9316_s5 + $0x418] sm:$0x11] }
 0x319   : > { %6112 = vmatmul.mubr.msk.bf16.vlgmr.msra.gmra.mrb[32].mxu0 %vm1364_vm1, %v2136_v46  ;;  %2066 = vmatprep.subr.bf16.mxu1 %v6945_v44  ;;  %v6206_v44 = vcombine.low %v6195_v33, %v6195_v33  ;;  %v2333_v46 = vand.u32 %v6134_v39, %v7891_v9  ;;  %v7059_v33 = vld [vmem:[%s9316_s5 + $0x3fc] ss:$8 sps:$4 sm:$0xff]   ;;  %v6231_v39 = vcombine.high %v6219_v50, %v6219_v50 }
 0x31a   : > { %2476 = vmatpush1.bf16.msra.mxu0 %v6940_v45  ;;  %2507 = vmatprep.mubr.bf16.mxu0 %v7461_v5  ;;  %v2749_v45 = vand.u32 %v6207_v37, %v7891_v9  ;;  %v6291_v37 = vld [vmem:[%s9316_s5 + $0x520] sm:$0x11] }
 0x31b   : > { %2477 = vmatprep.subr.bf16.mxu0 %v6948_v47  ;;  %v7007_v47 = vld [vmem:[%s9316_s5 + $0x31c] ss:$8 sps:$4 sm:$0xff]  }
 0x31c   : > { %2067 = vmatpush1.bf16.msra.mxu1 %v6943_v48  ;;  %v2746_v48 = vand.u32 %v6206_v44, %v7891_v9  ;;  %v6303_v44 = vcombine.high %v6291_v37, %v6291_v37 }
 0x31d   : > { %2068 = vmatprep.subr.bf16.mxu1 %v6951_v49  ;;  %v7010_v49 = vld [vmem:[%s9316_s5 + $0x424] ss:$8 sps:$4 sm:$0xff]  }
 0x31e   : > { %2478 = vmatpush1.bf16.msra.mxu0 %v6946_v53  ;;  %v7005_v53 = vld [vmem:[%s9316_s5 + $0x318] ss:$8 sps:$4 sm:$0xff]  }
 0x31f   : > { %2479 = vmatprep.subr.bf16.mxu0 %v6954_v54  ;;  %v2273_v54 = vrot.slane %v7994_v4, 3  ;;  %v7011_v4 = vld [vmem:[%s9316_s5 + $0x328] ss:$8 sps:$4 sm:$0xff]  }
 0x320   : > { %2069 = vmatpush1.bf16.msra.mxu1 %v6949_v55  ;;  %v7013_v55 = vld [vmem:[%s9316_s5 + $0x32c] ss:$8 sps:$4 sm:$0xff]  }
 0x321   : > { %2070 = vmatprep.subr.bf16.mxu1 %v6957_v56  ;;  %v7008_v56 = vld [vmem:[%s9316_s5 + $0x420] ss:$8 sps:$4 sm:$0xff]  }
 0x322   : > { %2480 = vmatpush1.bf16.msra.mxu0 %v6952_v16  ;;  %v2686_v16 = vrot.slane %v8156_v18, 1 }
 0x323   : > { %2481 = vmatprep.subr.bf16.mxu0 %v6960_v59  ;;  %v7019_v59 = vld [vmem:[%s9316_s5 + $0x33c] ss:$8 sps:$4 sm:$0xff]  }
 0x324   : > { %2071 = vmatpush1.bf16.msra.mxu1 %v6955_v17  ;;  %v7014_v17 = vld [vmem:[%s9316_s5 + $0x430] ss:$8 sps:$4 sm:$0xff]  }
 0x325   : > { %2072 = vmatprep.subr.bf16.mxu1 %v6963_v25  ;;  %v7017_v25 = vld [vmem:[%s9316_s5 + $0x338] ss:$8 sps:$4 sm:$0xff]  }
 0x326   : > { %2482 = vmatpush1.bf16.msra.mxu0 %v6958_v26  ;;  %v7020_v26 = vld [vmem:[%s9316_s5 + $0x440] ss:$8 sps:$4 sm:$0xff]  }
 0x327   : > { %2483 = vmatprep.subr.bf16.mxu0 %v6966_v28  ;;  %v6171_v28 = vld [vmem:[%s9316_s5 + $0x368] sm:$0x11] }
 0x328   : > { %2073 = vmatpush1.bf16.msra.mxu1 %v6961_v62  ;;  %v7023_v62 = vld [vmem:[%s9316_s5 + $0x348] ss:$8 sps:$4 sm:$0xff]   ;;  %v6183_v2 = vcombine.high %v6171_v28, %v6171_v28 }
 0x329   : > { %2074 = vmatprep.subr.bf16.mxu1 %v2062_v1  ;;  %v7031_v1 = vld [vmem:[%s9316_s5 + $0x35c] ss:$8 sps:$4 sm:$0xff]  }
 0x32a   : > { %2484 = vmatpush1.bf16.msra.mxu0 %v6964_v0  ;;  %v7026_v0 = vld [vmem:[%s9316_s5 + $0x450] ss:$8 sps:$4 sm:$0xff]  }
 0x32b   : > { %2485 = vmatprep.subr.bf16.mxu0 %v2473_v7  ;;  %v7029_v7 = vld [vmem:[%s9316_s5 + $0x358] ss:$8 sps:$4 sm:$0xff]  }
 0x32c   : > { %2075 = vmatpush1.bf16.msra.mxu1 %v2059_v8  ;;  %v6182_v8 = vcombine.low %v6171_v28, %v6171_v28  ;;  %v7090_v28 = vld [vmem:[%s9316_s5 + $0x5a4] ss:$8 sps:$4 sm:$0xff]  }
 0x32d   : > { %2338 = vmatprep.subr.bf16.mxu1 %v6973_v27  ;;  %v2611_v27 = vand.u32 %v6183_v2, %v7891_v9  ;;  %v7096_v2 = vld [vmem:[%s9316_s5 + $0x5b4] ss:$8 sps:$4 sm:$0xff]  }
 0x32e   : > { %2486 = vmatpush1.bf16.msra.mxu0 %v2470_v10  ;;  %v7032_v10 = vld [vmem:[%s9316_s5 + $0x460] ss:$8 sps:$4 sm:$0xff]  }
 0x32f   : > { %6088 = vmatmul.mubr.msk.bf16.vlgmr.msra.gmra.mrb[28].mxu1 %vm1364_vm1, %v1999_v13  ;;  %2751 = vmatprep.subr.bf16.mxu0 %v6976_v31  ;;  %v3023_v31 = vand.u32 %v6255_v6, %v7891_v9  ;;  %v7041_v13 = vld [vmem:[%s9316_s5 + $0x3cc] ss:$8 sps:$4 sm:$0xff]   ;;  %v7099_v6 = vld [vmem:[%s9316_s5 + $0x4bc] ss:$8 sps:$4 sm:$0xff]  }
 0x330   : > { %2339 = vmatpush1.bf16.msra.mxu1 %v6971_v12  ;;  %2370 = vmatprep.mubr.bf16.mxu1 %v7461_v5  ;;  %v2608_v12 = vand.u32 %v6182_v8, %v7891_v9  ;;  %v7094_v8 = vld [vmem:[%s9316_s5 + $0x5b0] ss:$8 sps:$4 sm:$0xff]  }
 0x331   : > { %6160 = vmatmul.mubr.msk.bf16.vlgmr.msra.gmra.mrb[36].mxu0 %vm1364_vm1, %v8156_v18  ;;  %2340 = vmatprep.subr.bf16.mxu1 %v6979_v14  ;;  %v3020_v14 = vand.u32 %v6254_v11, %v7891_v9  ;;  %v7097_v11 = vld [vmem:[%s9316_s5 + $0x4b8] ss:$8 sps:$4 sm:$0xff]  }
 0x332   : > { %2752 = vmatpush1.bf16.msra.mxu0 %v6974_v15  ;;  %2783 = vmatprep.mubr.bf16.mxu0 %v7461_v5  ;;  %v7044_v15 = vld [vmem:[%s9316_s5 + $0x4d4] ss:$8 sps:$4 sm:$0xff]  }
 0x333   : > { %2753 = vmatprep.subr.bf16.mxu0 %v6982_v19  ;;  %v7039_v19 = vld [vmem:[%s9316_s5 + $0x3c8] ss:$8 sps:$4 sm:$0xff]  }
 0x334   : > { %2341 = vmatpush1.bf16.msra.mxu1 %v6977_v20  ;;  %v8304_v20 = vshrl.u32 %v8156_v18, 16 }
 0x335   : > { %2342 = vmatprep.subr.bf16.mxu1 %v6985_v21  ;;  %v7047_v21 = vld [vmem:[%s9316_s5 + $0x3dc] ss:$8 sps:$4 sm:$0xff]  }
 0x336   : > { %2754 = vmatpush1.bf16.msra.mxu0 %v6980_v22  ;;  %v7042_v22 = vld [vmem:[%s9316_s5 + $0x4d0] ss:$8 sps:$4 sm:$0xff]  }
 0x337   : > { %2755 = vmatprep.subr.bf16.mxu0 %v6988_v23  ;;  %v2960_v23 = vrot.slane %v8156_v18, 2 }
 0x338   : > { %2343 = vmatpush1.bf16.msra.mxu1 %v6983_v24  ;;  %v7050_v24 = vld [vmem:[%s9316_s5 + $0x4e4] ss:$8 sps:$4 sm:$0xff]  }
 0x339   : > { %2344 = vmatprep.subr.bf16.mxu1 %v6991_v29  ;;  %v7045_v29 = vld [vmem:[%s9316_s5 + $0x3d8] ss:$8 sps:$4 sm:$0xff]  }
 0x33a   : > { %2756 = vmatpush1.bf16.msra.mxu0 %v6986_v57  ;;  %v7053_v57 = vld [vmem:[%s9316_s5 + $0x3ec] ss:$8 sps:$4 sm:$0xff]  }
 0x33b   : > { %2757 = vmatprep.subr.bf16.mxu0 %v6994_v32  ;;  %v7056_v32 = vld [vmem:[%s9316_s5 + $0x4f4] ss:$8 sps:$4 sm:$0xff]  }
 0x33c   : > { %2345 = vmatpush1.bf16.msra.mxu1 %v6989_v51  ;;  %v7051_v51 = vld [vmem:[%s9316_s5 + $0x3e8] ss:$8 sps:$4 sm:$0xff]  }
 0x33d   : > { %2346 = vmatprep.subr.bf16.mxu1 %v6997_v34  ;;  %v7054_v34 = vld [vmem:[%s9316_s5 + $0x4f0] ss:$8 sps:$4 sm:$0xff]  }
 0x33e   : > { %2758 = vmatpush1.bf16.msra.mxu0 %v6992_v35  ;;  %v7062_v35 = vld [vmem:[%s9316_s5 + $0x504] ss:$8 sps:$4 sm:$0xff]  }
 0x33f   : > { %2759 = vmatprep.subr.bf16.mxu0 %v7000_v52  ;;  %v7057_v52 = vld [vmem:[%s9316_s5 + $0x3f8] ss:$8 sps:$4 sm:$0xff]  }
 0x340   : > { %2347 = vmatpush1.bf16.msra.mxu1 %v6995_v38  ;;  %v7065_v38 = vld [vmem:[%s9316_s5 + $0x40c] ss:$8 sps:$4 sm:$0xff]  }
 0x341   : > { %2348 = vmatprep.subr.bf16.mxu1 %v2336_v40  ;;  %v7060_v40 = vld [vmem:[%s9316_s5 + $0x500] ss:$8 sps:$4 sm:$0xff]  }
 0x342   : > { %2760 = vmatpush1.bf16.msra.mxu0 %v6998_v43  ;;  %v7068_v43 = vld [vmem:[%s9316_s5 + $0x514] ss:$8 sps:$4 sm:$0xff]  }
 0x343   : > { %2761 = vmatprep.subr.bf16.mxu0 %v2749_v45  ;;  %v7063_v45 = vld [vmem:[%s9316_s5 + $0x408] ss:$8 sps:$4 sm:$0xff]  }
 0x344   : > { %2349 = vmatpush1.bf16.msra.mxu1 %v2333_v46  ;;  %v6230_v46 = vcombine.low %v6219_v50, %v6219_v50  ;;  %v7113_v50 = vld [vmem:[%s9316_s5 + $0x538] ss:$8 sps:$4 sm:$0xff]  }
 0x345   : > { %2613 = vmatprep.subr.bf16.mxu1 %v7007_v47  ;;  %v2886_v47 = vand.u32 %v6231_v39, %v7891_v9  ;;  %v7127_v39 = vld [vmem:[%s9316_s5 + $0x55c] ss:$8 sps:$4 sm:$0xff]  }
 0x346   : > { %2762 = vmatpush1.bf16.msra.mxu0 %v2746_v48  ;;  %v7066_v48 = vld [vmem:[%s9316_s5 + $0x510] ss:$8 sps:$4 sm:$0xff]  }
 0x347   : > { %6136 = vmatmul.mubr.msk.bf16.vlgmr.msra.gmra.mrb[32].mxu1 %vm1364_vm1, %v2273_v54  ;;  %3025 = vmatprep.subr.bf16.mxu0 %v7010_v49  ;;  %v6302_v49 = vcombine.low %v6291_v37, %v6291_v37  ;;  %v2883_v54 = vand.u32 %v6230_v46, %v7891_v9  ;;  %v7124_v37 = vld [vmem:[%s9316_s5 + $0x654] ss:$8 sps:$4 sm:$0xff]   ;;  %v6387_v46 = vld [vmem:[%s9316_s5 + $0x680] sm:$0x11] }
 0x348   : > { %2614 = vmatpush1.bf16.msra.mxu1 %v7005_v53  ;;  %2645 = vmatprep.mubr.bf16.mxu1 %v7461_v5  ;;  %v3297_v53 = vand.u32 %v6303_v44, %v7891_v9  ;;  %v7130_v44 = vld [vmem:[%s9316_s5 + $0x664] ss:$8 sps:$4 sm:$0xff]  }
 0x349   : > { %6208 = vmatmul.mubr.msk.bf16.vlgmr.msra.gmra.mrb[40].mxu0 %vm1364_vm1, %v2686_v16  ;;  %2615 = vmatprep.subr.bf16.mxu1 %v7013_v55  ;;  %v7075_v55 = vld [vmem:[%s9316_s5 + $0x47c] ss:$8 sps:$4 sm:$0xff]  }
 0x34a   : > { %3026 = vmatpush1.bf16.msra.mxu0 %v7008_v56  ;;  %3057 = vmatprep.mubr.bf16.mxu0 %v7461_v5  ;;  %v3294_v56 = vand.u32 %v6302_v49, %v7891_v9  ;;  %v7078_v16 = vld [vmem:[%s9316_s5 + $0x584] ss:$8 sps:$4 sm:$0xff]   ;;  %v7128_v49 = vld [vmem:[%s9316_s5 + $0x660] ss:$8 sps:$4 sm:$0xff]  }
 0x34b   : > { %3027 = vmatprep.subr.bf16.mxu0 %v7016_v58  ;;  %v7073_v58 = vld [vmem:[%s9316_s5 + $0x478] ss:$8 sps:$4 sm:$0xff]  }
 0x34c   : > { %2616 = vmatpush1.bf16.msra.mxu1 %v7011_v4  ;;  %v2823_v4 = vrot.slane %v8304_v20, 1 }
 0x34d   : > { %2617 = vmatprep.subr.bf16.mxu1 %v7019_v59  ;;  %v7081_v59 = vld [vmem:[%s9316_s5 + $0x48c] ss:$8 sps:$4 sm:$0xff]  }
 0x34e   : > { %3028 = vmatpush1.bf16.msra.mxu0 %v7014_v17  ;;  %v7076_v17 = vld [vmem:[%s9316_s5 + $0x580] ss:$8 sps:$4 sm:$0xff]  }
 0x34f   : > { %3029 = vmatprep.subr.bf16.mxu0 %v7022_v60  ;;  %v3234_v60 = vrot.slane %v8156_v18, 3  ;;  %v7082_v18 = vld [vmem:[%s9316_s5 + $0x590] ss:$8 sps:$4 sm:$0xff]  }
 0x350   : > { %2618 = vmatpush1.bf16.msra.mxu1 %v7017_v25  ;;  %v7084_v25 = vld [vmem:[%s9316_s5 + $0x594] ss:$8 sps:$4 sm:$0xff]  }
 0x351   : > { %2619 = vmatprep.subr.bf16.mxu1 %v7025_v41  ;;  %v7079_v41 = vld [vmem:[%s9316_s5 + $0x488] ss:$8 sps:$4 sm:$0xff]  }
 0x352   : > { %3030 = vmatpush1.bf16.msra.mxu0 %v7020_v26  ;;  %v7087_v26 = vld [vmem:[%s9316_s5 + $0x49c] ss:$8 sps:$4 sm:$0xff]  }
 0x353   : > { %3031 = vmatprep.subr.bf16.mxu0 %v7028_v61  ;;  %v7085_v61 = vld [vmem:[%s9316_s5 + $0x498] ss:$8 sps:$4 sm:$0xff]  }
 0x354   : > { %2620 = vmatpush1.bf16.msra.mxu1 %v7023_v62  ;;  %v7093_v62 = vld [vmem:[%s9316_s5 + $0x4ac] ss:$8 sps:$4 sm:$0xff]  }
 0x355   : > { %2621 = vmatprep.subr.bf16.mxu1 %v7031_v1  ;;  %v6267_v1 = vld [vmem:[%s9316_s5 + $0x4c8] sm:$0x11] }
 0x356   : > { %3032 = vmatpush1.bf16.msra.mxu0 %v7026_v0  ;;  %v7091_v0 = vld [vmem:[%s9316_s5 + $0x4a8] ss:$8 sps:$4 sm:$0xff]  }
 0x357   : > { %3033 = vmatprep.subr.bf16.mxu0 %v7034_v3  ;;  %v6339_v3 = vld [vmem:[%s9316_s5 + $0x5d0] sm:$0x11] }
 0x358   : > { %2622 = vmatpush1.bf16.msra.mxu1 %v7029_v7  ;;  %v6279_v7 = vcombine.high %v6267_v1, %v6267_v1 }
 0x359   : > { %2623 = vmatprep.subr.bf16.mxu1 %v2611_v27  ;;  %v7102_v27 = vld [vmem:[%s9316_s5 + $0x5c4] ss:$8 sps:$4 sm:$0xff]  }
 0x35a   : > { %3034 = vmatpush1.bf16.msra.mxu0 %v7032_v10  ;;  %v6351_v10 = vcombine.high %v6339_v3, %v6339_v3 }
 0x35b   : > { %3035 = vmatprep.subr.bf16.mxu0 %v3023_v31  ;;  %v6278_v31 = vcombine.low %v6267_v1, %v6267_v1  ;;  %v7155_v1 = vld [vmem:[%s9316_s5 + $0x5fc] ss:$8 sps:$4 sm:$0xff]  }
 0x35c   : > { %2624 = vmatpush1.bf16.msra.mxu1 %v2608_v12  ;;  %v3160_v12 = vand.u32 %v6279_v7, %v7891_v9  ;;  %v7156_v7 = vld [vmem:[%s9316_s5 + $0x700] ss:$8 sps:$4 sm:$0xff]  }
 0x35d   : > { %2888 = vmatprep.subr.bf16.mxu1 %v7041_v13  ;;  %v1216_v13 = vpop.permute.xlu0 %1215 }
 0x35e   : > { %3036 = vmatpush1.bf16.msra.mxu0 %v3020_v14  ;;  %v7100_v14 = vld [vmem:[%s9316_s5 + $0x5c0] ss:$8 sps:$4 sm:$0xff]  }
 0x35f   : > { %6184 = vmatmul.mubr.msk.bf16.vlgmr.msra.gmra.mrb[36].mxu1 %vm1364_vm1, %v8304_v20  ;;  %3299 = vmatprep.subr.bf16.mxu0 %v7044_v15  ;;  %v6350_v15 = vcombine.low %v6339_v3, %v6339_v3  ;;  %v7153_v3 = vld [vmem:[%s9316_s5 + $0x5f8] ss:$8 sps:$4 sm:$0xff]  }
 0x360   : > { %2889 = vmatpush1.bf16.msra.mxu1 %v7039_v19  ;;  %2920 = vmatprep.mubr.bf16.mxu1 %v7461_v5  ;;  %v1286_v19 = vadd.f32 %v7920_v36, %v1216_v13  ;;  %v7112_v36 = vld [vmem:[%s9316_s5 + $0x634] ss:$8 sps:$4 sm:$0xff]   ;;  %v7162_v13 = vld [vmem:[%s9316_s5 + $0x710] ss:$8 sps:$4 sm:$0xff]  }
 0x361   : > { %6256 = vmatmul.mubr.msk.bf16.vlgmr.msra.gmra.mrb[44].mxu0 %vm1364_vm1, %v2960_v23  ;;  %2890 = vmatprep.subr.bf16.mxu1 %v7047_v21  ;;  %v3571_v21 = vand.u32 %v6351_v10, %v7891_v9  ;;  %v7109_v23 = vld [vmem:[%s9316_s5 + $0x52c] ss:$8 sps:$4 sm:$0xff]   ;;  %v7159_v10 = vld [vmem:[%s9316_s5 + $0x608] ss:$8 sps:$4 sm:$0xff]  }
 0x362   : > { %3300 = vmatpush1.bf16.msra.mxu0 %v7042_v22  ;;  %3331 = vmatprep.mubr.bf16.mxu0 %v7461_v5  ;;  %v3157_v22 = vand.u32 %v6278_v31, %v7891_v9  ;;  %v7167_v31 = vld [vmem:[%s9316_s5 + $0x61c] ss:$8 sps:$4 sm:$0xff]  }
 0x363   : > { %3301 = vmatprep.subr.bf16.mxu0 %v7050_v24  ;;  %v3568_v24 = vand.u32 %v6350_v15, %v7891_v9 }
 0x364   : > { %2891 = vmatpush1.bf16.msra.mxu1 %v7045_v29  ;;  %v1294_v29 = vmax.f32 %v1286_v19, 0.0  ;;  %v7165_v19 = vld [vmem:[%s9316_s5 + $0x618] ss:$8 sps:$4 sm:$0xff]  }
 0x365   : > { %2892 = vmatprep.subr.bf16.mxu1 %v7053_v57  ;;  %v7107_v57 = vld [vmem:[%s9316_s5 + $0x528] ss:$8 sps:$4 sm:$0xff]  }
 0x366   : > { %3302 = vmatpush1.bf16.msra.mxu0 %v7048_v30  ;;  %v3097_v30 = vrot.slane %v8304_v20, 2 }
 0x367   : > { %3303 = vmatprep.subr.bf16.mxu0 %v7056_v32  ;;  %v7115_v32 = vld [vmem:[%s9316_s5 + $0x53c] ss:$8 sps:$4 sm:$0xff]  }
 0x368   : > { %2893 = vmatpush1.bf16.msra.mxu1 %v7051_v51  ;;  %v7110_v51 = vld [vmem:[%s9316_s5 + $0x630] ss:$8 sps:$4 sm:$0xff]  }
 0x369   : > { %2894 = vmatprep.subr.bf16.mxu1 %v7059_v33  ;;  %v8466_v33 = vpack.c.bf16 %v1294_v29, %v1294_v29 }
 0x36a   : > { %3304 = vmatpush1.bf16.msra.mxu0 %v7054_v34  ;;  %v7118_v34 = vld [vmem:[%s9316_s5 + $0x644] ss:$8 sps:$4 sm:$0xff]  }
 0x36b   : > { %3305 = vmatprep.subr.bf16.mxu0 %v7062_v35  ;;  %v7121_v35 = vld [vmem:[%s9316_s5 + $0x54c] ss:$8 sps:$4 sm:$0xff]  }
 0x36c   : > { %2895 = vmatpush1.bf16.msra.mxu1 %v7057_v52  ;;  %v7116_v52 = vld [vmem:[%s9316_s5 + $0x640] ss:$8 sps:$4 sm:$0xff]  }
 0x36d   : > { %2896 = vmatprep.subr.bf16.mxu1 %v7065_v38  ;;  %v7119_v38 = vld [vmem:[%s9316_s5 + $0x548] ss:$8 sps:$4 sm:$0xff]  }
 0x36e   : > { %3306 = vmatpush1.bf16.msra.mxu0 %v7060_v40  ;;  %v7122_v40 = vld [vmem:[%s9316_s5 + $0x650] ss:$8 sps:$4 sm:$0xff]  }
 0x36f   : > { %3307 = vmatprep.subr.bf16.mxu0 %v7068_v43  ;;  %v6315_v43 = vld [vmem:[%s9316_s5 + $0x578] sm:$0x11] }
 0x370   : > { %2897 = vmatpush1.bf16.msra.mxu1 %v7063_v45  ;;  %v7125_v45 = vld [vmem:[%s9316_s5 + $0x558] ss:$8 sps:$4 sm:$0xff]  }
 0x371   : > { %2898 = vmatprep.subr.bf16.mxu1 %v2886_v47  ;;  %v7133_v47 = vld [vmem:[%s9316_s5 + $0x56c] ss:$8 sps:$4 sm:$0xff]  }
 0x372   : > { %3308 = vmatpush1.bf16.msra.mxu0 %v7066_v48  ;;  %v6327_v48 = vcombine.high %v6315_v43, %v6315_v43 }
 0x373   : > { %3309 = vmatprep.subr.bf16.mxu0 %v3297_v53  ;;  %v7136_v53 = vld [vmem:[%s9316_s5 + $0x674] ss:$8 sps:$4 sm:$0xff]  }
 0x374   : > { %2899 = vmatpush1.bf16.msra.mxu1 %v2883_v54  ;;  %v6399_v54 = vcombine.high %v6387_v46, %v6387_v46 }
 0x375   : > { %3162 = vmatprep.subr.bf16.mxu1 %v7075_v55  ;;  %v7131_v55 = vld [vmem:[%s9316_s5 + $0x568] ss:$8 sps:$4 sm:$0xff]  }
 0x376   : > { %3310 = vmatpush1.bf16.msra.mxu0 %v3294_v56  ;;  %v6326_v56 = vcombine.low %v6315_v43, %v6315_v43  ;;  %v7183_v43 = vld [vmem:[%s9316_s5 + $0x69c] ss:$8 sps:$4 sm:$0xff]  }
 0x377   : > { %6232 = vmatmul.mubr.msk.bf16.vlgmr.msra.gmra.mrb[40].mxu1 %vm1364_vm1, %v2823_v4  ;;  %3573 = vmatprep.subr.bf16.mxu0 %v7078_v16  ;;  %v3434_v16 = vand.u32 %v6327_v48, %v7891_v9  ;;  %v6398_v4 = vcombine.low %v6387_v46, %v6387_v46  ;;  %v7178_v46 = vld [vmem:[%s9316_s5 + $0x790] ss:$8 sps:$4 sm:$0xff]   ;;  %v4058_v48 = vrot.slane %v8466_v33, 2 }
 0x378   : > { %3163 = vmatpush1.bf16.msra.mxu1 %v7073_v58  ;;  %3194 = vmatprep.mubr.bf16.mxu1 %v7461_v5  ;;  %v7134_v58 = vld [vmem:[%s9316_s5 + $0x670] ss:$8 sps:$4 sm:$0xff]  }
 0x379   : > { %6304 = vmatmul.mubr.msk.bf16.vlgmr.msra.gmra.mrb[48].mxu0 %vm1364_vm1, %v3234_v60  ;;  %3164 = vmatprep.subr.bf16.mxu1 %v7081_v59  ;;  %v3847_v59 = vand.u32 %v6399_v54, %v7891_v9  ;;  %v7143_v60 = vld [vmem:[%s9316_s5 + $0x5dc] ss:$8 sps:$4 sm:$0xff]   ;;  %v7189_v54 = vld [vmem:[%s9316_s5 + $0x6ac] ss:$8 sps:$4 sm:$0xff]  }
 0x37a   : > { %3574 = vmatpush1.bf16.msra.mxu0 %v7076_v17  ;;  %3605 = vmatprep.mubr.bf16.mxu0 %v7461_v5  ;;  %v3431_v17 = vand.u32 %v6326_v56, %v7891_v9  ;;  %v7192_v56 = vld [vmem:[%s9316_s5 + $0x7b4] ss:$8 sps:$4 sm:$0xff]  }
 0x37b   : > { %3575 = vmatprep.subr.bf16.mxu0 %v7084_v25  ;;  %v3844_v25 = vand.u32 %v6398_v4, %v7891_v9  ;;  %v1424_v4 = vlaneseq }
 0x37c   : > { %3165 = vmatpush1.bf16.msra.mxu1 %v7079_v41  ;;  %v7146_v41 = vld [vmem:[%s9316_s5 + $0x6e4] ss:$8 sps:$4 sm:$0xff]  }
 0x37d   : > { %3166 = vmatprep.subr.bf16.mxu1 %v7087_v26  ;;  %v7141_v26 = vld [vmem:[%s9316_s5 + $0x5d8] ss:$8 sps:$4 sm:$0xff]  }
 0x37e   : > { %3576 = vmatpush1.bf16.msra.mxu0 %v7082_v18  ;;  %v3371_v18 = vrot.slane %v8304_v20, 3  ;;  %v7147_v20 = vld [vmem:[%s9316_s5 + $0x5e8] ss:$8 sps:$4 sm:$0xff]  }
 0x37f   : > { %3577 = vmatprep.subr.bf16.mxu0 %v7090_v28  ;;  %v7149_v28 = vld [vmem:[%s9316_s5 + $0x5ec] ss:$8 sps:$4 sm:$0xff]  }
 0x380   : > { %3167 = vmatpush1.bf16.msra.mxu1 %v7085_v61  ;;  %v7144_v61 = vld [vmem:[%s9316_s5 + $0x6e0] ss:$8 sps:$4 sm:$0xff]  }
 0x381   : > { %3168 = vmatprep.subr.bf16.mxu1 %v7093_v62  ;;  %v3784_v62 = vrot.slane %v8466_v33, 1 }
 0x382   : > { %3578 = vmatpush1.bf16.msra.mxu0 %v7088_v63  ;;  %v7152_v63 = vld [vmem:[%s9316_s5 + $0x6f4] ss:$8 sps:$4 sm:$0xff]  }
 0x383   : > { %3579 = vmatprep.subr.bf16.mxu0 %v7096_v2  ;;  %v7150_v2 = vld [vmem:[%s9316_s5 + $0x6f0] ss:$8 sps:$4 sm:$0xff]  }
 0x384   : > { %3169 = vmatpush1.bf16.msra.mxu1 %v7091_v0  ;;  %v7158_v0 = vld [vmem:[%s9316_s5 + $0x704] ss:$8 sps:$4 sm:$0xff]  }
 0x385   : > { %3170 = vmatprep.subr.bf16.mxu1 %v7099_v6  ;;  %v7161_v6 = vld [vmem:[%s9316_s5 + $0x60c] ss:$8 sps:$4 sm:$0xff]  }
 0x386   : > { %3580 = vmatpush1.bf16.msra.mxu0 %v7094_v8  ;;  %v6363_v8 = vld [vmem:[%s9316_s5 + $0x628] sm:$0x11] }
 0x387   : > { %3581 = vmatprep.subr.bf16.mxu0 %v7102_v27  ;;  %v7164_v27 = vld [vmem:[%s9316_s5 + $0x714] ss:$8 sps:$4 sm:$0xff]  }
 0x388   : > { %3171 = vmatpush1.bf16.msra.mxu1 %v7097_v11  ;;  %v6435_v11 = vld [vmem:[%s9316_s5 + $0x730] sm:$0x11] }
 0x389   : > { %3172 = vmatprep.subr.bf16.mxu1 %v3160_v12  ;;  %v6375_v12 = vcombine.high %v6363_v8, %v6363_v8  ;;  %v6447_v15 = vcombine.high %v6435_v11, %v6435_v11 }
 0x38a   : > { %3582 = vmatpush1.bf16.msra.mxu0 %v7100_v14  ;;  %v7170_v14 = vld [vmem:[%s9316_s5 + $0x724] ss:$8 sps:$4 sm:$0xff]  }
 0x38b   : > { %3583 = vmatprep.subr.bf16.mxu0 %v3571_v21  ;;  %v6374_v21 = vcombine.low %v6363_v8, %v6363_v8  ;;  %v4121_v29 = vand.u32 %v6447_v15, %v7891_v9  ;;  %v7202_v8 = vld [vmem:[%s9316_s5 + $0x7d0] ss:$8 sps:$4 sm:$0xff]  }
 0x38c   : > { %3173 = vmatpush1.bf16.msra.mxu1 %v3157_v22  ;;  %v3709_v22 = vand.u32 %v6375_v12, %v7891_v9  ;;  %v7211_v12 = vld [vmem:[%s9316_s5 + $0x73c] ss:$8 sps:$4 sm:$0xff]  }
 0x38d   : > { %3436 = vmatprep.subr.bf16.mxu1 %v7109_v23  ;;  %v7168_v23 = vld [vmem:[%s9316_s5 + $0x720] ss:$8 sps:$4 sm:$0xff]  }
 0x38e   : > { %3584 = vmatpush1.bf16.msra.mxu0 %v3568_v24  ;;  %v6446_v24 = vcombine.low %v6435_v11, %v6435_v11 }
 0x38f   : > { %6280 = vmatmul.mubr.msk.bf16.vlgmr.msra.gmra.mrb[44].mxu1 %vm1364_vm1, %v3097_v30  ;;  %3849 = vmatprep.subr.bf16.mxu0 %v7112_v36  ;;  %v3706_v36 = vand.u32 %v6374_v21, %v7891_v9 }
 0x390   : > { %3437 = vmatpush1.bf16.msra.mxu1 %v7107_v57  ;;  %3468 = vmatprep.mubr.bf16.mxu1 %v7461_v5  ;;  %v7177_v57 = vld [vmem:[%s9316_s5 + $0x68c] ss:$8 sps:$4 sm:$0xff]  }
 0x391   : > { %6352 = vmatmul.mubr.msk.bf16.vlgmr.msra.gmra.mrb[52].mxu0 %vm1364_vm1, %v8466_v33  ;;  %3438 = vmatprep.subr.bf16.mxu1 %v7115_v32  ;;  %v4118_v32 = vand.u32 %v6446_v24, %v7891_v9 }
 0x392   : > { %3850 = vmatpush1.bf16.msra.mxu0 %v7110_v51  ;;  %3881 = vmatprep.mubr.bf16.mxu0 %v7461_v5 }
 0x393   : > { %3851 = vmatprep.subr.bf16.mxu0 %v7118_v34  ;;  %v7180_v34 = vld [vmem:[%s9316_s5 + $0x794] ss:$8 sps:$4 sm:$0xff]  }
 0x394   : > { %3439 = vmatpush1.bf16.msra.mxu1 %v7113_v50 }
 0x395   : > { %3440 = vmatprep.subr.bf16.mxu1 %v7121_v35 }
 0x396   : > { %3852 = vmatpush1.bf16.msra.mxu0 %v7116_v52 }
 0x397   : > { %3853 = vmatprep.subr.bf16.mxu0 %v7124_v37  ;;  %v7175_v37 = vld [vmem:[%s9316_s5 + $0x688] ss:$8 sps:$4 sm:$0xff]  }
 0x398   : > { %3441 = vmatpush1.bf16.msra.mxu1 %v7119_v38 }
 0x399   : > { %3442 = vmatprep.subr.bf16.mxu1 %v7127_v39 }
 0x39a   : > { %3854 = vmatpush1.bf16.msra.mxu0 %v7122_v40  ;;  %v8624_v40 = vshrl.u32 %v8466_v33, 16 }
 0x39b   : > { %3855 = vmatprep.subr.bf16.mxu0 %v7130_v44 }
 0x39c   : > { %3443 = vmatpush1.bf16.msra.mxu1 %v7125_v45 }
 0x39d   : > { %3444 = vmatprep.subr.bf16.mxu1 %v7133_v47 }
 0x39e   : > { %3856 = vmatpush1.bf16.msra.mxu0 %v7128_v49  ;;  %v7186_v49 = vld [vmem:[%s9316_s5 + $0x7a4] ss:$8 sps:$4 sm:$0xff]  }
 0x39f   : > { %3857 = vmatprep.subr.bf16.mxu0 %v7136_v53  ;;  %v7181_v53 = vld [vmem:[%s9316_s5 + $0x698] ss:$8 sps:$4 sm:$0xff]  }
 0x3a0   : > { %3445 = vmatpush1.bf16.msra.mxu1 %v7131_v55  ;;  %v7184_v55 = vld [vmem:[%s9316_s5 + $0x7a0] ss:$8 sps:$4 sm:$0xff]  }
 0x3a1   : > { %3446 = vmatprep.subr.bf16.mxu1 %v3434_v16  ;;  %v7462_v16 = vmov 1966171168  }
 0x3a2   : > { %3858 = vmatpush1.bf16.msra.mxu0 %v7134_v58  ;;  %v1422_v58 = vunpack.c.l.s4 %v7462_v16  ;;  %v7224_v16 = vld [vmem:[%s9316_s5 + $0x860] ss:$8 sps:$4 sm:$0xff]  }
 0x3a3   : > { %3859 = vmatprep.subr.bf16.mxu0 %v3847_v59  ;;  %v7187_v59 = vld [vmem:[%s9316_s5 + $0x6a8] ss:$8 sps:$4 sm:$0xff]  }
 0x3a4   : > { %3447 = vmatpush1.bf16.msra.mxu1 %v3431_v17  ;;  %v7195_v17 = vld [vmem:[%s9316_s5 + $0x6bc] ss:$8 sps:$4 sm:$0xff]  }
 0x3a5   : > { %3711 = vmatprep.subr.bf16.mxu1 %v7143_v60  ;;  %v7190_v60 = vld [vmem:[%s9316_s5 + $0x7b0] ss:$8 sps:$4 sm:$0xff]  }
 0x3a6   : > { %3860 = vmatpush1.bf16.msra.mxu0 %v3844_v25  ;;  %v6411_v25 = vld [vmem:[%s9316_s5 + $0x6d8] sm:$0x11] }
 0x3a7   : > { %6328 = vmatmul.mubr.msk.bf16.vlgmr.msra.gmra.mrb[48].mxu1 %vm1364_vm1, %v3371_v18  ;;  %4123 = vmatprep.subr.bf16.mxu0 %v7146_v41  ;;  %v7198_v41 = vld [vmem:[%s9316_s5 + $0x7c4] ss:$8 sps:$4 sm:$0xff]   ;;  %v8670_v18 = vshrl.u32 %v1424_v4, 7  ;;  %v7232_v4 = vld [vmem:[%s9316_s5 + $0x874] ss:$8 sps:$4 sm:$0xff]  }
 0x3a8   : > { %3712 = vmatpush1.bf16.msra.mxu1 %v7141_v26  ;;  %3743 = vmatprep.mubr.bf16.mxu1 %v7461_v5  ;;  %v1423_v26 = vunpack.c.0.s8 %v1422_v58  ;;  %v6459_v58 = vld [vmem:[%s9316_s5 + $0x788] sm:$0x11] }
 0x3a9   : > { %6400 = vmatmul.mubr.msk.bf16.vlgmr.msra.gmra.mrb[56].mxu0 %vm1364_vm1, %v3784_v62  ;;  %3713 = vmatprep.subr.bf16.mxu1 %v7149_v28  ;;  %v7193_v28 = vld [vmem:[%s9316_s5 + $0x6b8] ss:$8 sps:$4 sm:$0xff]   ;;  %v7201_v62 = vld [vmem:[%s9316_s5 + $0x6cc] ss:$8 sps:$4 sm:$0xff]  }
 0x3aa   : > { %4124 = vmatpush1.bf16.msra.mxu0 %v7144_v61  ;;  %4155 = vmatprep.mubr.bf16.mxu0 %v7461_v5  ;;  %v6483_v61 = vld [vmem:[%s9316_s5 + $0x7e0] sm:$0x11] }
 0x3ab   : > { %4125 = vmatprep.subr.bf16.mxu0 %v7152_v63  ;;  %v6423_v63 = vcombine.high %v6411_v25, %v6411_v25 }
 0x3ac   : > { %3714 = vmatpush1.bf16.msra.mxu1 %v7147_v20  ;;  %v7196_v20 = vld [vmem:[%s9316_s5 + $0x7c0] ss:$8 sps:$4 sm:$0xff]  }
 0x3ad   : > { %3715 = vmatprep.subr.bf16.mxu1 %v7155_v1  ;;  %v7204_v1 = vld [vmem:[%s9316_s5 + $0x7d4] ss:$8 sps:$4 sm:$0xff]  }
 0x3ae   : > { %4126 = vmatpush1.bf16.msra.mxu0 %v7150_v2  ;;  %v6495_v2 = vcombine.high %v6483_v61, %v6483_v61 }
 0x3af   : > { %4127 = vmatprep.subr.bf16.mxu0 %v7158_v0  ;;  %v8688_v0 = vsub.s32 %v1423_v26, %v8670_v18  ;;  %v7238_v26 = vld [vmem:[%s9316_s5 + $0x884] ss:$8 sps:$4 sm:$0xff]  }
 0x3b0   : > { %3716 = vmatpush1.bf16.msra.mxu1 %v7153_v3  ;;  %v7199_v3 = vld [vmem:[%s9316_s5 + $0x6c8] ss:$8 sps:$4 sm:$0xff]  }
 0x3b1   : > { %3717 = vmatprep.subr.bf16.mxu1 %v7161_v6  ;;  %v6422_v6 = vcombine.low %v6411_v25, %v6411_v25  ;;  %v6471_v25 = vcombine.high %v6459_v58, %v6459_v58 }
 0x3b2   : > { %4128 = vmatpush1.bf16.msra.mxu0 %v7156_v7  ;;  %v3984_v7 = vand.u32 %v6423_v63, %v7891_v9 }
 0x3b3   : > { %4129 = vmatprep.subr.bf16.mxu0 %v7164_v27  ;;  %v6494_v27 = vcombine.low %v6483_v61, %v6483_v61  ;;  %v7233_v61 = vld [vmem:[%s9316_s5 + $0x778] ss:$8 sps:$4 sm:$0xff]   ;;  %v4258_v63 = vand.u32 %v6471_v25, %v7891_v9 }
 0x3b4   : > { %3718 = vmatpush1.bf16.msra.mxu1 %v7159_v10  ;;  %v4395_v10 = vand.u32 %v6495_v2, %v7891_v9 }
 0x3b5   : > { %3719 = vmatprep.subr.bf16.mxu1 %v7167_v31  ;;  %v3981_v31 = vand.u32 %v6422_v6, %v7891_v9 }
 0x3b6   : > { %4130 = vmatpush1.bf16.msra.mxu0 %v7162_v13 }
 0x3b7   : > { %4131 = vmatprep.subr.bf16.mxu0 %v7170_v14  ;;  %v4392_v14 = vand.u32 %v6494_v27, %v7891_v9 }
 0x3b8   : > { %3720 = vmatpush1.bf16.msra.mxu1 %v7165_v19  ;;  %v7214_v19 = vld [vmem:[%s9316_s5 + $0x844] ss:$8 sps:$4 sm:$0xff]  }
 0x3b9   : > { %3721 = vmatprep.subr.bf16.mxu1 %v3709_v22 }
 0x3ba   : > { %4132 = vmatpush1.bf16.msra.mxu0 %v7168_v23  ;;  %v8606_v30 = vpop.f32.mrb[16].mxu1 }
 0x3bb   : > { %v8609_v51 = vpop.f32.mrb[17].mxu1  ;;  %4133 = vmatprep.subr.bf16.mxu0 %v4121_v29  ;;  %v3921_v29 = vrot.slane %v8624_v40, 1 }
 0x3bc   : > { %v1420_v50 = vcombine.low %v8606_v30, %v8609_v51  ;;  %3722 = vmatpush1.bf16.msra.mxu1 %v3706_v36  ;;  %v1415_v35 = vpop.f32.mrb[18].mxu1  ;;  %v8616_v52 = vpop.f32.mrb[24].mxu0  ;;  %v7209_v36 = vld [vmem:[%s9316_s5 + $0x738] ss:$8 sps:$4 sm:$0xff]   ;;  %v7217_v51 = vld [vmem:[%s9316_s5 + $0x74c] ss:$8 sps:$4 sm:$0xff]  }
 0x3bd   : > { %v1416_v38 = vpop.f32.mrb[19].mxu1  ;;  %v8621_v39 = vpop.f32.mrb[25].mxu0  ;;  %3986 = vmatprep.subr.bf16.mxu1 %v7177_v57  ;;  %v1296_v57 = vld [vmem:[%s9317_s6] sm:$0x3] }
 0x3be   : > { %v1696_v44 = vcombine.low %v8616_v52, %v8621_v39  ;;  %4134 = vmatpush1.bf16.msra.mxu0 %v4118_v32  ;;  %v1691_v45 = vpop.f32.mrb[26].mxu0  ;;  %v1427_v11 = vrot.slane %v1420_v50, %v8688_v0  ;;  %v7212_v38 = vld [vmem:[%s9316_s5 + $0x840] ss:$8 sps:$4 sm:$0xff]   ;;  %v7220_v52 = vld [vmem:[%s9316_s5 + $0x854] ss:$8 sps:$4 sm:$0xff]  }
 0x3bf   : > { %6376 = vmatmul.mubr.msk.bf16.vlgmr.msra.gmra.mrb[52].mxu1 %vm1364_vm1, %v8624_v40  ;;  %v1692_v47 = vpop.f32.mrb[27].mxu0  ;;  %4397 = vmatprep.subr.bf16.mxu0 %v7180_v34  ;;  %v4332_v45 = vrot.slane %v8466_v33, 3  ;;  %v7223_v33 = vld [vmem:[%s9316_s5 + $0x75c] ss:$8 sps:$4 sm:$0xff]  }
 0x3c0   : > { %3987 = vmatpush1.bf16.msra.mxu1 %v7175_v37  ;;  %4018 = vmatprep.mubr.bf16.mxu1 %v7461_v5  ;;  %v1434_v21 = vrot.slane %v1427_v11, %v8688_v0  ;;  %v1703_v34 = vrot.slane %v1696_v44, %v8688_v0 }
 0x3c1   : > { %6448 = vmatmul.mubr.msk.bf16.vlgmr.msra.gmra.mrb[60].mxu0 %vm1364_vm1, %v4058_v48  ;;  %3988 = vmatprep.subr.bf16.mxu1 %v7183_v43 }
 0x3c2   : > { %4398 = vmatpush1.bf16.msra.mxu0 %v7178_v46  ;;  %4429 = vmatprep.mubr.bf16.mxu0 %v7461_v5  ;;  %v1436_v39 = vadd.f32 %v1434_v21, %v1296_v57  ;;  %v7215_v46 = vld [vmem:[%s9316_s5 + $0x748] ss:$8 sps:$4 sm:$0xff]   ;;  %v1710_v47 = vrot.slane %v1703_v34, %v8688_v0 }
 0x3c3   : > { %4399 = vmatprep.subr.bf16.mxu0 %v7186_v49  ;;  %v7218_v49 = vld [vmem:[%s9316_s5 + $0x850] ss:$8 sps:$4 sm:$0xff]  }
 0x3c4   : > { %3989 = vmatpush1.bf16.msra.mxu1 %v7181_v53  ;;  %v7226_v53 = vld [vmem:[%s9316_s5 + $0x864] ss:$8 sps:$4 sm:$0xff]  }
 0x3c5   : > { %3990 = vmatprep.subr.bf16.mxu1 %v7189_v54  ;;  %v7221_v54 = vld [vmem:[%s9316_s5 + $0x758] ss:$8 sps:$4 sm:$0xff]  }
 0x3c6   : > { %4400 = vmatpush1.bf16.msra.mxu0 %v7184_v55 }
 0x3c7   : > { %4401 = vmatprep.subr.bf16.mxu0 %v7192_v56  ;;  %v7229_v56 = vld [vmem:[%s9316_s5 + $0x76c] ss:$8 sps:$4 sm:$0xff]  }
 0x3c8   : > { %3991 = vmatpush1.bf16.msra.mxu1 %v7187_v59  ;;  %v7227_v59 = vld [vmem:[%s9316_s5 + $0x768] ss:$8 sps:$4 sm:$0xff]  }
 0x3c9   : > { %3992 = vmatprep.subr.bf16.mxu1 %v7195_v17  ;;  %v6531_v17 = vld [vmem:[%s9316_s5 + $0x890] sm:$0x11] }
 0x3ca   : > { %4402 = vmatpush1.bf16.msra.mxu0 %v7190_v60  ;;  %v7235_v60 = vld [vmem:[%s9316_s5 + $0x77c] ss:$8 sps:$4 sm:$0xff]   ;;  %v6542_v2 = vcombine.low %v6531_v17, %v6531_v17 }
 0x3cb   : > { %4403 = vmatprep.subr.bf16.mxu0 %v7198_v41  ;;  %v7230_v41 = vld [vmem:[%s9316_s5 + $0x870] ss:$8 sps:$4 sm:$0xff]  }
 0x3cc   : > { %3993 = vmatpush1.bf16.msra.mxu1 %v7193_v28  ;;  %v6543_v28 = vcombine.high %v6531_v17, %v6531_v17 }
 0x3cd   : > { %3994 = vmatprep.subr.bf16.mxu1 %v7201_v62  ;;  %v6470_v62 = vcombine.low %v6459_v58, %v6459_v58 }
 0x3ce   : > { %4404 = vmatpush1.bf16.msra.mxu0 %v7196_v20  ;;  %v1221_v20 = vpop.permute.xlu1 %1220  ;;  %v4669_v6 = vand.u32 %v6543_v28, %v7891_v9  ;;  %v7279_v28 = vld [vmem:[%s9316_s5 + $0x89c] ss:$8 sps:$4 sm:$0xff]  }
 0x3cf   : > { %4405 = vmatprep.subr.bf16.mxu0 %v7204_v1  ;;  %v7236_v1 = vld [vmem:[%s9316_s5 + $0x880] ss:$8 sps:$4 sm:$0xff]  }
 0x3d0   : > { %3995 = vmatpush1.bf16.msra.mxu1 %v7199_v3  ;;  %v1289_v3 = vadd.f32 %v7931_v42, %v1221_v20  ;;  %v7248_v42 = vld [vmem:[%s9316_s5 + $0x8f4] ss:$8 sps:$4 sm:$0xff]   ;;  %v7282_v20 = vld [vmem:[%s9316_s5 + $0x9a4] ss:$8 sps:$4 sm:$0xff]  }
 0x3d1   : > { %3996 = vmatprep.subr.bf16.mxu1 %v3984_v7  ;;  %v4255_v7 = vand.u32 %v6470_v62, %v7891_v9 }
 0x3d2   : > { %v1549_v13 = vpop.f32.mrb[20].mxu1  ;;  %4406 = vmatpush1.bf16.msra.mxu0 %v7202_v8  ;;  %v7245_v8 = vld [vmem:[%s9316_s5 + $0x7ec] ss:$8 sps:$4 sm:$0xff]   ;;  %v1295_v11 = vmax.f32 %v1289_v3, 0.0 }
 0x3d3   : > { %v1551_v15 = vpop.f32.mrb[21].mxu1  ;;  %4407 = vmatprep.subr.bf16.mxu0 %v4395_v10  ;;  %v4666_v10 = vand.u32 %v6542_v2, %v7891_v9 }
 0x3d4   : > { %v1558_v22 = vcombine.low %v1549_v13, %v1551_v15  ;;  %v1553_v23 = vpop.f32.mrb[22].mxu1  ;;  %v8711_v24 = vpop.f32.mrb[28].mxu0  ;;  %3997 = vmatpush1.bf16.msra.mxu1 %v3981_v31  ;;  %v7243_v15 = vld [vmem:[%s9316_s5 + $0x7e8] ss:$8 sps:$4 sm:$0xff]   ;;  %v8827_v34 = vpack.c.bf16 %v1295_v11, %v1295_v11 }
 0x3d5   : > { %v1554_v30 = vpop.f32.mrb[23].mxu1  ;;  %v8720_v32 = vpop.f32.mrb[29].mxu0  ;;  %4260 = vmatprep.subr.bf16.mxu1 %v7211_v12  ;;  %v7251_v23 = vld [vmem:[%s9316_s5 + $0x7fc] ss:$8 sps:$4 sm:$0xff]  }
 0x3d6   : > { %v1565_v50 = vrot.slane %v1558_v22, %v8688_v0  ;;  %v1970_v35 = vcombine.low %v8711_v24, %v8720_v32  ;;  %v1965_v37 = vpop.f32.mrb[30].mxu0  ;;  %4408 = vmatpush1.bf16.msra.mxu0 %v4392_v14  ;;  %v4195_v22 = vrot.slane %v8624_v40, 2  ;;  %v7254_v24 = vld [vmem:[%s9316_s5 + $0x904] ss:$8 sps:$4 sm:$0xff]  }
 0x3d7   : > { %v1966_v43 = vpop.f32.mrb[31].mxu0  ;;  %6424 = vmatmul.mubr.msk.bf16.vlgmr.msra.gmra.mrb[56].mxu1 %vm1364_vm1, %v3921_v29  ;;  %4671 = vmatprep.subr.bf16.mxu0 %v7214_v19  ;;  %v7257_v37 = vld [vmem:[%s9316_s5 + $0x80c] ss:$8 sps:$4 sm:$0xff]  }
 0x3d8   : > { %v1572_v44 = vrot.slane %v1565_v50, %v8688_v0  ;;  %4261 = vmatpush1.bf16.msra.mxu1 %v7209_v36  ;;  %4292 = vmatprep.mubr.bf16.mxu1 %v7461_v5  ;;  %v1977_v29 = vrot.slane %v1970_v35, %v8688_v0  ;;  %v7249_v35 = vld [vmem:[%s9316_s5 + $0x7f8] ss:$8 sps:$4 sm:$0xff]  }
 0x3d9   : > { %6496 = vmatmul.mubr.msk.bf16.vlgmr.msra.gmra.mrb[64].mxu0 %vm1364_vm1, %v4332_v45  ;;  %4262 = vmatprep.subr.bf16.mxu1 %v7217_v51  ;;  %v7246_v51 = vld [vmem:[%s9316_s5 + $0x8f0] ss:$8 sps:$4 sm:$0xff]   ;;  %v7252_v45 = vld [vmem:[%s9316_s5 + $0x900] ss:$8 sps:$4 sm:$0xff]  }
 0x3da   : > { %v1574_v48 = vadd.f32 %v1572_v44, %v1436_v39  ;;  %4672 = vmatpush1.bf16.msra.mxu0 %v7212_v38  ;;  %4703 = vmatprep.mubr.bf16.mxu0 %v7461_v5  ;;  %v1984_v38 = vrot.slane %v1977_v29, %v8688_v0  ;;  %v7255_v39 = vld [vmem:[%s9316_s5 + $0x808] ss:$8 sps:$4 sm:$0xff]  }
 0x3db   : > { %4673 = vmatprep.subr.bf16.mxu0 %v7220_v52  ;;  %v7260_v52 = vld [vmem:[%s9316_s5 + $0x914] ss:$8 sps:$4 sm:$0xff]  }
 0x3dc   : > { %4263 = vmatpush1.bf16.msra.mxu1 %v7215_v46  ;;  %v8760_v55 = vadd.f32 %v1710_v47, %v1574_v48  ;;  %v7263_v46 = vld [vmem:[%s9316_s5 + $0x81c] ss:$8 sps:$4 sm:$0xff]  }
 0x3dd   : > { %4264 = vmatprep.subr.bf16.mxu1 %v7223_v33  ;;  %v7258_v33 = vld [vmem:[%s9316_s5 + $0x910] ss:$8 sps:$4 sm:$0xff]   ;;  %v7266_v48 = vld [vmem:[%s9316_s5 + $0x924] ss:$8 sps:$4 sm:$0xff]  }
 0x3de   : > { %4674 = vmatpush1.bf16.msra.mxu0 %v7218_v49  ;;  %v6507_v47 = vld [vmem:[%s9316_s5 + $0x838] sm:$0x11] }
 0x3df   : > { %4675 = vmatprep.subr.bf16.mxu0 %v7226_v53  ;;  %v7261_v49 = vld [vmem:[%s9316_s5 + $0x818] ss:$8 sps:$4 sm:$0xff]  }
 0x3e0   : > { %4265 = vmatpush1.bf16.msra.mxu1 %v7221_v54  ;;  %v6579_v53 = vld [vmem:[%s9316_s5 + $0x940] sm:$0x11]  ;;  %v7269_v54 = vld [vmem:[%s9316_s5 + $0x82c] ss:$8 sps:$4 sm:$0xff]  }
 0x3e1   : > { %4266 = vmatprep.subr.bf16.mxu1 %v7229_v56  ;;  %v7264_v56 = vld [vmem:[%s9316_s5 + $0x920] ss:$8 sps:$4 sm:$0xff]   ;;  %v6591_v58 = vcombine.high %v6579_v53, %v6579_v53  ;;  %v6590_v25 = vcombine.low %v6579_v53, %v6579_v53 }
 0x3e2   : > { %4676 = vmatpush1.bf16.msra.mxu0 %v7224_v16  ;;  %v7272_v16 = vld [vmem:[%s9316_s5 + $0x934] ss:$8 sps:$4 sm:$0xff]  }
 0x3e3   : > { %4677 = vmatprep.subr.bf16.mxu0 %v7232_v4  ;;  %v7267_v4 = vld [vmem:[%s9316_s5 + $0x828] ss:$8 sps:$4 sm:$0xff]   ;;  %v4942_v62 = vand.u32 %v6590_v25, %v7891_v9 }
 0x3e4   : > { %4267 = vmatpush1.bf16.msra.mxu1 %v7227_v59  ;;  %v6518_v59 = vcombine.low %v6507_v47, %v6507_v47  ;;  %v7311_v25 = vld [vmem:[%s9316_s5 + $0x948] ss:$8 sps:$4 sm:$0xff]  }
 0x3e5   : > { %4268 = vmatprep.subr.bf16.mxu1 %v7235_v60  ;;  %v7270_v60 = vld [vmem:[%s9316_s5 + $0x930] ss:$8 sps:$4 sm:$0xff]  }
 0x3e6   : > { %4678 = vmatpush1.bf16.msra.mxu0 %v7230_v41  ;;  %v4945_v41 = vand.u32 %v6591_v58, %v7891_v9 }
 0x3e7   : > { %4679 = vmatprep.subr.bf16.mxu0 %v7238_v26  ;;  %v4529_v26 = vand.u32 %v6518_v59, %v7891_v9 }
 0x3e8   : > { %4269 = vmatpush1.bf16.msra.mxu1 %v7233_v61 }
 0x3e9   : > { %4270 = vmatprep.subr.bf16.mxu1 %v4258_v63 }
 0x3ea   : > { %v1824_v27 = vpop.f32.mrb[24].mxu1  ;;  %4680 = vmatpush1.bf16.msra.mxu0 %v7236_v1 }
 0x3eb   : > { %v1826_v31 = vpop.f32.mrb[25].mxu1  ;;  %4681 = vmatprep.subr.bf16.mxu0 %v4669_v6  ;;  %v7277_v6 = vld [vmem:[%s9316_s5 + $0x898] ss:$8 sps:$4 sm:$0xff]  }
 0x3ec   : > { %v1833_v12 = vcombine.low %v1824_v27, %v1826_v31  ;;  %v1828_v13 = vpop.f32.mrb[26].mxu1  ;;  %v8806_v14 = vpop.f32.mrb[32].mxu0  ;;  %4271 = vmatpush1.bf16.msra.mxu1 %v4255_v7  ;;  %v4469_v27 = vrot.slane %v8624_v40, 3  ;;  %v7280_v40 = vld [vmem:[%s9316_s5 + $0x9a0] ss:$8 sps:$4 sm:$0xff]  }
 0x3ed   : > { %v1829_v19 = vpop.f32.mrb[27].mxu1  ;;  %v8811_v21 = vpop.f32.mrb[33].mxu0  ;;  %4534 = vmatprep.subr.bf16.mxu1 %v7245_v8 }
 0x3ee   : > { %v1840_v36 = vrot.slane %v1833_v12, %v8688_v0  ;;  %v2244_v57 = vcombine.low %v8806_v14, %v8811_v21  ;;  %v2239_v30 = vpop.f32.mrb[34].mxu0  ;;  %4682 = vmatpush1.bf16.msra.mxu0 %v4666_v10  ;;  %v7285_v10 = vld [vmem:[%s9316_s5 + $0x8ac] ss:$8 sps:$4 sm:$0xff]   ;;  %v7283_v21 = vld [vmem:[%s9316_s5 + $0x8a8] ss:$8 sps:$4 sm:$0xff]  }
 0x3ef   : > { %v2240_v50 = vpop.f32.mrb[35].mxu0  ;;  %6472 = vmatmul.mubr.msk.bf16.vlgmr.msra.gmra.mrb[60].mxu1 %vm1364_vm1, %v4195_v22  ;;  %4947 = vmatprep.subr.bf16.mxu0 %v7248_v42  ;;  %v7288_v14 = vld [vmem:[%s9316_s5 + $0x9b4] ss:$8 sps:$4 sm:$0xff]   ;;  %v7289_v30 = vld [vmem:[%s9316_s5 + $0x8b8] ss:$8 sps:$4 sm:$0xff]  }
 0x3f0   : > { %v1847_v32 = vrot.slane %v1840_v36, %v8688_v0  ;;  %4535 = vmatpush1.bf16.msra.mxu1 %v7243_v15  ;;  %4566 = vmatprep.mubr.bf16.mxu1 %v7461_v5  ;;  %v2251_v11 = vrot.slane %v2244_v57, %v8688_v0  ;;  %v4882_v15 = vrot.slane %v8827_v34, 1  ;;  %v7291_v22 = vld [vmem:[%s9316_s5 + $0x8bc] ss:$8 sps:$4 sm:$0xff]   ;;  %v7286_v36 = vld [vmem:[%s9316_s5 + $0x9b0] ss:$8 sps:$4 sm:$0xff]  }
 0x3f1   : > { %6544 = vmatmul.mubr.msk.bf16.vlgmr.msra.gmra.mrb[68].mxu0 %vm1364_vm1, %v8827_v34  ;;  %4536 = vmatprep.subr.bf16.mxu1 %v7251_v23  ;;  %v7294_v57 = vld [vmem:[%s9316_s5 + $0x9c4] ss:$8 sps:$4 sm:$0xff]  }
 0x3f2   : > { %v1849_v43 = vadd.f32 %v1847_v32, %v8760_v55  ;;  %4948 = vmatpush1.bf16.msra.mxu0 %v7246_v51  ;;  %4979 = vmatprep.mubr.bf16.mxu0 %v7461_v5  ;;  %v6519_v55 = vcombine.high %v6507_v47, %v6507_v47  ;;  %v2258_v23 = vrot.slane %v2251_v11, %v8688_v0  ;;  %v7297_v50 = vld [vmem:[%s9316_s5 + $0x8cc] ss:$8 sps:$4 sm:$0xff]  }
 0x3f3   : > { %4949 = vmatprep.subr.bf16.mxu0 %v7254_v24  ;;  %v7292_v24 = vld [vmem:[%s9316_s5 + $0x9c0] ss:$8 sps:$4 sm:$0xff]  }
 0x3f4   : > { %4537 = vmatpush1.bf16.msra.mxu1 %v7249_v35  ;;  %v8855_v44 = vadd.f32 %v1984_v38, %v1849_v43  ;;  %v4532_v17 = vand.u32 %v6519_v55, %v7891_v9  ;;  %v6555_v32 = vld [vmem:[%s9316_s5 + $0x8e8] sm:$0x11]  ;;  %v7300_v35 = vld [vmem:[%s9316_s5 + $0x9d4] ss:$8 sps:$4 sm:$0xff]  }
 0x3f5   : > { %4538 = vmatprep.subr.bf16.mxu1 %v7257_v37  ;;  %v7295_v37 = vld [vmem:[%s9316_s5 + $0x8c8] ss:$8 sps:$4 sm:$0xff]   ;;  %v7303_v43 = vld [vmem:[%s9316_s5 + $0x8dc] ss:$8 sps:$4 sm:$0xff]   ;;  %v7313_v55 = vld [vmem:[%s9316_s5 + $0x94c] ss:$8 sps:$4 sm:$0xff]  }
 0x3f6   : > { %4950 = vmatpush1.bf16.msra.mxu0 %v7252_v45  ;;  %v6627_v38 = vld [vmem:[%s9316_s5 + $0x9f0] sm:$0x11]  ;;  %v6567_v45 = vcombine.high %v6555_v32, %v6555_v32 }
 0x3f7   : > { %4951 = vmatprep.subr.bf16.mxu0 %v7260_v52  ;;  %v7298_v52 = vld [vmem:[%s9316_s5 + $0x9d0] ss:$8 sps:$4 sm:$0xff]  }
 0x3f8   : > { %4539 = vmatpush1.bf16.msra.mxu1 %v7255_v39  ;;  %v7306_v39 = vld [vmem:[%s9316_s5 + $0x9e4] ss:$8 sps:$4 sm:$0xff]   ;;  %v4807_v47 = vand.u32 %v6567_v45, %v7891_v9 }
 0x3f9   : > { %4540 = vmatprep.subr.bf16.mxu1 %v7263_v46  ;;  %v7301_v46 = vld [vmem:[%s9316_s5 + $0x8d8] ss:$8 sps:$4 sm:$0xff]   ;;  %v7347_v45 = vld [vmem:[%s9316_s5 + $0x9fc] ss:$8 sps:$4 sm:$0xff]  }
 0x3fa   : > { %4952 = vmatpush1.bf16.msra.mxu0 %v7258_v33  ;;  %v6566_v33 = vcombine.low %v6555_v32, %v6555_v32 }
 0x3fb   : > { %4953 = vmatprep.subr.bf16.mxu0 %v7266_v48  ;;  %v7304_v48 = vld [vmem:[%s9316_s5 + $0x9e0] ss:$8 sps:$4 sm:$0xff]  }
 0x3fc   : > { %4541 = vmatpush1.bf16.msra.mxu1 %v7261_v49  ;;  %v6638_v49 = vcombine.low %v6627_v38, %v6627_v38 }
 0x3fd   : > { %4542 = vmatprep.subr.bf16.mxu1 %v7269_v54  ;;  %v4804_v54 = vand.u32 %v6566_v33, %v7891_v9 }
 0x3fe   : > { %4954 = vmatpush1.bf16.msra.mxu0 %v7264_v56 }
 0x3ff   : > { %4955 = vmatprep.subr.bf16.mxu0 %v7272_v16  ;;  %v5216_v16 = vand.u32 %v6638_v49, %v7891_v9 }
 0x400   : > { %4543 = vmatpush1.bf16.msra.mxu1 %v7267_v4  ;;  %v7316_v4 = vld [vmem:[%s9316_s5 + $0xa54] ss:$8 sps:$4 sm:$0xff]  }
 0x401   : > { %4544 = vmatprep.subr.bf16.mxu1 %v4532_v17 }
 0x402   : > { %v2098_v61 = vpop.f32.mrb[28].mxu1  ;;  %4956 = vmatpush1.bf16.msra.mxu0 %v7270_v60 }
 0x403   : > { %v2100_v63 = vpop.f32.mrb[29].mxu1  ;;  %4957 = vmatprep.subr.bf16.mxu0 %v4945_v41 }
 0x404   : > { %v2107_v1 = vcombine.low %v2098_v61, %v2100_v63  ;;  %v2102_v2 = vpop.f32.mrb[30].mxu1  ;;  %v8900_v3 = vpop.f32.mrb[36].mxu0  ;;  %4545 = vmatpush1.bf16.msra.mxu1 %v4529_v26  ;;  %v7319_v61 = vld [vmem:[%s9316_s5 + $0x95c] ss:$8 sps:$4 sm:$0xff]  }
 0x405   : > { %v2103_v7 = vpop.f32.mrb[31].mxu1  ;;  %v8905_v8 = vpop.f32.mrb[37].mxu0  ;;  %4809 = vmatprep.subr.bf16.mxu1 %v7279_v28  ;;  %v9000_v28 = vshrl.u32 %v8827_v34, 16  ;;  %v7314_v2 = vld [vmem:[%s9316_s5 + $0xa50] ss:$8 sps:$4 sm:$0xff]  }
 0x406   : > { %v2114_v31 = vrot.slane %v2107_v1, %v8688_v0  ;;  %v2518_v42 = vcombine.low %v8900_v3, %v8905_v8  ;;  %v2513_v12 = vpop.f32.mrb[38].mxu0  ;;  %4958 = vmatpush1.bf16.msra.mxu0 %v4942_v62  ;;  %v5156_v7 = vrot.slane %v8827_v34, 2  ;;  %v7322_v3 = vld [vmem:[%s9316_s5 + $0xa64] ss:$8 sps:$4 sm:$0xff]  }
 0x407   : > { %v2514_v13 = vpop.f32.mrb[39].mxu0  ;;  %6520 = vmatmul.mubr.msk.bf16.vlgmr.msra.gmra.mrb[64].mxu1 %vm1364_vm1, %v4469_v27  ;;  %5221 = vmatprep.subr.bf16.mxu0 %v7282_v20  ;;  %v7317_v27 = vld [vmem:[%s9316_s5 + $0x958] ss:$8 sps:$4 sm:$0xff]   ;;  %v7328_v12 = vld [vmem:[%s9316_s5 + $0xa74] ss:$8 sps:$4 sm:$0xff]  }
 0x408   : > { %v2121_v19 = vrot.slane %v2114_v31, %v8688_v0  ;;  %4810 = vmatpush1.bf16.msra.mxu1 %v7277_v6  ;;  %4841 = vmatprep.mubr.bf16.mxu1 %v7461_v5  ;;  %v2525_v62 = vrot.slane %v2518_v42, %v8688_v0  ;;  %v7320_v42 = vld [vmem:[%s9316_s5 + $0xa60] ss:$8 sps:$4 sm:$0xff]  }
 0x409   : > { %6592 = vmatmul.mubr.msk.bf16.vlgmr.msra.gmra.mrb[72].mxu0 %vm1364_vm1, %v4882_v15  ;;  %4811 = vmatprep.subr.bf16.mxu1 %v7285_v10  ;;  %v7325_v10 = vld [vmem:[%s9316_s5 + $0x96c] ss:$8 sps:$4 sm:$0xff]   ;;  %v7331_v15 = vld [vmem:[%s9316_s5 + $0x97c] ss:$8 sps:$4 sm:$0xff]  }
 0x40a   : > { %v2123_v29 = vadd.f32 %v2121_v19, %v8855_v44  ;;  %5222 = vmatpush1.bf16.msra.mxu0 %v7280_v40  ;;  %5253 = vmatprep.mubr.bf16.mxu0 %v7461_v5  ;;  %v6639_v44 = vcombine.high %v6627_v38, %v6627_v38  ;;  %v2532_v11 = vrot.slane %v2525_v62, %v8688_v0  ;;  %v7323_v40 = vld [vmem:[%s9316_s5 + $0x968] ss:$8 sps:$4 sm:$0xff]   ;;  %v6603_v19 = vld [vmem:[%s9316_s5 + $0x998] sm:$0x11] }
 0x40b   : > { %5223 = vmatprep.subr.bf16.mxu0 %v7288_v14  ;;  %v7326_v14 = vld [vmem:[%s9316_s5 + $0xa70] ss:$8 sps:$4 sm:$0xff]  }
 0x40c   : > { %4812 = vmatpush1.bf16.msra.mxu1 %v7283_v21  ;;  %v8947_v51 = vadd.f32 %v2258_v23, %v2123_v29  ;;  %v5219_v53 = vand.u32 %v6639_v44, %v7891_v9  ;;  %v7334_v21 = vld [vmem:[%s9316_s5 + $0xa84] ss:$8 sps:$4 sm:$0xff]  }
 0x40d   : > { %4813 = vmatprep.subr.bf16.mxu1 %v7291_v22  ;;  %v7329_v22 = vld [vmem:[%s9316_s5 + $0x978] ss:$8 sps:$4 sm:$0xff]   ;;  %v7337_v29 = vld [vmem:[%s9316_s5 + $0x98c] ss:$8 sps:$4 sm:$0xff]  }
 0x40e   : > { %5224 = vmatpush1.bf16.msra.mxu0 %v7286_v36  ;;  %v6675_v23 = vld [vmem:[%s9316_s5 + $0xaa0] sm:$0x11]  ;;  %v6615_v36 = vcombine.high %v6603_v19, %v6603_v19 }
 0x40f   : > { %5225 = vmatprep.subr.bf16.mxu0 %v7294_v57  ;;  %v7332_v57 = vld [vmem:[%s9316_s5 + $0xa80] ss:$8 sps:$4 sm:$0xff]  }
 0x410   : > { %4814 = vmatpush1.bf16.msra.mxu1 %v7289_v30  ;;  %v7340_v30 = vld [vmem:[%s9316_s5 + $0xa94] ss:$8 sps:$4 sm:$0xff]   ;;  %v5082_v32 = vand.u32 %v6615_v36, %v7891_v9 }
 0x411   : > { %4815 = vmatprep.subr.bf16.mxu1 %v7297_v50  ;;  %v7335_v50 = vld [vmem:[%s9316_s5 + $0x988] ss:$8 sps:$4 sm:$0xff]  }
 0x412   : > { %5226 = vmatpush1.bf16.msra.mxu0 %v7292_v24  ;;  %v6614_v24 = vcombine.low %v6603_v19, %v6603_v19  ;;  %v5293_v19 = vrot.slane %v9000_v28, 2 }
 0x413   : > { %5227 = vmatprep.subr.bf16.mxu0 %v7300_v35  ;;  %v7338_v35 = vld [vmem:[%s9316_s5 + $0xa90] ss:$8 sps:$4 sm:$0xff]  }
 0x414   : > { %4816 = vmatpush1.bf16.msra.mxu1 %v7295_v37  ;;  %v6686_v37 = vcombine.low %v6675_v23, %v6675_v23 }
 0x415   : > { %4817 = vmatprep.subr.bf16.mxu1 %v7303_v43  ;;  %v5079_v43 = vand.u32 %v6614_v24, %v7891_v9 }
 0x416   : > { %5228 = vmatpush1.bf16.msra.mxu0 %v7298_v52 }
 0x417   : > { %5229 = vmatprep.subr.bf16.mxu0 %v7306_v39  ;;  %v5490_v39 = vand.u32 %v6686_v37, %v7891_v9 }
 0x418   : > { %4818 = vmatpush1.bf16.msra.mxu1 %v7301_v46 }
 0x419   : > { %4819 = vmatprep.subr.bf16.mxu1 %v4807_v47 }
 0x41a   : > { %v2372_v56 = vpop.f32.mrb[32].mxu1  ;;  %5230 = vmatpush1.bf16.msra.mxu0 %v7304_v48  ;;  %v7345_v48 = vld [vmem:[%s9316_s5 + $0x9f8] ss:$8 sps:$4 sm:$0xff]  }
 0x41b   : > { %v2374_v58 = vpop.f32.mrb[33].mxu1  ;;  %5231 = vmatprep.subr.bf16.mxu0 %v5219_v53 }
 0x41c   : > { %v2381_v59 = vcombine.low %v2372_v56, %v2374_v58  ;;  %v2376_v17 = vpop.f32.mrb[34].mxu1  ;;  %v8992_v60 = vpop.f32.mrb[40].mxu0  ;;  %4820 = vmatpush1.bf16.msra.mxu1 %v4804_v54  ;;  %v5019_v54 = vrot.slane %v9000_v28, 1 }
 0x41d   : > { %v2377_v41 = vpop.f32.mrb[35].mxu1  ;;  %v8997_v26 = vpop.f32.mrb[41].mxu0  ;;  %5084 = vmatprep.subr.bf16.mxu1 %v7313_v55  ;;  %v7350_v55 = vld [vmem:[%s9316_s5 + $0xa0c] ss:$8 sps:$4 sm:$0xff]   ;;  %v5430_v17 = vrot.slane %v8827_v34, 3 }
 0x41e   : > { %v2388_v63 = vrot.slane %v2381_v59, %v8688_v0  ;;  %v2794_v20 = vcombine.low %v8992_v60, %v8997_v26  ;;  %v2789_v1 = vpop.f32.mrb[42].mxu0  ;;  %5232 = vmatpush1.bf16.msra.mxu0 %v5216_v16  ;;  %v7348_v41 = vld [vmem:[%s9316_s5 + $0xa08] ss:$8 sps:$4 sm:$0xff]   ;;  %v7353_v60 = vld [vmem:[%s9316_s5 + $0xa1c] ss:$8 sps:$4 sm:$0xff]  }
 0x41f   : > { %v2790_v6 = vpop.f32.mrb[43].mxu0  ;;  %6568 = vmatmul.mubr.msk.bf16.vlgmr.msra.gmra.mrb[68].mxu1 %vm1364_vm1, %v9000_v28  ;;  %5495 = vmatprep.subr.bf16.mxu0 %v7316_v4  ;;  %v7354_v1 = vld [vmem:[%s9316_s5 + $0xa28] ss:$8 sps:$4 sm:$0xff]  }
 0x420   : > { %v2395_v8 = vrot.slane %v2388_v63, %v8688_v0  ;;  %5085 = vmatpush1.bf16.msra.mxu1 %v7311_v25  ;;  %5116 = vmatprep.mubr.bf16.mxu1 %v7461_v5  ;;  %v2801_v56 = vrot.slane %v2794_v20, %v8688_v0  ;;  %v7356_v63 = vld [vmem:[%s9316_s5 + $0xa2c] ss:$8 sps:$4 sm:$0xff]  }
 0x421   : > { %6640 = vmatmul.mubr.msk.bf16.vlgmr.msra.gmra.mrb[76].mxu0 %vm1364_vm1, %v5156_v7  ;;  %5086 = vmatprep.subr.bf16.mxu1 %v7319_v61  ;;  %v7351_v61 = vld [vmem:[%s9316_s5 + $0xa18] ss:$8 sps:$4 sm:$0xff]   ;;  %v6651_v20 = vld [vmem:[%s9316_s5 + $0xa48] sm:$0x11] }
 0x422   : > { %v2397_v31 = vadd.f32 %v2395_v8, %v8947_v51  ;;  %5496 = vmatpush1.bf16.msra.mxu0 %v7314_v2  ;;  %5527 = vmatprep.mubr.bf16.mxu0 %v7461_v5  ;;  %v6687_v51 = vcombine.high %v6675_v23, %v6675_v23  ;;  %v2808_v26 = vrot.slane %v2801_v56, %v8688_v0  ;;  %v7359_v2 = vld [vmem:[%s9316_s5 + $0xa3c] ss:$8 sps:$4 sm:$0xff]   ;;  %v7357_v7 = vld [vmem:[%s9316_s5 + $0xa38] ss:$8 sps:$4 sm:$0xff]  }
 0x423   : > { %5497 = vmatprep.subr.bf16.mxu0 %v7322_v3  ;;  %v6663_v6 = vcombine.high %v6651_v20, %v6651_v20  ;;  %v6662_v3 = vcombine.low %v6651_v20, %v6651_v20 }
 0x424   : > { %5087 = vmatpush1.bf16.msra.mxu1 %v7317_v27  ;;  %v9042_v13 = vadd.f32 %v2532_v11, %v2397_v31  ;;  %v5493_v38 = vand.u32 %v6687_v51, %v7891_v9  ;;  %v7365_v51 = vld [vmem:[%s9316_s5 + $0xab8] ss:$8 sps:$4 sm:$0xff]  }
 0x425   : > { %5088 = vmatprep.subr.bf16.mxu1 %v7325_v10  ;;  %v5356_v8 = vand.u32 %v6663_v6, %v7891_v9  ;;  %v5353_v27 = vand.u32 %v6662_v3, %v7891_v9  ;;  %v7364_v10 = vld [vmem:[%s9316_s5 + $0xaac] ss:$8 sps:$4 sm:$0xff]  }
 0x426   : > { %5498 = vmatpush1.bf16.msra.mxu0 %v7320_v42 }
 0x427   : > { %5499 = vmatprep.subr.bf16.mxu0 %v7328_v12 }
 0x428   : > { %5089 = vmatpush1.bf16.msra.mxu1 %v7323_v40 }
 0x429   : > { %5090 = vmatprep.subr.bf16.mxu1 %v7331_v15 }
 0x42a   : > { %5500 = vmatpush1.bf16.msra.mxu0 %v7326_v14 }
 0x42b   : > { %5501 = vmatprep.subr.bf16.mxu0 %v7334_v21  ;;  %v7367_v21 = vld [vmem:[%s9316_s5 + $0xabc] ss:$8 sps:$4 sm:$0xff]  }
 0x42c   : > { %5091 = vmatpush1.bf16.msra.mxu1 %v7329_v22 }
 0x42d   : > { %5092 = vmatprep.subr.bf16.mxu1 %v7337_v29 }
 0x42e   : > { %5502 = vmatpush1.bf16.msra.mxu0 %v7332_v57 }
 0x42f   : > { %5503 = vmatprep.subr.bf16.mxu0 %v7340_v30 }
 0x430   : > { %5093 = vmatpush1.bf16.msra.mxu1 %v7335_v50  ;;  %v7370_v50 = vld [vmem:[%s9316_s5 + $0xacc] ss:$8 sps:$4 sm:$0xff]  }
 0x431   : > { %5094 = vmatprep.subr.bf16.mxu1 %v5082_v32 }
 0x432   : > { %v2647_v52 = vpop.f32.mrb[36].mxu1  ;;  %5504 = vmatpush1.bf16.msra.mxu0 %v7338_v35  ;;  %v7368_v35 = vld [vmem:[%s9316_s5 + $0xac8] ss:$8 sps:$4 sm:$0xff]  }
 0x433   : > { %v2649_v44 = vpop.f32.mrb[37].mxu1  ;;  %5505 = vmatprep.subr.bf16.mxu0 %v5493_v38  ;;  %v7373_v38 = vld [vmem:[%s9316_s5 + $0xadc] ss:$8 sps:$4 sm:$0xff]  }
 0x434   : > { %v2656_v46 = vcombine.low %v2647_v52, %v2649_v44  ;;  %v2651_v33 = vpop.f32.mrb[38].mxu1  ;;  %v3059_v47 = vpop.f32.mrb[44].mxu0  ;;  %5095 = vmatpush1.bf16.msra.mxu1 %v5079_v43  ;;  %v7371_v43 = vld [vmem:[%s9316_s5 + $0xad8] ss:$8 sps:$4 sm:$0xff]  }
 0x435   : > { %v2652_v49 = vpop.f32.mrb[39].mxu1  ;;  %v3061_v53 = vpop.f32.mrb[45].mxu0  ;;  %5358 = vmatprep.subr.bf16.mxu1 %v7347_v45  ;;  %v7376_v45 = vld [vmem:[%s9316_s5 + $0xaec] ss:$8 sps:$4 sm:$0xff]  }
 0x436   : > { %v2663_v16 = vrot.slane %v2656_v46, %v8688_v0  ;;  %v3068_v58 = vcombine.low %v3059_v47, %v3061_v53  ;;  %v3063_v4 = vpop.f32.mrb[46].mxu0  ;;  %5506 = vmatpush1.bf16.msra.mxu0 %v5490_v39  ;;  %v7374_v39 = vld [vmem:[%s9316_s5 + $0xae8] ss:$8 sps:$4 sm:$0xff]  }
 0x437   : > { %v3064_v59 = vpop.f32.mrb[47].mxu0  ;;  %6616 = vmatmul.mubr.msk.bf16.vlgmr.msra.gmra.mrb[72].mxu1 %vm1364_vm1, %v5019_v54 }
 0x438   : > { %v2670_v25 = vrot.slane %v2663_v16, %v8688_v0  ;;  %5359 = vmatpush1.bf16.msra.mxu1 %v7345_v48  ;;  %5390 = vmatprep.mubr.bf16.mxu1 %v7461_v5  ;;  %v3075_v22 = vrot.slane %v3068_v58, %v8688_v0  ;;  %v5567_v16 = vrot.slane %v9000_v28, 3 }
 0x439   : > { %6688 = vmatmul.mubr.msk.bf16.vlgmr.msra.gmra.mrb[80].mxu0 %vm1364_vm1, %v5430_v17  ;;  %5360 = vmatprep.subr.bf16.mxu1 %v7350_v55 }
 0x43a   : > { %v2672_v34 = vadd.f32 %v2670_v25, %v9042_v13  ;;  %v7362_v13 = vld [vmem:[%s9316_s5 + $0xaa8] ss:$8 sps:$4 sm:$0xff]   ;;  %v3082_v24 = vrot.slane %v3075_v22, %v8688_v0 }
 0x43c   : > { %5361 = vmatpush1.bf16.msra.mxu1 %v7348_v41  ;;  %v2810_v62 = vadd.f32 %v2808_v26, %v2672_v34 }
 0x43d   : > { %5362 = vmatprep.subr.bf16.mxu1 %v7353_v60 }
 0x440   : > { %5363 = vmatpush1.bf16.msra.mxu1 %v7351_v61 }
 0x441   : > { %5364 = vmatprep.subr.bf16.mxu1 %v7356_v63 }
 0x444   : > { %5365 = vmatpush1.bf16.msra.mxu1 %v7354_v1 }
 0x445   : > { %5366 = vmatprep.subr.bf16.mxu1 %v7359_v2 }
 0x448   : > { %5367 = vmatpush1.bf16.msra.mxu1 %v7357_v7 }
 0x449   : > { %5368 = vmatprep.subr.bf16.mxu1 %v5356_v8 }
 0x44a   : > { %v2922_v11 = vpop.f32.mrb[40].mxu1 }
 0x44b   : > { %v2924_v31 = vpop.f32.mrb[41].mxu1 }
 0x44c   : > { %v2931_v42 = vcombine.low %v2922_v11, %v2924_v31  ;;  %v2926_v12 = vpop.f32.mrb[42].mxu1  ;;  %v3333_v40 = vpop.f32.mrb[48].mxu0  ;;  %5369 = vmatpush1.bf16.msra.mxu1 %v5353_v27 }
 0x44d   : > { %v2927_v15 = vpop.f32.mrb[43].mxu1  ;;  %v3335_v14 = vpop.f32.mrb[49].mxu0  ;;  %5632 = vmatprep.subr.bf16.mxu1 %v7364_v10 }
 0x44e   : > { %v2938_v23 = vrot.slane %v2931_v42, %v8688_v0  ;;  %v3342_v29 = vcombine.low %v3333_v40, %v3335_v14  ;;  %v3337_v36 = vpop.f32.mrb[50].mxu0 }
 0x44f   : > { %v3338_v57 = vpop.f32.mrb[51].mxu0  ;;  %6664 = vmatmul.mubr.msk.bf16.vlgmr.msra.gmra.mrb[76].mxu1 %vm1364_vm1, %v5293_v19 }
 0x450   : > { %v2945_v30 = vrot.slane %v2938_v23, %v8688_v0  ;;  %5633 = vmatpush1.bf16.msra.mxu1 %v7362_v13  ;;  %5664 = vmatprep.mubr.bf16.mxu1 %v7461_v5  ;;  %v6699_v5 = vld [vmem:[%s9316_s5 + $0xaf8] sm:$0x11]  ;;  %v3349_v58 = vrot.slane %v3342_v29, %v8688_v0 }
 0x451   : > { %5634 = vmatprep.subr.bf16.mxu1 %v7367_v21  ;;  %v6711_v52 = vcombine.high %v6699_v5, %v6699_v5  ;;  %v6710_v44 = vcombine.low %v6699_v5, %v6699_v5 }
 0x452   : > { %v2947_v32 = vadd.f32 %v2945_v30, %v2810_v62  ;;  %v3356_v41 = vrot.slane %v3349_v58, %v8688_v0  ;;  %v7385_v58 = vld [vmem:[%s9318_s7 + $0x58] sm:$0xff]  }
 0x453   : > { %v5630_v46 = vand.u32 %v6711_v52, %v7891_v9  ;;  %v5627_v33 = vand.u32 %v6710_v44, %v7891_v9  ;;  %v7382_v44 = vld [vmem:[%s9318_s7 + $0x8] sm:$0xff]  }
 0x454   : > { %5635 = vmatpush1.bf16.msra.mxu1 %v7365_v51  ;;  %v3084_v37 = vadd.f32 %v3082_v24, %v2947_v32  ;;  %v7379_v32 = vld [vmem:[%s9318_s7 + $0x40] sm:$0xff]  }
 0x455   : > { %5636 = vmatprep.subr.bf16.mxu1 %v7370_v50  ;;  %6761 = vmatprep.subr.bf16.mxu0 %v7379_v32 }
 0x458   : > { %5637 = vmatpush1.bf16.msra.mxu1 %v7368_v35  ;;  %v7380_v35 = vld [vmem:[%s9318_s7] sm:$0xff]  }
 0x459   : > { %5638 = vmatprep.subr.bf16.mxu1 %v7373_v38  ;;  %6762 = vmatpush3.bf16.msra.mxu0 %v7380_v35 }
 0x45c   : > { %5639 = vmatpush1.bf16.msra.mxu1 %v7371_v43 }
 0x45d   : > { %5640 = vmatprep.subr.bf16.mxu1 %v7376_v45 }
 0x460   : > { %5641 = vmatpush1.bf16.msra.mxu1 %v7374_v39 }
 0x461   : > { %5642 = vmatprep.subr.bf16.mxu1 %v5630_v46 }
 0x462   : > { %v3196_v47 = vpop.f32.mrb[44].mxu1 }
 0x463   : > { %v3198_v48 = vpop.f32.mrb[45].mxu1 }
 0x464   : > { %v3205_v49 = vcombine.low %v3196_v47, %v3198_v48  ;;  %v3200_v53 = vpop.f32.mrb[46].mxu1  ;;  %v3607_v54 = vpop.f32.mrb[52].mxu0  ;;  %5643 = vmatpush1.bf16.msra.mxu1 %v5627_v33 }
 0x465   : > { %v3201_v55 = vpop.f32.mrb[47].mxu1  ;;  %v3609_v56 = vpop.f32.mrb[53].mxu0 }
 0x466   : > { %v3212_v4 = vrot.slane %v3205_v49, %v8688_v0  ;;  %v3616_v59 = vcombine.low %v3607_v54, %v3609_v56  ;;  %v3611_v17 = vpop.f32.mrb[54].mxu0  ;;  %v7383_v49 = vld [vmem:[%s9318_s7 + $0x50] sm:$0xff]  }
 0x467   : > { %v3612_v25 = vpop.f32.mrb[55].mxu0  ;;  %6712 = vmatmul.mubr.msk.bf16.vlgmr.msra.gmra.mrb[80].mxu1 %vm1364_vm1, %v5567_v16  ;;  %v7384_v55 = vld [vmem:[%s9318_s7 + $0x10] sm:$0xff]   ;;  %v7387_v17 = vld [vmem:[%s9318_s7 + $0x60] sm:$0xff]  }
 0x468   : > { %v3219_v9 = vrot.slane %v3212_v4, %v8688_v0  ;;  %v3623_v2 = vrot.slane %v3616_v59, %v8688_v0  ;;  %v7386_v59 = vld [vmem:[%s9318_s7 + $0x18] sm:$0xff]   ;;  %v7388_v25 = vld [vmem:[%s9318_s7 + $0x20] sm:$0xff]  }
 0x46a   : > { %v3221_v60 = vadd.f32 %v3219_v9, %v3084_v37  ;;  %v3630_v10 = vrot.slane %v3623_v2, %v8688_v0  ;;  %v7381_v37 = vld [vmem:[%s9318_s7 + $0x48] sm:$0xff]  }
 0x46b   : > { %6763 = vmatprep.subr.bf16.mxu0 %v7381_v37  ;;  %v7389_v9 = vld [vmem:[%s9318_s7 + $0x68] sm:$0xff]  }
 0x46c   : > { %v3358_v26 = vadd.f32 %v3356_v41, %v3221_v60  ;;  %6764 = vmatpush3.bf16.msra.mxu0 %v7382_v44  ;;  %v7390_v41 = vld [vmem:[%s9318_s7 + $0x28] sm:$0xff]  }
 0x46d   : > { %6765 = vmatprep.subr.bf16.mxu0 %v7383_v49 }
 0x470   : > { %6766 = vmatpush3.bf16.msra.mxu0 %v7384_v55 }
 0x471   : > { %6767 = vmatprep.subr.bf16.mxu0 %v7385_v58 }
 0x474   : > { %6768 = vmatpush3.bf16.msra.mxu0 %v7386_v59 }
 0x475   : > { %6769 = vmatprep.subr.bf16.mxu0 %v7387_v17 }
 0x478   : > { %6770 = vmatpush3.bf16.msra.mxu0 %v7388_v25 }
 0x479   : > { %6771 = vmatprep.subr.bf16.mxu0 %v7389_v9 }
 0x47a   : > { %v3470_v34 = vpop.f32.mrb[48].mxu1 }
 0x47b   : > { %v3472_v61 = vpop.f32.mrb[49].mxu1 }
 0x47c   : > { %v3479_v62 = vcombine.low %v3470_v34, %v3472_v61  ;;  %v3474_v63 = vpop.f32.mrb[50].mxu1  ;;  %v3883_v28 = vpop.f32.mrb[56].mxu0  ;;  %6772 = vmatpush3.bf16.msra.mxu0 %v7390_v41  ;;  %v7392_v34 = vld [vmem:[%s9318_s7 + $0x30] sm:$0xff]   ;;  %v7393_v61 = vld [vmem:[%s9318_s7 + $0x78] sm:$0xff]  }
 0x47d   : > { %v3475_v20 = vpop.f32.mrb[51].mxu1  ;;  %v3885_v1 = vpop.f32.mrb[57].mxu0 }
 0x47e   : > { %v3486_v6 = vrot.slane %v3479_v62, %v8688_v0  ;;  %v3892_v7 = vcombine.low %v3883_v28, %v3885_v1  ;;  %v3887_v3 = vpop.f32.mrb[58].mxu0 }
 0x47f   : > { %v3888_v8 = vpop.f32.mrb[59].mxu0 }
 0x480   : > { %v3493_v27 = vrot.slane %v3486_v6, %v8688_v0  ;;  %v3899_v21 = vrot.slane %v3892_v7, %v8688_v0  ;;  %v7394_v6 = vld [vmem:[%s9318_s7 + $0x38] sm:$0xff]  }
 0x482   : > { %v3495_v11 = vadd.f32 %v3493_v27, %v3358_v26  ;;  %v3906_v30 = vrot.slane %v3899_v21, %v8688_v0  ;;  %v7391_v26 = vld [vmem:[%s9318_s7 + $0x70] sm:$0xff]  }
 0x483   : > { %6773 = vmatprep.subr.bf16.mxu0 %v7391_v26 }
 0x484   : > { %v3632_v31 = vadd.f32 %v3630_v10, %v3495_v11  ;;  %6774 = vmatpush3.bf16.msra.mxu0 %v7392_v34 }
 0x485   : > { %6775 = vmatprep.subr.bf16.mxu0 %v7393_v61 }
 0x488   : > { %6776 = vmatpush3.bf16.msra.mxu0 %v7394_v6 }
 0x492   : > { %v3745_v42 = vpop.f32.mrb[52].mxu1 }
 0x493   : > { %v3747_v12 = vpop.f32.mrb[53].mxu1 }
 0x494   : > { %v3754_v40 = vcombine.low %v3745_v42, %v3747_v12  ;;  %v3749_v13 = vpop.f32.mrb[54].mxu1  ;;  %v4157_v15 = vpop.f32.mrb[60].mxu0 }
 0x495   : > { %v3750_v14 = vpop.f32.mrb[55].mxu1  ;;  %v4159_v19 = vpop.f32.mrb[61].mxu0 }
 0x496   : > { %v3761_v22 = vrot.slane %v3754_v40, %v8688_v0  ;;  %v4166_v23 = vcombine.low %v4157_v15, %v4159_v19  ;;  %v4161_v29 = vpop.f32.mrb[62].mxu0 }
 0x497   : > { %v4162_v36 = vpop.f32.mrb[63].mxu0 }
 0x498   : > { %v3768_v57 = vrot.slane %v3761_v22, %v8688_v0  ;;  %v4173_v46 = vrot.slane %v4166_v23, %v8688_v0 }
 0x49a   : > { %v3770_v51 = vadd.f32 %v3768_v57, %v3632_v31  ;;  %v4180_v56 = vrot.slane %v4173_v46, %v8688_v0 }
 0x49c   : > { %v3908_v50 = vadd.f32 %v3906_v30, %v3770_v51 }
 0x4aa   : > { %v4020_v24 = vpop.f32.mrb[56].mxu1 }
 0x4ab   : > { %v4022_v38 = vpop.f32.mrb[57].mxu1 }
 0x4ac   : > { %v4029_v5 = vcombine.low %v4020_v24, %v4022_v38  ;;  %v4024_v43 = vpop.f32.mrb[58].mxu1  ;;  %v4431_v45 = vpop.f32.mrb[64].mxu0 }
 0x4ad   : > { %v4025_v52 = vpop.f32.mrb[59].mxu1  ;;  %v4433_v39 = vpop.f32.mrb[65].mxu0 }
 0x4ae   : > { %v4036_v33 = vrot.slane %v4029_v5, %v8688_v0  ;;  %v4440_v47 = vcombine.low %v4431_v45, %v4433_v39  ;;  %v4435_v48 = vpop.f32.mrb[66].mxu0 }
 0x4af   : > { %v4436_v53 = vpop.f32.mrb[67].mxu0 }
 0x4b0   : > { %v4043_v54 = vrot.slane %v4036_v33, %v8688_v0  ;;  %v4447_v7 = vrot.slane %v4440_v47, %v8688_v0 }
 0x4b2   : > { %v4045_v16 = vadd.f32 %v4043_v54, %v3908_v50  ;;  %v4454_v31 = vrot.slane %v4447_v7, %v8688_v0 }
 0x4b4   : > { %v4182_v4 = vadd.f32 %v4180_v56, %v4045_v16 }
 0x4c2   : > { %v4294_v60 = vpop.f32.mrb[60].mxu1 }
 0x4c3   : > { %v4296_v62 = vpop.f32.mrb[61].mxu1 }
 0x4c4   : > { %v4303_v63 = vcombine.low %v4294_v60, %v4296_v62  ;;  %v4298_v28 = vpop.f32.mrb[62].mxu1  ;;  %v4705_v20 = vpop.f32.mrb[68].mxu0 }
 0x4c5   : > { %v4299_v1 = vpop.f32.mrb[63].mxu1  ;;  %v4707_v2 = vpop.f32.mrb[69].mxu0 }
 0x4c6   : > { %v4310_v3 = vrot.slane %v4303_v63, %v8688_v0  ;;  %v4714_v8 = vcombine.low %v4705_v20, %v4707_v2  ;;  %v4709_v27 = vpop.f32.mrb[70].mxu0 }
 0x4c7   : > { %v4710_v10 = vpop.f32.mrb[71].mxu0 }
 0x4c8   : > { %v4317_v11 = vrot.slane %v4310_v3, %v8688_v0  ;;  %v4721_v23 = vrot.slane %v4714_v8, %v8688_v0 }
 0x4ca   : > { %v4319_v42 = vadd.f32 %v4317_v11, %v4182_v4  ;;  %v4728_v50 = vrot.slane %v4721_v23, %v8688_v0 }
 0x4cc   : > { %v4456_v12 = vadd.f32 %v4454_v31, %v4319_v42 }
 0x4da   : > { %v4568_v40 = vpop.f32.mrb[64].mxu1 }
 0x4db   : > { %v4570_v13 = vpop.f32.mrb[65].mxu1 }
 0x4dc   : > { %v4577_v15 = vcombine.low %v4568_v40, %v4570_v13  ;;  %v4572_v14 = vpop.f32.mrb[66].mxu1  ;;  %v4981_v19 = vpop.f32.mrb[72].mxu0 }
 0x4dd   : > { %v4573_v21 = vpop.f32.mrb[67].mxu1  ;;  %v4983_v22 = vpop.f32.mrb[73].mxu0 }
 0x4de   : > { %v4584_v29 = vrot.slane %v4577_v15, %v8688_v0  ;;  %v4990_v36 = vcombine.low %v4981_v19, %v4983_v22  ;;  %v4985_v57 = vpop.f32.mrb[74].mxu0  ;;  %v5700_v21 = vsub.s32 1, %v8670_v18  ;;  %v5696_v22 = vsub.s32 0, %v8670_v18 }
 0x4df   : > { %v4986_v30 = vpop.f32.mrb[75].mxu0 }
 0x4e0   : > { %v4591_v51 = vrot.slane %v4584_v29, %v8688_v0  ;;  %v4997_v39 = vrot.slane %v4990_v36, %v8688_v0 }
 0x4e2   : > { %v4593_v24 = vadd.f32 %v4591_v51, %v4456_v12  ;;  %v5004_v49 = vrot.slane %v4997_v39, %v8688_v0 }
 0x4e4   : > { %v4730_v32 = vadd.f32 %v4728_v50, %v4593_v24  ;;  %v5738_v50 = vld [vmem:[%s9319_s8] sm:$0x1] }
 0x4f2   : > { %v4843_v35 = vpop.f32.mrb[68].mxu1 }
 0x4f3   : > { %v4845_v37 = vpop.f32.mrb[69].mxu1 }
 0x4f4   : > { %v4852_v38 = vcombine.low %v4843_v35, %v4845_v37  ;;  %v4847_v5 = vpop.f32.mrb[70].mxu1  ;;  %v5255_v43 = vpop.f32.mrb[76].mxu0 }
 0x4f5   : > { %v4848_v45 = vpop.f32.mrb[71].mxu1  ;;  %v5257_v52 = vpop.f32.mrb[77].mxu0 }
 0x4f6   : > { %v4859_v44 = vrot.slane %v4852_v38, %v8688_v0  ;;  %v5264_v46 = vcombine.low %v5255_v43, %v5257_v52  ;;  %v5259_v33 = vpop.f32.mrb[78].mxu0 }
 0x4f7   : > { %v5260_v47 = vpop.f32.mrb[79].mxu0 }
 0x4f8   : > { %v4866_v48 = vrot.slane %v4859_v44, %v8688_v0  ;;  %v5271_v25 = vrot.slane %v5264_v46, %v8688_v0 }
 0x4fa   : > { %v4868_v53 = vadd.f32 %v4866_v48, %v4730_v32  ;;  %v5278_v61 = vrot.slane %v5271_v25, %v8688_v0 }
 0x4fc   : > { %v5006_v54 = vadd.f32 %v5004_v49, %v4868_v53 }
 0x50a   : > { %v5118_v55 = vpop.f32.mrb[72].mxu1 }
 0x50b   : > { %v5120_v56 = vpop.f32.mrb[73].mxu1 }
 0x50c   : > { %v5127_v16 = vcombine.low %v5118_v55, %v5120_v56  ;;  %v5122_v58 = vpop.f32.mrb[74].mxu1  ;;  %v5529_v4 = vpop.f32.mrb[80].mxu0 }
 0x50d   : > { %v5123_v59 = vpop.f32.mrb[75].mxu1  ;;  %v5531_v17 = vpop.f32.mrb[81].mxu0 }
 0x50e   : > { %v5134_v9 = vrot.slane %v5127_v16, %v8688_v0  ;;  %v5538_v41 = vcombine.low %v5529_v4, %v5531_v17  ;;  %v5533_v60 = vpop.f32.mrb[82].mxu0 }
 0x50f   : > { %v5534_v26 = vpop.f32.mrb[83].mxu0 }
 0x510   : > { %v5141_v34 = vrot.slane %v5134_v9, %v8688_v0  ;;  %v5545_v7 = vrot.slane %v5538_v41, %v8688_v0 }
 0x512   : > { %v5143_v62 = vadd.f32 %v5141_v34, %v5006_v54  ;;  %v5552_v27 = vrot.slane %v5545_v7, %v8688_v0 }
 0x514   : > { %v5280_v63 = vadd.f32 %v5278_v61, %v5143_v62 }
 0x522   : > { %v5392_v28 = vpop.f32.mrb[76].mxu1 }
 0x523   : > { %v5394_v20 = vpop.f32.mrb[77].mxu1 }
 0x524   : > { %v5401_v1 = vcombine.low %v5392_v28, %v5394_v20  ;;  %v5396_v2 = vpop.f32.mrb[78].mxu1 }
 0x525   : > { %v5397_v6 = vpop.f32.mrb[79].mxu1 }
 0x526   : > { %v5408_v3 = vrot.slane %v5401_v1, %v8688_v0 }
 0x528   : > { %v5415_v8 = vrot.slane %v5408_v3, %v8688_v0 }
 0x52a   : > { %v5417_v10 = vadd.f32 %v5415_v8, %v5280_v63 }
 0x52c   : > { %v5554_v11 = vadd.f32 %v5552_v27, %v5417_v10 }
 0x53a   : > { %v5666_v31 = vpop.f32.mrb[80].mxu1 }
 0x53b   : > { %v5668_v42 = vpop.f32.mrb[81].mxu1 }
 0x53c   : > { %v5675_v12 = vcombine.low %v5666_v31, %v5668_v42  ;;  %v5670_v40 = vpop.f32.mrb[82].mxu1 }
 0x53d   : > { %v5671_v13 = vpop.f32.mrb[83].mxu1 }
 0x53e   : > { %v5682_v15 = vrot.slane %v5675_v12, %v8688_v0 }
 0x540   : > { %v5689_v14 = vrot.slane %v5682_v15, %v8688_v0 }
 0x542   : > { %v5691_v19 = vadd.f32 %v5689_v14, %v5554_v11 }
 0x544   : > { %v5692_v23 = vmax.f32 %v5691_v19, 0.0 }
 0x546   : > { %v5701_v29 = vrot.slane %v5692_v23, %v5700_v21  ;;  %v5697_v36 = vrot.slane %v5692_v23, %v5696_v22 }
 0x548   : > { %v5705_v57 = vpack.c.bf16 %v5701_v29, %v5701_v29  ;;  %v5704_v30 = vpack.c.bf16 %v5697_v36, %v5697_v36 }
 0x54a   : > { %5867 = vmatprep.mubr.bf16.mxu0 %v5705_v57 }
 0x54b   : > { %5868 = vmatmul.mubr.bf16.vlgmr.msra.gmra.mrb[84].mxu0 %v5704_v30 }
 0x61e   : > { %v6777_v51 = vpop.f32.mrb[84].mxu0 }
 0x61f   : > { %v6778_v0 = vpop.f32.mrb[85].mxu0 }
 0x620   : > { %v6779_v24 = vadd.f32 %v6778_v0, %v6777_v51  ;;  %v6780_v18 = vpop.f32.mrb[86].mxu0 }
 0x621   : > { %v6781_v32 = vpop.f32.mrb[87].mxu0 }
 0x622   : > { %v5870_v35 = vadd.f32 %v6779_v24, %v5738_v50 }
 0x624   : > { %5875 = vst [vmem:[%s324_s27] sm:$0x1] %v5870_v35 }
 0x625   : > { %7410 = shalt.err (!%p7407_p3)
}
 0x626   : > { %s7411_s24 = scalar_lea.hbm %s9269_s17, 16  ;;  %s7415_s27 = scalar_lea.hbm %s9320_s9, 32 }
 0x627   : > { %p7412_p4 = scmp.ne.s32.totalorder %s9269_s17, %s7411_s24  ;;  %p7416_p9 = scmp.lt.u32.totalorder %s9269_s17, %s9320_s9 }
 0x628   : > { %p7417_p10 = scmp.lt.u32.totalorder %s7415_s27, %s7411_s24  ;;  %p7419_p12 = scmp.lt.u32.totalorder %s7411_s24, %s9269_s17 }
 0x629   : > { %p7413_p7 = pnand %p7412_p4, %p7552_p5 }
 0x62a   : > { %p7418_p11 = por %p7417_p10, %p7416_p9 }
 0x62b   : > { %p7414_p8 = pneg %p7413_p7 }
 0x62c   : > { %p7420_p13 = por %p7419_p12, %p7418_p11 }
 0x62e   : > { %p7421_p0 = pnand %p7420_p13, %p7414_p8 }
 0x630   : > { %7424 = shalt.err (!%p7421_p0)
}
 0x631   : > { %6783 = dma.vmem_to_hbm [thread:$0]  (%p7552_p5), %s9271_s29, 16, %s9269_s17, %s5877_s21  }
 0x632 PF: > { %p6789_p1 = scmp.ge.s32.totalorder %s7459_s12, 2  ;;  %s5901_s22 = sand.u32 1, %s7447_s30  }
 0x633   : > { %s5902_s13 = scalar_lea.sflag [#allocation3], %s5901_s22 }
 0x634   : > { %p6786_p2 = pnand %p6789_p1, %p7556_p6 }
 0x636   : > { %7442 = dma.done.wait (!%p6786_p2), %s5902_s13, 16  }
 0x637   : > { %7444 = vsyncadd (!%p6786_p2), %s5902_s13, 4294967280  ;;  %p19_p3 = scmp.ge.s32.totalorder %s7539_s15, 4   ;;  %s9323_s30 = smov %s7451_s10 }
 0x638   : > { %s9324_s10 = smov %s7455_s11  ;;  %s9325_s11 = smov %s7550_s18 }
 0x639   : > { %s9326_s12 = smov %s7539_s15  ;;  %21 = sbr.rel (!%p19_p3) target bundleno = 3 (0x3), region = 122 }
 0x640   :  { %5906 = vsyncpa [#allocation3], 1 }
 0x641   :  { %5908 = vsyncpa [#allocation3 + $0x1], 1 }

</bundles_post_ra>
